<compile_context>
chip_gen: v5e
topology: v5e:2x2
jax: 0.10.0
libtpu: 0.0.40
codegen_flags: <defaults>
</compile_context>

<pallas_src>
import functools
import math

import jax
import jax.numpy as jnp
from jax.experimental import pallas as pl
from jax.experimental.pallas import tpu as pltpu

# ---- model hyper-parameters (module defaults, smaller num_layers for demo) --
INPUT_DIM = 8
D_MODEL = 64
NHEAD = 8
HEAD_DIM = D_MODEL // NHEAD
FF_DIM = 4 * D_MODEL
NUM_LAYERS = 2            # demo-sized stack (nn default is 6)
OUTPUT_DIM = 1
LN_EPS = 1e-5             # nn.LayerNorm default
MAX_LEN = 1000            # PositionalEncoding buffer length used by the module


def _layer_norm(x, w, b):
    # Biased variance, f32 statistics (matches nn.LayerNorm).
    mean = jnp.mean(x, axis=-1, keepdims=True)
    var = jnp.mean((x - mean) ** 2, axis=-1, keepdims=True)
    return (x - mean) * jax.lax.rsqrt(var + LN_EPS) * w + b


def _split_heads(x2d, bt, s):
    """(bt*s, D) f32 -> (bt*NHEAD, s, HEAD_DIM) bf16."""
    x4 = x2d.reshape(bt, s, NHEAD, HEAD_DIM)
    x4 = jnp.transpose(x4, (0, 2, 1, 3))                 # (bt, H, s, hd)
    return x4.reshape(bt * NHEAD, s, HEAD_DIM).astype(jnp.bfloat16)


def _merge_heads(ctx, bt, s):
    """(bt*NHEAD, s, HEAD_DIM) f32 -> (bt*s, D) f32."""
    c4 = ctx.reshape(bt, NHEAD, s, HEAD_DIM)
    c4 = jnp.transpose(c4, (0, 2, 1, 3))                  # (bt, s, H, hd)
    return c4.reshape(bt * s, D_MODEL)


def _mha(q2d, k2d, v2d, bt, sq, sk):
    """Multi-head attention batched over (bt*NHEAD); bf16 MXU, f32 stats."""
    scale = 1.0 / math.sqrt(HEAD_DIM)
    qb = _split_heads(q2d, bt, sq)
    kb = _split_heads(k2d, bt, sk)
    vb = _split_heads(v2d, bt, sk)
    # TODO(synk): for S >~ 512 switch to online-softmax over key tiles so the
    # (bt*H, sq, sk) score tensor fits v7x's 64 MiB VMEM.
    s = jnp.einsum('bqd,bkd->bqk', qb, kb,
                   preferred_element_type=jnp.float32) * scale
    s = s - jnp.max(s, axis=-1, keepdims=True)            # f32 softmax stats
    p = jnp.exp(s)
    # Approx reciprocal runs on the EUP slot; rows sum to ~1 (not exactly 1).
    p = p * pl.reciprocal(jnp.sum(p, axis=-1, keepdims=True), approx=True)
    ctx = jnp.einsum('bqk,bkd->bqd', p.astype(jnp.bfloat16), vb,
                     preferred_element_type=jnp.float32)
    return _merge_heads(ctx, bt, sq)


# ------------------------------ fused kernel -------------------------------- #
def _fused_kernel(src_ref, pe_ref, w_in_ref, b_in_ref,
                  wqkv_ref, bqkv_ref, wo_ref, bo_ref,
                  ln1w_ref, ln1b_ref, w1_ref, b1_ref, w2_ref, b2_ref,
                  ln2w_ref, ln2b_ref, w_out_ref, b_out_ref, o_ref,
                  *, seq_out):
    """One grid step == Bt batch elements; everything stays in VMEM."""
    bt, s_len = src_ref.shape[0], src_ref.shape[1]
    m = bt * s_len

    def matmul(x, w, bias):
        return jnp.dot(x.astype(jnp.bfloat16), w,
                       preferred_element_type=jnp.float32) + bias

    # ---- input projection (sqrt(d_model) pre-folded) + positional encoding --
    x = matmul(src_ref[...].reshape(m, INPUT_DIM), w_in_ref[...], b_in_ref[...])
    x = (x.reshape(bt, s_len, D_MODEL) + pe_ref[...]).reshape(m, D_MODEL)
    # TODO(synk): nn.Dropout is identity in eval mode; no stochastic dropout.

    def encoder_layer(x_kv_flat, x_q_flat, sq, l):
        """Post-norm TransformerEncoderLayer; queries restricted to sq rows."""
        qkv = matmul(x_kv_flat, wqkv_ref[l], bqkv_ref[l])         # (m, 3D)
        k2d = qkv[:, D_MODEL:2 * D_MODEL]
        v2d = qkv[:, 2 * D_MODEL:3 * D_MODEL]
        if sq == s_len:
            q2d = qkv[:, 0:D_MODEL]
        else:
            q2d = qkv.reshape(bt, s_len, 3 * D_MODEL)[
                :, s_len - sq:, 0:D_MODEL].reshape(bt * sq, D_MODEL)
        attn = _mha(q2d, k2d, v2d, bt, sq, s_len)
        attn = matmul(attn, wo_ref[l], bo_ref[l])
        x1 = _layer_norm(x_q_flat + attn, ln1w_ref[l], ln1b_ref[l])   # norm1
        h1 = jnp.maximum(matmul(x1, w1_ref[l], b1_ref[l]), 0.0)       # relu
        ff = matmul(h1, w2_ref[l], b2_ref[l])
        return _layer_norm(x1 + ff, ln2w_ref[l], ln2b_ref[l])         # norm2

    # Layers 0 .. L-2 on the full sequence.
    for l in range(NUM_LAYERS - 1):
        x = encoder_layer(x, x, s_len, l)

    # Last layer: only the last seq_out query positions feed the output.
    x_tail = x.reshape(bt, s_len, D_MODEL)[:, s_len - seq_out:, :]
    x_tail = x_tail.reshape(bt * seq_out, D_MODEL)
    xf = encoder_layer(x, x_tail, seq_out, NUM_LAYERS - 1)

    # ---- output projection (OUTPUT_DIM == 1): VPU multiply + lane reduce ----
    out = jnp.sum(xf.reshape(bt, seq_out, D_MODEL) * w_out_ref[...], axis=-1)
    o_ref[...] = out + b_out_ref[...]           # lane-dense (bt, seq_out) store


# ------------------------------ JAX wrapper --------------------------------- #
def _choose_batch_tile(b):
    """Batch rows per grid step: large enough to fill the MXU M dimension,
    while keeping >=2 grid steps when possible (v7x megacore) and keeping the
    output block's sublane dim a multiple of 8 (or the full batch)."""
    for bt in (16, 8):
        if b % bt == 0 and b // bt >= 2:
            return bt
    return b


def _const_spec(w):
    nd = w.ndim
    return pl.BlockSpec(w.shape, lambda g, _nd=nd: (0,) * _nd)


def _cost_estimate(b, s, seq_out, weight_bytes):
    d, ff, h = D_MODEL, FF_DIM, NHEAD
    flops = 2 * b * s * INPUT_DIM * d                          # input proj
    transcendentals = 0
    for l in range(NUM_LAYERS):
        q_rows = s if l < NUM_LAYERS - 1 else seq_out
        flops += 2 * b * s * d * (3 * d)                       # fused QKV
        flops += 4 * b * q_rows * s * d                        # scores + ctx
        flops += 2 * b * q_rows * d * d                        # attn out proj
        flops += 4 * b * q_rows * d * ff                       # FFN matmuls
        transcendentals += b * h * q_rows * s                  # softmax exp
    flops += 2 * b * seq_out * d                               # output reduce
    bytes_accessed = 4 * b * s * INPUT_DIM + 4 * b * seq_out + weight_bytes
    return pl.CostEstimate(flops=flops, transcendentals=transcendentals,
                           bytes_accessed=bytes_accessed)


def power_transformer_forward(kparams, src, seq_len):
    """src: (B, S, input_dim) f32 -> (B, seq_len, output_dim) f32."""
    b, s, in_dim = src.shape
    assert in_dim == INPUT_DIM
    assert seq_len <= s, "seq_len must not exceed the source sequence length"
    bt = _choose_batch_tile(b)
    assert b % bt == 0

    kernel = functools.partial(_fused_kernel, seq_out=seq_len)

    const_weights = (kparams['w_in'], kparams['b_in'],
                     kparams['wqkv'], kparams['bqkv'],
                     kparams['wo'], kparams['bo'],
                     kparams['ln1w'], kparams['ln1b'],
                     kparams['w1'], kparams['b1'],
                     kparams['w2'], kparams['b2'],
                     kparams['ln2w'], kparams['ln2b'],
                     kparams['w_out'], kparams['b_out'])

    in_specs = [
        pl.BlockSpec((bt, s, INPUT_DIM), lambda g: (g, 0, 0)),
        # pe[:S] window taken by the index_map (no wrapper-side slice/copy).
        pl.BlockSpec((s, D_MODEL), lambda g: (0, 0)),
    ] + [_const_spec(w) for w in const_weights]

    weight_bytes = sum(int(w.size) * w.dtype.itemsize
                       for w in (kparams['pe'],) + const_weights)

    out = pl.pallas_call(
        kernel,
        grid=(b // bt,),
        out_shape=jax.ShapeDtypeStruct((b, seq_len), jnp.float32),
        in_specs=in_specs,
        out_specs=pl.BlockSpec((bt, seq_len), lambda g: (g, 0)),
        compiler_params=pltpu.CompilerParams(
            dimension_semantics=("parallel",),        # megacore split on v7x
            vmem_limit_bytes=32 * 1024 * 1024),       # v5e default is 16 MiB
        cost_estimate=_cost_estimate(b, s, seq_len, weight_bytes),
    )(src, kparams['pe'], *const_weights)

    return out.reshape(b, seq_len, OUTPUT_DIM)        # kernel output lane-dense


# ------------------------------ parameters ---------------------------------- #
def sinusoidal_pe(length, d_model):
    position = jnp.arange(length, dtype=jnp.float32)[:, None]
    div_term = jnp.exp(jnp.arange(0, d_model, 2, dtype=jnp.float32) *
                       (-math.log(10000.0) / d_model))
    pe = jnp.zeros((length, d_model), jnp.float32)
    pe = pe.at[:, 0::2].set(jnp.sin(position * div_term))
    pe = pe.at[:, 1::2].set(jnp.cos(position * div_term))
    return pe


def init_params(key):
    def dense(k, fan_in, fan_out):
        return jax.random.normal(k, (fan_in, fan_out), jnp.float32) * 0.02

    def bias(k, n):
        return jax.random.normal(k, (1, n), jnp.float32) * 0.02

    keys = jax.random.split(key, 4 + NUM_LAYERS)
    params = {
        'w_in': dense(keys[0], INPUT_DIM, D_MODEL),
        'b_in': bias(keys[1], D_MODEL),
        'w_out': dense(keys[2], D_MODEL, OUTPUT_DIM),
        'b_out': bias(keys[3], OUTPUT_DIM),
        'layers': [],
    }
    for l in range(NUM_LAYERS):
        k = jax.random.split(keys[4 + l], 12)
        params['layers'].append(dict(
            wq=dense(k[0], D_MODEL, D_MODEL), bq=bias(k[1], D_MODEL),
            wk=dense(k[2], D_MODEL, D_MODEL), bk=bias(k[3], D_MODEL),
            wv=dense(k[4], D_MODEL, D_MODEL), bv=bias(k[5], D_MODEL),
            wo=dense(k[6], D_MODEL, D_MODEL), bo=bias(k[7], D_MODEL),
            ln1w=jnp.ones((1, D_MODEL), jnp.float32),
            ln1b=jnp.zeros((1, D_MODEL), jnp.float32),
            w1=dense(k[8], D_MODEL, FF_DIM), b1=bias(k[9], FF_DIM),
            w2=dense(k[10], FF_DIM, D_MODEL), b2=bias(k[11], D_MODEL),
            ln2w=jnp.ones((1, D_MODEL), jnp.float32),
            ln2b=jnp.zeros((1, D_MODEL), jnp.float32),
        ))
    return params


def pack_params(params):
    """Fuse QKV, stack per-layer weights, pre-fold sqrt(d_model), cast matmul
    weights to bf16 (biases / LN params / output head stay f32)."""
    sq = math.sqrt(D_MODEL)
    layers = params['layers']
    stack = lambda key: jnp.stack([l[key] for l in layers], axis=0)
    wqkv = jnp.stack([jnp.concatenate([l['wq'], l['wk'], l['wv']], axis=1)
                      for l in layers], axis=0)               # (L, D, 3D)
    bqkv = jnp.stack([jnp.concatenate([l['bq'], l['bk'], l['bv']], axis=1)
                      for l in layers], axis=0)               # (L, 1, 3D)
    return {
        'pe': sinusoidal_pe(MAX_LEN, D_MODEL),                # (MAX_LEN, D)
        'w_in': (params['w_in'] * sq).astype(jnp.bfloat16),   # sqrt(d) folded
        'b_in': params['b_in'] * sq,
        'wqkv': wqkv.astype(jnp.bfloat16), 'bqkv': bqkv,
        'wo': stack('wo').astype(jnp.bfloat16), 'bo': stack('bo'),
        'ln1w': stack('ln1w'), 'ln1b': stack('ln1b'),
        'w1': stack('w1').astype(jnp.bfloat16), 'b1': stack('b1'),
        'w2': stack('w2').astype(jnp.bfloat16), 'b2': stack('b2'),
        'ln2w': stack('ln2w'), 'ln2b': stack('ln2b'),
        'w_out': params['w_out'].T,                           # (1, D) f32
        'b_out': params['b_out'],                             # (1, 1) f32
    }


if __name__ == "__main__":
    key = jax.random.PRNGKey(0)
    k_param, k_src = jax.random.split(key)

    B, S, seq_len = 2, 8, 4
    params = init_params(k_param)
    kparams = pack_params(params)
    src = jax.random.normal(k_src, (B, S, INPUT_DIM), jnp.float32)

    out = power_transformer_forward(kparams, src, seq_len)
    out = jax.block_until_ready(out)
    assert out.shape == (B, seq_len, OUTPUT_DIM), out.shape
    assert bool(jnp.all(jnp.isfinite(out)))
    print("KERNEL_OK")
</pallas_src>

<mosaic_0001>
module attributes {stable_mosaic.version = 11 : i64} {
  func.func @_fused_kernel(%arg0: i32, %arg1: memref<2x8x8xf32, #tpu.memory_space<vmem>>, %arg2: memref<8x64xf32, #tpu.memory_space<vmem>>, %arg3: memref<8x64xbf16, #tpu.memory_space<vmem>>, %arg4: memref<1x64xf32, #tpu.memory_space<vmem>>, %arg5: memref<2x64x192xbf16, #tpu.memory_space<vmem>>, %arg6: memref<2x1x192xf32, #tpu.memory_space<vmem>>, %arg7: memref<2x64x64xbf16, #tpu.memory_space<vmem>>, %arg8: memref<2x1x64xf32, #tpu.memory_space<vmem>>, %arg9: memref<2x1x64xf32, #tpu.memory_space<vmem>>, %arg10: memref<2x1x64xf32, #tpu.memory_space<vmem>>, %arg11: memref<2x64x256xbf16, #tpu.memory_space<vmem>>, %arg12: memref<2x1x256xf32, #tpu.memory_space<vmem>>, %arg13: memref<2x256x64xbf16, #tpu.memory_space<vmem>>, %arg14: memref<2x1x64xf32, #tpu.memory_space<vmem>>, %arg15: memref<2x1x64xf32, #tpu.memory_space<vmem>>, %arg16: memref<2x1x64xf32, #tpu.memory_space<vmem>>, %arg17: memref<1x64xf32, #tpu.memory_space<vmem>>, %arg18: memref<1x1xf32, #tpu.memory_space<vmem>>, %arg19: memref<2x4xf32, #tpu.memory_space<vmem>>) attributes {dimension_semantics = [#tpu.dimension_semantics<parallel>], iteration_bounds = array<i64: 1>, scalar_prefetch = 0 : i64, scratch_operands = 0 : i64, tpu.core_type = #tpu.core_type<tc>, window_params = [{transform_indices = @transform_0, window_bounds = array<i64: 2, 8, 8>}, {transform_indices = @transform_1, window_bounds = array<i64: 8, 64>}, {pipeline_mode = #tpu.pipeline_mode<synchronous>, transform_indices = @transform_2, window_bounds = array<i64: 8, 64>}, {pipeline_mode = #tpu.pipeline_mode<synchronous>, transform_indices = @transform_3, window_bounds = array<i64: 1, 64>}, {pipeline_mode = #tpu.pipeline_mode<synchronous>, transform_indices = @transform_4, window_bounds = array<i64: 2, 64, 192>}, {pipeline_mode = #tpu.pipeline_mode<synchronous>, transform_indices = @transform_5, window_bounds = array<i64: 2, 1, 192>}, {pipeline_mode = #tpu.pipeline_mode<synchronous>, transform_indices = @transform_6, window_bounds = array<i64: 2, 64, 64>}, {pipeline_mode = #tpu.pipeline_mode<synchronous>, transform_indices = @transform_7, window_bounds = array<i64: 2, 1, 64>}, {pipeline_mode = #tpu.pipeline_mode<synchronous>, transform_indices = @transform_8, window_bounds = array<i64: 2, 1, 64>}, {pipeline_mode = #tpu.pipeline_mode<synchronous>, transform_indices = @transform_9, window_bounds = array<i64: 2, 1, 64>}, {pipeline_mode = #tpu.pipeline_mode<synchronous>, transform_indices = @transform_10, window_bounds = array<i64: 2, 64, 256>}, {pipeline_mode = #tpu.pipeline_mode<synchronous>, transform_indices = @transform_11, window_bounds = array<i64: 2, 1, 256>}, {pipeline_mode = #tpu.pipeline_mode<synchronous>, transform_indices = @transform_12, window_bounds = array<i64: 2, 256, 64>}, {pipeline_mode = #tpu.pipeline_mode<synchronous>, transform_indices = @transform_13, window_bounds = array<i64: 2, 1, 64>}, {pipeline_mode = #tpu.pipeline_mode<synchronous>, transform_indices = @transform_14, window_bounds = array<i64: 2, 1, 64>}, {pipeline_mode = #tpu.pipeline_mode<synchronous>, transform_indices = @transform_15, window_bounds = array<i64: 2, 1, 64>}, {pipeline_mode = #tpu.pipeline_mode<synchronous>, transform_indices = @transform_16, window_bounds = array<i64: 1, 64>}, {pipeline_mode = #tpu.pipeline_mode<synchronous>, transform_indices = @transform_17, window_bounds = array<i64: 1, 1>}, {transform_indices = @transform_18, window_bounds = array<i64: 2, 4>}]} {
    %c0 = arith.constant 0 : index
    %c0_0 = arith.constant 0 : index
    %c0_1 = arith.constant 0 : index
    %0 = vector.load %arg1[%c0, %c0_0, %c0_1] : memref<2x8x8xf32, #tpu.memory_space<vmem>>, vector<2x8x8xf32>
    %1 = vector.shape_cast %0 : vector<2x8x8xf32> to vector<16x8xf32>
    %c0_2 = arith.constant 0 : index
    %c0_3 = arith.constant 0 : index
    %2 = vector.load %arg3[%c0_2, %c0_3] : memref<8x64xbf16, #tpu.memory_space<vmem>>, vector<8x64xbf16>
    %c0_4 = arith.constant 0 : index
    %c0_5 = arith.constant 0 : index
    %3 = vector.load %arg4[%c0_4, %c0_5] : memref<1x64xf32, #tpu.memory_space<vmem>>, vector<1x64xf32>
    %4 = arith.truncf %1 : vector<16x8xf32> to vector<16x8xbf16>
    %cst = arith.constant dense<0.000000e+00> : vector<16x64xf32>
    %5 = tpu.matmul %4, %2, %cst {dimension_numbers = #tpu.dot_dimension_numbers<[1], [0], [0], [1], [0, 0, 1, 1], [], []>} : vector<16x8xbf16>, vector<8x64xbf16>, vector<16x64xf32> -> vector<16x64xf32>
    %6 = vector.broadcast %3 : vector<1x64xf32> to vector<16x64xf32>
    %7 = arith.addf %5, %6 : vector<16x64xf32>
    %8 = vector.shape_cast %7 : vector<16x64xf32> to vector<2x8x64xf32>
    %c0_6 = arith.constant 0 : index
    %c0_7 = arith.constant 0 : index
    %9 = vector.load %arg2[%c0_6, %c0_7] : memref<8x64xf32, #tpu.memory_space<vmem>>, vector<8x64xf32>
    %10 = vector.shape_cast %9 : vector<8x64xf32> to vector<1x8x64xf32>
    %11 = vector.broadcast %10 : vector<1x8x64xf32> to vector<2x8x64xf32>
    %12 = arith.addf %8, %11 : vector<2x8x64xf32>
    %13 = vector.shape_cast %12 : vector<2x8x64xf32> to vector<16x64xf32>
    %c0_8 = arith.constant 0 : index
    %c0_9 = arith.constant 0 : index
    %c0_10 = arith.constant 0 : index
    %14 = vector.load %arg5[%c0_8, %c0_9, %c0_10] : memref<2x64x192xbf16, #tpu.memory_space<vmem>>, vector<1x64x192xbf16>
    %15 = vector.shape_cast %14 : vector<1x64x192xbf16> to vector<64x192xbf16>
    %c0_11 = arith.constant 0 : index
    %c0_12 = arith.constant 0 : index
    %c0_13 = arith.constant 0 : index
    %16 = vector.load %arg6[%c0_11, %c0_12, %c0_13] : memref<2x1x192xf32, #tpu.memory_space<vmem>>, vector<1x1x192xf32>
    %17 = vector.shape_cast %16 : vector<1x1x192xf32> to vector<1x192xf32>
    %18 = arith.truncf %13 : vector<16x64xf32> to vector<16x64xbf16>
    %cst_14 = arith.constant dense<0.000000e+00> : vector<16x192xf32>
    %19 = tpu.matmul %18, %15, %cst_14 {dimension_numbers = #tpu.dot_dimension_numbers<[1], [0], [0], [1], [0, 0, 1, 1], [], []>} : vector<16x64xbf16>, vector<64x192xbf16>, vector<16x192xf32> -> vector<16x192xf32>
    %20 = vector.broadcast %17 : vector<1x192xf32> to vector<16x192xf32>
    %21 = arith.addf %19, %20 : vector<16x192xf32>
    %22 = vector.extract_strided_slice %21 {offsets = [0, 64], sizes = [16, 64], strides = [1, 1]} : vector<16x192xf32> to vector<16x64xf32>
    %23 = vector.extract_strided_slice %21 {offsets = [0, 128], sizes = [16, 64], strides = [1, 1]} : vector<16x192xf32> to vector<16x64xf32>
    %24 = vector.extract_strided_slice %21 {offsets = [0, 0], sizes = [16, 64], strides = [1, 1]} : vector<16x192xf32> to vector<16x64xf32>
    %25 = vector.shape_cast %24 : vector<16x64xf32> to vector<2x8x8x8xf32>
    %26 = tpu.transpose %25, [0, 2, 1, 3] : vector<2x8x8x8xf32> -> vector<2x8x8x8xf32>
    %27 = vector.shape_cast %26 : vector<2x8x8x8xf32> to vector<16x8x8xf32>
    %28 = arith.truncf %27 : vector<16x8x8xf32> to vector<16x8x8xbf16>
    %29 = vector.shape_cast %22 : vector<16x64xf32> to vector<2x8x8x8xf32>
    %30 = tpu.transpose %29, [0, 2, 1, 3] : vector<2x8x8x8xf32> -> vector<2x8x8x8xf32>
    %31 = vector.shape_cast %30 : vector<2x8x8x8xf32> to vector<16x8x8xf32>
    %32 = arith.truncf %31 : vector<16x8x8xf32> to vector<16x8x8xbf16>
    %33 = vector.shape_cast %23 : vector<16x64xf32> to vector<2x8x8x8xf32>
    %34 = tpu.transpose %33, [0, 2, 1, 3] : vector<2x8x8x8xf32> -> vector<2x8x8x8xf32>
    %35 = vector.shape_cast %34 : vector<2x8x8x8xf32> to vector<16x8x8xf32>
    %36 = arith.truncf %35 : vector<16x8x8xf32> to vector<16x8x8xbf16>
    "tpu.trace_start"() <{level = 10 : i32, message = "bqd,bkd->bqk"}> : () -> ()
    %cst_15 = arith.constant dense<0.000000e+00> : vector<16x8x8xf32>
    %37 = tpu.matmul %28, %32, %cst_15 {dimension_numbers = #tpu.dot_dimension_numbers<[2], [2], [1], [1], [0, 0, 0, 1, 1, 1], [0], [0]>} : vector<16x8x8xbf16>, vector<16x8x8xbf16>, vector<16x8x8xf32> -> vector<16x8x8xf32>
    "tpu.trace_stop"() : () -> ()
    %cst_16 = arith.constant 0.353553385 : f32
    %38 = vector.broadcast %cst_16 : f32 to vector<16x8x8xf32>
    %39 = arith.mulf %37, %38 : vector<16x8x8xf32>
    %cst_17 = arith.constant dense<0xFF800000> : vector<16x8xf32>
    %40 = vector.multi_reduction <maximumf>, %39, %cst_17 [2] : vector<16x8x8xf32> to vector<16x8xf32>
    %41 = vector.shape_cast %40 : vector<16x8xf32> to vector<16x8x1xf32>
    %42 = vector.broadcast %41 : vector<16x8x1xf32> to vector<16x8x8xf32>
    %43 = arith.subf %39, %42 : vector<16x8x8xf32>
    %44 = math.exp %43 : vector<16x8x8xf32>
    %cst_18 = arith.constant dense<0.000000e+00> : vector<16x8xf32>
    %45 = vector.multi_reduction <add>, %44, %cst_18 [2] : vector<16x8x8xf32> to vector<16x8xf32>
    %46 = vector.shape_cast %45 : vector<16x8xf32> to vector<16x8x1xf32>
    %47 = tpu.reciprocal %46 {approx = true} : vector<16x8x1xf32> -> vector<16x8x1xf32>
    %48 = vector.broadcast %47 : vector<16x8x1xf32> to vector<16x8x8xf32>
    %49 = arith.mulf %44, %48 : vector<16x8x8xf32>
    %50 = arith.truncf %49 : vector<16x8x8xf32> to vector<16x8x8xbf16>
    "tpu.trace_start"() <{level = 10 : i32, message = "bqk,bkd->bqd"}> : () -> ()
    %cst_19 = arith.constant dense<0.000000e+00> : vector<16x8x8xf32>
    %51 = tpu.matmul %50, %36, %cst_19 {dimension_numbers = #tpu.dot_dimension_numbers<[2], [1], [1], [2], [0, 0, 0, 1, 1, 2], [0], [0]>} : vector<16x8x8xbf16>, vector<16x8x8xbf16>, vector<16x8x8xf32> -> vector<16x8x8xf32>
    "tpu.trace_stop"() : () -> ()
    %52 = vector.shape_cast %51 : vector<16x8x8xf32> to vector<2x8x8x8xf32>
    %53 = tpu.transpose %52, [0, 2, 1, 3] : vector<2x8x8x8xf32> -> vector<2x8x8x8xf32>
    %54 = vector.shape_cast %53 : vector<2x8x8x8xf32> to vector<16x64xf32>
    %c0_20 = arith.constant 0 : index
    %c0_21 = arith.constant 0 : index
    %c0_22 = arith.constant 0 : index
    %55 = vector.load %arg7[%c0_20, %c0_21, %c0_22] : memref<2x64x64xbf16, #tpu.memory_space<vmem>>, vector<1x64x64xbf16>
    %56 = vector.shape_cast %55 : vector<1x64x64xbf16> to vector<64x64xbf16>
    %c0_23 = arith.constant 0 : index
    %c0_24 = arith.constant 0 : index
    %c0_25 = arith.constant 0 : index
    %57 = vector.load %arg8[%c0_23, %c0_24, %c0_25] : memref<2x1x64xf32, #tpu.memory_space<vmem>>, vector<1x1x64xf32>
    %58 = vector.shape_cast %57 : vector<1x1x64xf32> to vector<1x64xf32>
    %59 = arith.truncf %54 : vector<16x64xf32> to vector<16x64xbf16>
    %cst_26 = arith.constant dense<0.000000e+00> : vector<16x64xf32>
    %60 = tpu.matmul %59, %56, %cst_26 {dimension_numbers = #tpu.dot_dimension_numbers<[1], [0], [0], [1], [0, 0, 1, 1], [], []>} : vector<16x64xbf16>, vector<64x64xbf16>, vector<16x64xf32> -> vector<16x64xf32>
    %61 = vector.broadcast %58 : vector<1x64xf32> to vector<16x64xf32>
    %62 = arith.addf %60, %61 : vector<16x64xf32>
    %63 = arith.addf %13, %62 : vector<16x64xf32>
    %c0_27 = arith.constant 0 : index
    %c0_28 = arith.constant 0 : index
    %c0_29 = arith.constant 0 : index
    %64 = vector.load %arg9[%c0_27, %c0_28, %c0_29] : memref<2x1x64xf32, #tpu.memory_space<vmem>>, vector<1x1x64xf32>
    %65 = vector.shape_cast %64 : vector<1x1x64xf32> to vector<1x64xf32>
    %c0_30 = arith.constant 0 : index
    %c0_31 = arith.constant 0 : index
    %c0_32 = arith.constant 0 : index
    %66 = vector.load %arg10[%c0_30, %c0_31, %c0_32] : memref<2x1x64xf32, #tpu.memory_space<vmem>>, vector<1x1x64xf32>
    %67 = vector.shape_cast %66 : vector<1x1x64xf32> to vector<1x64xf32>
    %cst_33 = arith.constant dense<0.000000e+00> : vector<16xf32>
    %68 = vector.multi_reduction <add>, %63, %cst_33 [1] : vector<16x64xf32> to vector<16xf32>
    %69 = vector.shape_cast %68 : vector<16xf32> to vector<16x1xf32>
    %cst_34 = arith.constant 6.400000e+01 : f32
    %70 = vector.broadcast %cst_34 : f32 to vector<16x1xf32>
    %71 = arith.divf %69, %70 : vector<16x1xf32>
    %72 = vector.broadcast %71 : vector<16x1xf32> to vector<16x64xf32>
    %73 = arith.subf %63, %72 : vector<16x64xf32>
    %74 = arith.mulf %73, %73 : vector<16x64xf32>
    %cst_35 = arith.constant dense<0.000000e+00> : vector<16xf32>
    %75 = vector.multi_reduction <add>, %74, %cst_35 [1] : vector<16x64xf32> to vector<16xf32>
    %76 = vector.shape_cast %75 : vector<16xf32> to vector<16x1xf32>
    %cst_36 = arith.constant 6.400000e+01 : f32
    %77 = vector.broadcast %cst_36 : f32 to vector<16x1xf32>
    %78 = arith.divf %76, %77 : vector<16x1xf32>
    %79 = vector.broadcast %71 : vector<16x1xf32> to vector<16x64xf32>
    %80 = arith.subf %63, %79 : vector<16x64xf32>
    %cst_37 = arith.constant 9.99999974E-6 : f32
    %81 = vector.broadcast %cst_37 : f32 to vector<16x1xf32>
    %82 = arith.addf %78, %81 : vector<16x1xf32>
    %83 = math.rsqrt %82 : vector<16x1xf32>
    %84 = vector.broadcast %83 : vector<16x1xf32> to vector<16x64xf32>
    %85 = arith.mulf %80, %84 : vector<16x64xf32>
    %86 = vector.broadcast %65 : vector<1x64xf32> to vector<16x64xf32>
    %87 = arith.mulf %85, %86 : vector<16x64xf32>
    %88 = vector.broadcast %67 : vector<1x64xf32> to vector<16x64xf32>
    %89 = arith.addf %87, %88 : vector<16x64xf32>
    %c0_38 = arith.constant 0 : index
    %c0_39 = arith.constant 0 : index
    %c0_40 = arith.constant 0 : index
    %90 = vector.load %arg11[%c0_38, %c0_39, %c0_40] : memref<2x64x256xbf16, #tpu.memory_space<vmem>>, vector<1x64x256xbf16>
    %91 = vector.shape_cast %90 : vector<1x64x256xbf16> to vector<64x256xbf16>
    %c0_41 = arith.constant 0 : index
    %c0_42 = arith.constant 0 : index
    %c0_43 = arith.constant 0 : index
    %92 = vector.load %arg12[%c0_41, %c0_42, %c0_43] : memref<2x1x256xf32, #tpu.memory_space<vmem>>, vector<1x1x256xf32>
    %93 = vector.shape_cast %92 : vector<1x1x256xf32> to vector<1x256xf32>
    %94 = arith.truncf %89 : vector<16x64xf32> to vector<16x64xbf16>
    %cst_44 = arith.constant dense<0.000000e+00> : vector<16x256xf32>
    %95 = tpu.matmul %94, %91, %cst_44 {dimension_numbers = #tpu.dot_dimension_numbers<[1], [0], [0], [1], [0, 0, 1, 1], [], []>} : vector<16x64xbf16>, vector<64x256xbf16>, vector<16x256xf32> -> vector<16x256xf32>
    %96 = vector.broadcast %93 : vector<1x256xf32> to vector<16x256xf32>
    %97 = arith.addf %95, %96 : vector<16x256xf32>
    %cst_45 = arith.constant 0.000000e+00 : f32
    %98 = vector.broadcast %cst_45 : f32 to vector<16x256xf32>
    %99 = arith.maximumf %97, %98 : vector<16x256xf32>
    %c0_46 = arith.constant 0 : index
    %c0_47 = arith.constant 0 : index
    %c0_48 = arith.constant 0 : index
    %100 = vector.load %arg13[%c0_46, %c0_47, %c0_48] : memref<2x256x64xbf16, #tpu.memory_space<vmem>>, vector<1x256x64xbf16>
    %101 = vector.shape_cast %100 : vector<1x256x64xbf16> to vector<256x64xbf16>
    %c0_49 = arith.constant 0 : index
    %c0_50 = arith.constant 0 : index
    %c0_51 = arith.constant 0 : index
    %102 = vector.load %arg14[%c0_49, %c0_50, %c0_51] : memref<2x1x64xf32, #tpu.memory_space<vmem>>, vector<1x1x64xf32>
    %103 = vector.shape_cast %102 : vector<1x1x64xf32> to vector<1x64xf32>
    %104 = arith.truncf %99 : vector<16x256xf32> to vector<16x256xbf16>
    %cst_52 = arith.constant dense<0.000000e+00> : vector<16x64xf32>
    %105 = tpu.matmul %104, %101, %cst_52 {dimension_numbers = #tpu.dot_dimension_numbers<[1], [0], [0], [1], [0, 0, 1, 1], [], []>} : vector<16x256xbf16>, vector<256x64xbf16>, vector<16x64xf32> -> vector<16x64xf32>
    %106 = vector.broadcast %103 : vector<1x64xf32> to vector<16x64xf32>
    %107 = arith.addf %105, %106 : vector<16x64xf32>
    %108 = arith.addf %89, %107 : vector<16x64xf32>
    %c0_53 = arith.constant 0 : index
    %c0_54 = arith.constant 0 : index
    %c0_55 = arith.constant 0 : index
    %109 = vector.load %arg15[%c0_53, %c0_54, %c0_55] : memref<2x1x64xf32, #tpu.memory_space<vmem>>, vector<1x1x64xf32>
    %110 = vector.shape_cast %109 : vector<1x1x64xf32> to vector<1x64xf32>
    %c0_56 = arith.constant 0 : index
    %c0_57 = arith.constant 0 : index
    %c0_58 = arith.constant 0 : index
    %111 = vector.load %arg16[%c0_56, %c0_57, %c0_58] : memref<2x1x64xf32, #tpu.memory_space<vmem>>, vector<1x1x64xf32>
    %112 = vector.shape_cast %111 : vector<1x1x64xf32> to vector<1x64xf32>
    %cst_59 = arith.constant dense<0.000000e+00> : vector<16xf32>
    %113 = vector.multi_reduction <add>, %108, %cst_59 [1] : vector<16x64xf32> to vector<16xf32>
    %114 = vector.shape_cast %113 : vector<16xf32> to vector<16x1xf32>
    %cst_60 = arith.constant 6.400000e+01 : f32
    %115 = vector.broadcast %cst_60 : f32 to vector<16x1xf32>
    %116 = arith.divf %114, %115 : vector<16x1xf32>
    %117 = vector.broadcast %116 : vector<16x1xf32> to vector<16x64xf32>
    %118 = arith.subf %108, %117 : vector<16x64xf32>
    %119 = arith.mulf %118, %118 : vector<16x64xf32>
    %cst_61 = arith.constant dense<0.000000e+00> : vector<16xf32>
    %120 = vector.multi_reduction <add>, %119, %cst_61 [1] : vector<16x64xf32> to vector<16xf32>
    %121 = vector.shape_cast %120 : vector<16xf32> to vector<16x1xf32>
    %cst_62 = arith.constant 6.400000e+01 : f32
    %122 = vector.broadcast %cst_62 : f32 to vector<16x1xf32>
    %123 = arith.divf %121, %122 : vector<16x1xf32>
    %124 = vector.broadcast %116 : vector<16x1xf32> to vector<16x64xf32>
    %125 = arith.subf %108, %124 : vector<16x64xf32>
    %cst_63 = arith.constant 9.99999974E-6 : f32
    %126 = vector.broadcast %cst_63 : f32 to vector<16x1xf32>
    %127 = arith.addf %123, %126 : vector<16x1xf32>
    %128 = math.rsqrt %127 : vector<16x1xf32>
    %129 = vector.broadcast %128 : vector<16x1xf32> to vector<16x64xf32>
    %130 = arith.mulf %125, %129 : vector<16x64xf32>
    %131 = vector.broadcast %110 : vector<1x64xf32> to vector<16x64xf32>
    %132 = arith.mulf %130, %131 : vector<16x64xf32>
    %133 = vector.broadcast %112 : vector<1x64xf32> to vector<16x64xf32>
    %134 = arith.addf %132, %133 : vector<16x64xf32>
    %135 = vector.shape_cast %134 : vector<16x64xf32> to vector<2x8x64xf32>
    %136 = vector.extract_strided_slice %135 {offsets = [0, 4, 0], sizes = [2, 4, 64], strides = [1, 1, 1]} : vector<2x8x64xf32> to vector<2x4x64xf32>
    %137 = vector.shape_cast %136 : vector<2x4x64xf32> to vector<8x64xf32>
    %c1 = arith.constant 1 : index
    %c0_64 = arith.constant 0 : index
    %c0_65 = arith.constant 0 : index
    %138 = vector.load %arg5[%c1, %c0_64, %c0_65] : memref<2x64x192xbf16, #tpu.memory_space<vmem>>, vector<1x64x192xbf16>
    %139 = vector.shape_cast %138 : vector<1x64x192xbf16> to vector<64x192xbf16>
    %c1_66 = arith.constant 1 : index
    %c0_67 = arith.constant 0 : index
    %c0_68 = arith.constant 0 : index
    %140 = vector.load %arg6[%c1_66, %c0_67, %c0_68] : memref<2x1x192xf32, #tpu.memory_space<vmem>>, vector<1x1x192xf32>
    %141 = vector.shape_cast %140 : vector<1x1x192xf32> to vector<1x192xf32>
    %142 = arith.truncf %134 : vector<16x64xf32> to vector<16x64xbf16>
    %cst_69 = arith.constant dense<0.000000e+00> : vector<16x192xf32>
    %143 = tpu.matmul %142, %139, %cst_69 {dimension_numbers = #tpu.dot_dimension_numbers<[1], [0], [0], [1], [0, 0, 1, 1], [], []>} : vector<16x64xbf16>, vector<64x192xbf16>, vector<16x192xf32> -> vector<16x192xf32>
    %144 = vector.broadcast %141 : vector<1x192xf32> to vector<16x192xf32>
    %145 = arith.addf %143, %144 : vector<16x192xf32>
    %146 = vector.extract_strided_slice %145 {offsets = [0, 64], sizes = [16, 64], strides = [1, 1]} : vector<16x192xf32> to vector<16x64xf32>
    %147 = vector.extract_strided_slice %145 {offsets = [0, 128], sizes = [16, 64], strides = [1, 1]} : vector<16x192xf32> to vector<16x64xf32>
    %148 = vector.shape_cast %145 : vector<16x192xf32> to vector<2x8x192xf32>
    %149 = vector.extract_strided_slice %148 {offsets = [0, 4, 0], sizes = [2, 4, 64], strides = [1, 1, 1]} : vector<2x8x192xf32> to vector<2x4x64xf32>
    %150 = vector.shape_cast %149 : vector<2x4x64xf32> to vector<8x64xf32>
    %151 = vector.shape_cast %150 : vector<8x64xf32> to vector<2x4x8x8xf32>
    %152 = tpu.transpose %151, [0, 2, 1, 3] : vector<2x4x8x8xf32> -> vector<2x8x4x8xf32>
    %153 = vector.shape_cast %152 : vector<2x8x4x8xf32> to vector<16x4x8xf32>
    %154 = arith.truncf %153 : vector<16x4x8xf32> to vector<16x4x8xbf16>
    %155 = vector.shape_cast %146 : vector<16x64xf32> to vector<2x8x8x8xf32>
    %156 = tpu.transpose %155, [0, 2, 1, 3] : vector<2x8x8x8xf32> -> vector<2x8x8x8xf32>
    %157 = vector.shape_cast %156 : vector<2x8x8x8xf32> to vector<16x8x8xf32>
    %158 = arith.truncf %157 : vector<16x8x8xf32> to vector<16x8x8xbf16>
    %159 = vector.shape_cast %147 : vector<16x64xf32> to vector<2x8x8x8xf32>
    %160 = tpu.transpose %159, [0, 2, 1, 3] : vector<2x8x8x8xf32> -> vector<2x8x8x8xf32>
    %161 = vector.shape_cast %160 : vector<2x8x8x8xf32> to vector<16x8x8xf32>
    %162 = arith.truncf %161 : vector<16x8x8xf32> to vector<16x8x8xbf16>
    "tpu.trace_start"() <{level = 10 : i32, message = "bqd,bkd->bqk"}> : () -> ()
    %cst_70 = arith.constant dense<0.000000e+00> : vector<16x4x8xf32>
    %163 = tpu.matmul %154, %158, %cst_70 {dimension_numbers = #tpu.dot_dimension_numbers<[2], [2], [1], [1], [0, 0, 0, 1, 1, 1], [0], [0]>} : vector<16x4x8xbf16>, vector<16x8x8xbf16>, vector<16x4x8xf32> -> vector<16x4x8xf32>
    "tpu.trace_stop"() : () -> ()
    %cst_71 = arith.constant 0.353553385 : f32
    %164 = vector.broadcast %cst_71 : f32 to vector<16x4x8xf32>
    %165 = arith.mulf %163, %164 : vector<16x4x8xf32>
    %cst_72 = arith.constant dense<0xFF800000> : vector<16x4xf32>
    %166 = vector.multi_reduction <maximumf>, %165, %cst_72 [2] : vector<16x4x8xf32> to vector<16x4xf32>
    %167 = vector.shape_cast %166 : vector<16x4xf32> to vector<16x4x1xf32>
    %168 = vector.broadcast %167 : vector<16x4x1xf32> to vector<16x4x8xf32>
    %169 = arith.subf %165, %168 : vector<16x4x8xf32>
    %170 = math.exp %169 : vector<16x4x8xf32>
    %cst_73 = arith.constant dense<0.000000e+00> : vector<16x4xf32>
    %171 = vector.multi_reduction <add>, %170, %cst_73 [2] : vector<16x4x8xf32> to vector<16x4xf32>
    %172 = vector.shape_cast %171 : vector<16x4xf32> to vector<16x4x1xf32>
    %173 = tpu.reciprocal %172 {approx = true} : vector<16x4x1xf32> -> vector<16x4x1xf32>
    %174 = vector.broadcast %173 : vector<16x4x1xf32> to vector<16x4x8xf32>
    %175 = arith.mulf %170, %174 : vector<16x4x8xf32>
    %176 = arith.truncf %175 : vector<16x4x8xf32> to vector<16x4x8xbf16>
    "tpu.trace_start"() <{level = 10 : i32, message = "bqk,bkd->bqd"}> : () -> ()
    %cst_74 = arith.constant dense<0.000000e+00> : vector<16x4x8xf32>
    %177 = tpu.matmul %176, %162, %cst_74 {dimension_numbers = #tpu.dot_dimension_numbers<[2], [1], [1], [2], [0, 0, 0, 1, 1, 2], [0], [0]>} : vector<16x4x8xbf16>, vector<16x8x8xbf16>, vector<16x4x8xf32> -> vector<16x4x8xf32>
    "tpu.trace_stop"() : () -> ()
    %178 = vector.shape_cast %177 : vector<16x4x8xf32> to vector<2x8x4x8xf32>
    %179 = tpu.transpose %178, [0, 2, 1, 3] : vector<2x8x4x8xf32> -> vector<2x4x8x8xf32>
    %180 = vector.shape_cast %179 : vector<2x4x8x8xf32> to vector<8x64xf32>
    %c1_75 = arith.constant 1 : index
    %c0_76 = arith.constant 0 : index
    %c0_77 = arith.constant 0 : index
    %181 = vector.load %arg7[%c1_75, %c0_76, %c0_77] : memref<2x64x64xbf16, #tpu.memory_space<vmem>>, vector<1x64x64xbf16>
    %182 = vector.shape_cast %181 : vector<1x64x64xbf16> to vector<64x64xbf16>
    %c1_78 = arith.constant 1 : index
    %c0_79 = arith.constant 0 : index
    %c0_80 = arith.constant 0 : index
    %183 = vector.load %arg8[%c1_78, %c0_79, %c0_80] : memref<2x1x64xf32, #tpu.memory_space<vmem>>, vector<1x1x64xf32>
    %184 = vector.shape_cast %183 : vector<1x1x64xf32> to vector<1x64xf32>
    %185 = arith.truncf %180 : vector<8x64xf32> to vector<8x64xbf16>
    %cst_81 = arith.constant dense<0.000000e+00> : vector<8x64xf32>
    %186 = tpu.matmul %185, %182, %cst_81 {dimension_numbers = #tpu.dot_dimension_numbers<[1], [0], [0], [1], [0, 0, 1, 1], [], []>} : vector<8x64xbf16>, vector<64x64xbf16>, vector<8x64xf32> -> vector<8x64xf32>
    %187 = vector.broadcast %184 : vector<1x64xf32> to vector<8x64xf32>
    %188 = arith.addf %186, %187 : vector<8x64xf32>
    %189 = arith.addf %137, %188 : vector<8x64xf32>
    %c1_82 = arith.constant 1 : index
    %c0_83 = arith.constant 0 : index
    %c0_84 = arith.constant 0 : index
    %190 = vector.load %arg9[%c1_82, %c0_83, %c0_84] : memref<2x1x64xf32, #tpu.memory_space<vmem>>, vector<1x1x64xf32>
    %191 = vector.shape_cast %190 : vector<1x1x64xf32> to vector<1x64xf32>
    %c1_85 = arith.constant 1 : index
    %c0_86 = arith.constant 0 : index
    %c0_87 = arith.constant 0 : index
    %192 = vector.load %arg10[%c1_85, %c0_86, %c0_87] : memref<2x1x64xf32, #tpu.memory_space<vmem>>, vector<1x1x64xf32>
    %193 = vector.shape_cast %192 : vector<1x1x64xf32> to vector<1x64xf32>
    %cst_88 = arith.constant dense<0.000000e+00> : vector<8xf32>
    %194 = vector.multi_reduction <add>, %189, %cst_88 [1] : vector<8x64xf32> to vector<8xf32>
    %195 = vector.shape_cast %194 : vector<8xf32> to vector<8x1xf32>
    %cst_89 = arith.constant 6.400000e+01 : f32
    %196 = vector.broadcast %cst_89 : f32 to vector<8x1xf32>
    %197 = arith.divf %195, %196 : vector<8x1xf32>
    %198 = vector.broadcast %197 : vector<8x1xf32> to vector<8x64xf32>
    %199 = arith.subf %189, %198 : vector<8x64xf32>
    %200 = arith.mulf %199, %199 : vector<8x64xf32>
    %cst_90 = arith.constant dense<0.000000e+00> : vector<8xf32>
    %201 = vector.multi_reduction <add>, %200, %cst_90 [1] : vector<8x64xf32> to vector<8xf32>
    %202 = vector.shape_cast %201 : vector<8xf32> to vector<8x1xf32>
    %cst_91 = arith.constant 6.400000e+01 : f32
    %203 = vector.broadcast %cst_91 : f32 to vector<8x1xf32>
    %204 = arith.divf %202, %203 : vector<8x1xf32>
    %205 = vector.broadcast %197 : vector<8x1xf32> to vector<8x64xf32>
    %206 = arith.subf %189, %205 : vector<8x64xf32>
    %cst_92 = arith.constant 9.99999974E-6 : f32
    %207 = vector.broadcast %cst_92 : f32 to vector<8x1xf32>
    %208 = arith.addf %204, %207 : vector<8x1xf32>
    %209 = math.rsqrt %208 : vector<8x1xf32>
    %210 = vector.broadcast %209 : vector<8x1xf32> to vector<8x64xf32>
    %211 = arith.mulf %206, %210 : vector<8x64xf32>
    %212 = vector.broadcast %191 : vector<1x64xf32> to vector<8x64xf32>
    %213 = arith.mulf %211, %212 : vector<8x64xf32>
    %214 = vector.broadcast %193 : vector<1x64xf32> to vector<8x64xf32>
    %215 = arith.addf %213, %214 : vector<8x64xf32>
    %c1_93 = arith.constant 1 : index
    %c0_94 = arith.constant 0 : index
    %c0_95 = arith.constant 0 : index
    %216 = vector.load %arg11[%c1_93, %c0_94, %c0_95] : memref<2x64x256xbf16, #tpu.memory_space<vmem>>, vector<1x64x256xbf16>
    %217 = vector.shape_cast %216 : vector<1x64x256xbf16> to vector<64x256xbf16>
    %c1_96 = arith.constant 1 : index
    %c0_97 = arith.constant 0 : index
    %c0_98 = arith.constant 0 : index
    %218 = vector.load %arg12[%c1_96, %c0_97, %c0_98] : memref<2x1x256xf32, #tpu.memory_space<vmem>>, vector<1x1x256xf32>
    %219 = vector.shape_cast %218 : vector<1x1x256xf32> to vector<1x256xf32>
    %220 = arith.truncf %215 : vector<8x64xf32> to vector<8x64xbf16>
    %cst_99 = arith.constant dense<0.000000e+00> : vector<8x256xf32>
    %221 = tpu.matmul %220, %217, %cst_99 {dimension_numbers = #tpu.dot_dimension_numbers<[1], [0], [0], [1], [0, 0, 1, 1], [], []>} : vector<8x64xbf16>, vector<64x256xbf16>, vector<8x256xf32> -> vector<8x256xf32>
    %222 = vector.broadcast %219 : vector<1x256xf32> to vector<8x256xf32>
    %223 = arith.addf %221, %222 : vector<8x256xf32>
    %cst_100 = arith.constant 0.000000e+00 : f32
    %224 = vector.broadcast %cst_100 : f32 to vector<8x256xf32>
    %225 = arith.maximumf %223, %224 : vector<8x256xf32>
    %c1_101 = arith.constant 1 : index
    %c0_102 = arith.constant 0 : index
    %c0_103 = arith.constant 0 : index
    %226 = vector.load %arg13[%c1_101, %c0_102, %c0_103] : memref<2x256x64xbf16, #tpu.memory_space<vmem>>, vector<1x256x64xbf16>
    %227 = vector.shape_cast %226 : vector<1x256x64xbf16> to vector<256x64xbf16>
    %c1_104 = arith.constant 1 : index
    %c0_105 = arith.constant 0 : index
    %c0_106 = arith.constant 0 : index
    %228 = vector.load %arg14[%c1_104, %c0_105, %c0_106] : memref<2x1x64xf32, #tpu.memory_space<vmem>>, vector<1x1x64xf32>
    %229 = vector.shape_cast %228 : vector<1x1x64xf32> to vector<1x64xf32>
    %230 = arith.truncf %225 : vector<8x256xf32> to vector<8x256xbf16>
    %cst_107 = arith.constant dense<0.000000e+00> : vector<8x64xf32>
    %231 = tpu.matmul %230, %227, %cst_107 {dimension_numbers = #tpu.dot_dimension_numbers<[1], [0], [0], [1], [0, 0, 1, 1], [], []>} : vector<8x256xbf16>, vector<256x64xbf16>, vector<8x64xf32> -> vector<8x64xf32>
    %232 = vector.broadcast %229 : vector<1x64xf32> to vector<8x64xf32>
    %233 = arith.addf %231, %232 : vector<8x64xf32>
    %234 = arith.addf %215, %233 : vector<8x64xf32>
    %c1_108 = arith.constant 1 : index
    %c0_109 = arith.constant 0 : index
    %c0_110 = arith.constant 0 : index
    %235 = vector.load %arg15[%c1_108, %c0_109, %c0_110] : memref<2x1x64xf32, #tpu.memory_space<vmem>>, vector<1x1x64xf32>
    %236 = vector.shape_cast %235 : vector<1x1x64xf32> to vector<1x64xf32>
    %c1_111 = arith.constant 1 : index
    %c0_112 = arith.constant 0 : index
    %c0_113 = arith.constant 0 : index
    %237 = vector.load %arg16[%c1_111, %c0_112, %c0_113] : memref<2x1x64xf32, #tpu.memory_space<vmem>>, vector<1x1x64xf32>
    %238 = vector.shape_cast %237 : vector<1x1x64xf32> to vector<1x64xf32>
    %cst_114 = arith.constant dense<0.000000e+00> : vector<8xf32>
    %239 = vector.multi_reduction <add>, %234, %cst_114 [1] : vector<8x64xf32> to vector<8xf32>
    %240 = vector.shape_cast %239 : vector<8xf32> to vector<8x1xf32>
    %cst_115 = arith.constant 6.400000e+01 : f32
    %241 = vector.broadcast %cst_115 : f32 to vector<8x1xf32>
    %242 = arith.divf %240, %241 : vector<8x1xf32>
    %243 = vector.broadcast %242 : vector<8x1xf32> to vector<8x64xf32>
    %244 = arith.subf %234, %243 : vector<8x64xf32>
    %245 = arith.mulf %244, %244 : vector<8x64xf32>
    %cst_116 = arith.constant dense<0.000000e+00> : vector<8xf32>
    %246 = vector.multi_reduction <add>, %245, %cst_116 [1] : vector<8x64xf32> to vector<8xf32>
    %247 = vector.shape_cast %246 : vector<8xf32> to vector<8x1xf32>
    %cst_117 = arith.constant 6.400000e+01 : f32
    %248 = vector.broadcast %cst_117 : f32 to vector<8x1xf32>
    %249 = arith.divf %247, %248 : vector<8x1xf32>
    %250 = vector.broadcast %242 : vector<8x1xf32> to vector<8x64xf32>
    %251 = arith.subf %234, %250 : vector<8x64xf32>
    %cst_118 = arith.constant 9.99999974E-6 : f32
    %252 = vector.broadcast %cst_118 : f32 to vector<8x1xf32>
    %253 = arith.addf %249, %252 : vector<8x1xf32>
    %254 = math.rsqrt %253 : vector<8x1xf32>
    %255 = vector.broadcast %254 : vector<8x1xf32> to vector<8x64xf32>
    %256 = arith.mulf %251, %255 : vector<8x64xf32>
    %257 = vector.broadcast %236 : vector<1x64xf32> to vector<8x64xf32>
    %258 = arith.mulf %256, %257 : vector<8x64xf32>
    %259 = vector.broadcast %238 : vector<1x64xf32> to vector<8x64xf32>
    %260 = arith.addf %258, %259 : vector<8x64xf32>
    %261 = vector.shape_cast %260 : vector<8x64xf32> to vector<2x4x64xf32>
    %c0_119 = arith.constant 0 : index
    %c0_120 = arith.constant 0 : index
    %262 = vector.load %arg17[%c0_119, %c0_120] : memref<1x64xf32, #tpu.memory_space<vmem>>, vector<1x64xf32>
    %263 = vector.shape_cast %262 : vector<1x64xf32> to vector<1x1x64xf32>
    %264 = vector.broadcast %263 : vector<1x1x64xf32> to vector<2x4x64xf32>
    %265 = arith.mulf %261, %264 : vector<2x4x64xf32>
    %cst_121 = arith.constant dense<0.000000e+00> : vector<2x4xf32>
    %266 = vector.multi_reduction <add>, %265, %cst_121 [2] : vector<2x4x64xf32> to vector<2x4xf32>
    %c0_122 = arith.constant 0 : index
    %c0_123 = arith.constant 0 : index
    %267 = vector.load %arg18[%c0_122, %c0_123] : memref<1x1xf32, #tpu.memory_space<vmem>>, vector<1x1xf32>
    %268 = vector.broadcast %267 : vector<1x1xf32> to vector<2x4xf32>
    %269 = arith.addf %266, %268 : vector<2x4xf32>
    %c0_124 = arith.constant 0 : index
    %c0_125 = arith.constant 0 : index
    %270 = vector.load %arg19[%c0_124, %c0_125] : memref<2x4xf32, #tpu.memory_space<vmem>>, vector<2x4xf32>
    tpu.vector_store %arg19[%c0_124, %c0_125], %269 {strides = array<i32>} : memref<2x4xf32, #tpu.memory_space<vmem>>, vector<2x4xf32>,
    return
  }
  func.func @transform_0(%arg0: i32) -> (i32, i32, i32) {
    %c0_i32 = arith.constant 0 : i32
    %c0_i32_0 = arith.constant 0 : i32
    %c0_i32_1 = arith.constant 0 : i32
    return %arg0, %c0_i32, %c0_i32_0 : i32, i32, i32
  }
  func.func @transform_1(%arg0: i32) -> (i32, i32) {
    %c0_i32 = arith.constant 0 : i32
    %c0_i32_0 = arith.constant 0 : i32
    %c0_i32_1 = arith.constant 0 : i32
    return %c0_i32, %c0_i32_0 : i32, i32
  }
  func.func @transform_2(%arg0: i32) -> (i32, i32) {
    %c0_i32 = arith.constant 0 : i32
    %c0_i32_0 = arith.constant 0 : i32
    %c0_i32_1 = arith.constant 0 : i32
    return %c0_i32, %c0_i32_0 : i32, i32
  }
  func.func @transform_3(%arg0: i32) -> (i32, i32) {
    %c0_i32 = arith.constant 0 : i32
    %c0_i32_0 = arith.constant 0 : i32
    %c0_i32_1 = arith.constant 0 : i32
    return %c0_i32, %c0_i32_0 : i32, i32
  }
  func.func @transform_4(%arg0: i32) -> (i32, i32, i32) {
    %c0_i32 = arith.constant 0 : i32
    %c0_i32_0 = arith.constant 0 : i32
    %c0_i32_1 = arith.constant 0 : i32
    %c0_i32_2 = arith.constant 0 : i32
    return %c0_i32, %c0_i32_0, %c0_i32_1 : i32, i32, i32
  }
  func.func @transform_5(%arg0: i32) -> (i32, i32, i32) {
    %c0_i32 = arith.constant 0 : i32
    %c0_i32_0 = arith.constant 0 : i32
    %c0_i32_1 = arith.constant 0 : i32
    %c0_i32_2 = arith.constant 0 : i32
    return %c0_i32, %c0_i32_0, %c0_i32_1 : i32, i32, i32
  }
  func.func @transform_6(%arg0: i32) -> (i32, i32, i32) {
    %c0_i32 = arith.constant 0 : i32
    %c0_i32_0 = arith.constant 0 : i32
    %c0_i32_1 = arith.constant 0 : i32
    %c0_i32_2 = arith.constant 0 : i32
    return %c0_i32, %c0_i32_0, %c0_i32_1 : i32, i32, i32
  }
  func.func @transform_7(%arg0: i32) -> (i32, i32, i32) {
    %c0_i32 = arith.constant 0 : i32
    %c0_i32_0 = arith.constant 0 : i32
    %c0_i32_1 = arith.constant 0 : i32
    %c0_i32_2 = arith.constant 0 : i32
    return %c0_i32, %c0_i32_0, %c0_i32_1 : i32, i32, i32
  }
  func.func @transform_8(%arg0: i32) -> (i32, i32, i32) {
    %c0_i32 = arith.constant 0 : i32
    %c0_i32_0 = arith.constant 0 : i32
    %c0_i32_1 = arith.constant 0 : i32
    %c0_i32_2 = arith.constant 0 : i32
    return %c0_i32, %c0_i32_0, %c0_i32_1 : i32, i32, i32
  }
  func.func @transform_9(%arg0: i32) -> (i32, i32, i32) {
    %c0_i32 = arith.constant 0 : i32
    %c0_i32_0 = arith.constant 0 : i32
    %c0_i32_1 = arith.constant 0 : i32
    %c0_i32_2 = arith.constant 0 : i32
    return %c0_i32, %c0_i32_0, %c0_i32_1 : i32, i32, i32
  }
  func.func @transform_10(%arg0: i32) -> (i32, i32, i32) {
    %c0_i32 = arith.constant 0 : i32
    %c0_i32_0 = arith.constant 0 : i32
    %c0_i32_1 = arith.constant 0 : i32
    %c0_i32_2 = arith.constant 0 : i32
    return %c0_i32, %c0_i32_0, %c0_i32_1 : i32, i32, i32
  }
  func.func @transform_11(%arg0: i32) -> (i32, i32, i32) {
    %c0_i32 = arith.constant 0 : i32
    %c0_i32_0 = arith.constant 0 : i32
    %c0_i32_1 = arith.constant 0 : i32
    %c0_i32_2 = arith.constant 0 : i32
    return %c0_i32, %c0_i32_0, %c0_i32_1 : i32, i32, i32
  }
  func.func @transform_12(%arg0: i32) -> (i32, i32, i32) {
    %c0_i32 = arith.constant 0 : i32
    %c0_i32_0 = arith.constant 0 : i32
    %c0_i32_1 = arith.constant 0 : i32
    %c0_i32_2 = arith.constant 0 : i32
    return %c0_i32, %c0_i32_0, %c0_i32_1 : i32, i32, i32
  }
  func.func @transform_13(%arg0: i32) -> (i32, i32, i32) {
    %c0_i32 = arith.constant 0 : i32
    %c0_i32_0 = arith.constant 0 : i32
    %c0_i32_1 = arith.constant 0 : i32
    %c0_i32_2 = arith.constant 0 : i32
    return %c0_i32, %c0_i32_0, %c0_i32_1 : i32, i32, i32
  }
  func.func @transform_14(%arg0: i32) -> (i32, i32, i32) {
    %c0_i32 = arith.constant 0 : i32
    %c0_i32_0 = arith.constant 0 : i32
    %c0_i32_1 = arith.constant 0 : i32
    %c0_i32_2 = arith.constant 0 : i32
    return %c0_i32, %c0_i32_0, %c0_i32_1 : i32, i32, i32
  }
  func.func @transform_15(%arg0: i32) -> (i32, i32, i32) {
    %c0_i32 = arith.constant 0 : i32
    %c0_i32_0 = arith.constant 0 : i32
    %c0_i32_1 = arith.constant 0 : i32
    %c0_i32_2 = arith.constant 0 : i32
    return %c0_i32, %c0_i32_0, %c0_i32_1 : i32, i32, i32
  }
  func.func @transform_16(%arg0: i32) -> (i32, i32) {
    %c0_i32 = arith.constant 0 : i32
    %c0_i32_0 = arith.constant 0 : i32
    %c0_i32_1 = arith.constant 0 : i32
    return %c0_i32, %c0_i32_0 : i32, i32
  }
  func.func @transform_17(%arg0: i32) -> (i32, i32) {
    %c0_i32 = arith.constant 0 : i32
    %c0_i32_0 = arith.constant 0 : i32
    %c0_i32_1 = arith.constant 0 : i32
    return %c0_i32, %c0_i32_0 : i32, i32
  }
  func.func @transform_18(%arg0: i32) -> (i32, i32) {
    %c0_i32 = arith.constant 0 : i32
    %c0_i32_0 = arith.constant 0 : i32
    return %arg0, %c0_i32 : i32, i32
  }
}

</mosaic_0001>

<bundles_post_ra>
// kernel: tpu_custom_call.1
= control target key start
LH: loop header
LB: loop body
LE: loop exit
PB: predicated region body
PF: predicated region fallthrough
CT: control target
= control target key end

     0   :  { %s10235_s0 = inlined_call_operand.vmem [shape: f32[2,8,8], index: 0, kind: input, shape index: {}]   ;;  %s10236_s1 = inlined_call_operand.vmem [shape: f32[1000,64], index: 1, kind: input, shape index: {}]   ;;  %s10237_s2 = inlined_call_operand.vmem [shape: bf16[8,64], index: 2, kind: input, shape index: {}]   ;;  %s10238_s3 = inlined_call_operand.vmem [shape: f32[1,64], index: 3, kind: input, shape index: {}]   ;;  %s10239_s4 = inlined_call_operand.vmem [shape: bf16[2,64,192], index: 4, kind: input, shape index: {}]   ;;  %s10240_s5 = inlined_call_operand.vmem [shape: f32[2,1,192], index: 5, kind: input, shape index: {}]   ;;  %s10241_s6 = inlined_call_operand.vmem [shape: bf16[2,64,64], index: 6, kind: input, shape index: {}]   ;;  %s10242_s7 = inlined_call_operand.vmem [shape: f32[2,1,64], index: 7, kind: input, shape index: {}]   ;;  %s10243_s8 = inlined_call_operand.vmem [shape: f32[2,1,64], index: 8, kind: input, shape index: {}]   ;;  %s10244_s9 = inlined_call_operand.vmem [shape: f32[2,1,64], index: 9, kind: input, shape index: {}]   ;;  %s10245_s10 = inlined_call_operand.vmem [shape: bf16[2,64,256], index: 10, kind: input, shape index: {}]   ;;  %s10246_s11 = inlined_call_operand.vmem [shape: f32[2,1,256], index: 11, kind: input, shape index: {}]   ;;  %s10247_s12 = inlined_call_operand.vmem [shape: bf16[2,256,64], index: 12, kind: input, shape index: {}]   ;;  %s10248_s13 = inlined_call_operand.vmem [shape: f32[2,1,64], index: 13, kind: input, shape index: {}]   ;;  %s10249_s14 = inlined_call_operand.vmem [shape: f32[2,1,64], index: 14, kind: input, shape index: {}]   ;;  %s10250_s15 = inlined_call_operand.vmem [shape: f32[2,1,64], index: 15, kind: input, shape index: {}]   ;;  %s10251_s16 = inlined_call_operand.vmem [shape: f32[1,64], index: 16, kind: input, shape index: {}]   ;;  %s10252_s17 = inlined_call_operand.<no memory space> [shape: f32[1,1], index: 17, kind: input, shape index: {}]   ;;  %s10253_s18 = inlined_call_operand.hbm [shape: f32[2,4], index: 18, kind: output, shape index: {}]  }
   0x1   :  { %10266 = sst [smem:[#allocation6_spill]] %s10235_s0  ;;  %v23_v0 = vstv %s10252_s17 }
   0x2   :  { %10267 = sst [smem:[#allocation7_spill]] %s10236_s1  ;;  %24 = vst [vmem:[#allocation2] sm:$0x1] %v23_v0 }
   0x3   :  { %10268 = sst [smem:[#allocation8_spill]] %s10237_s2 }
   0x4   :  { %s10269_s0 = sld [smem:[#allocation8_spill]]  ;;  %vm75_vm0 = vcmask 1043456   ;;  %vm71_vm1 = vcmask 64512  }
   0x5   :  { %s10270_s20 = sld [smem:[#allocation6_spill]] }
   0xa   :  { %v65_v1 = vld [vmem:[%s10269_s0] sm:$0xf] }
   0xb   :  { %v63_v2 = vld [vmem:[%s10270_s20] sm:$0xff]  ;;  %v64_v3 = vld [vmem:[%s10270_s20 + $0x8] sm:$0xff]  ;;  %v77_v4 = vsel %vm75_vm0, %v65_v1, 0 }
   0xc   :  { %v67_v5 = vpack.c.bf16 %v64_v3, %v63_v2  ;;  %86 = vmatpush.bf16.msra.mxu3 %v77_v4 }
   0xf   :  { %6506 = vmatmul.msk.bf16.vlgmr.msra.gmra.mxu3 %vm71_vm1, %v67_v5 }
  0x10   :  { %25 = vsyncpa [#allocation4], 0  ;;  %v6533_v6 = vld [vmem:[%s10239_s4 + $0x30] sm:$0xf]  ;;  %v6948_v7 = vld [vmem:[%s10239_s4 + $0x34] sm:$0xf0] }
  0x11   :  { %v6947_v8 = vld [vmem:[%s10239_s4 + $0x34] sm:$0xf]  ;;  %v6534_v9 = vor.u32 %v6948_v7, %v6533_v6  ;;  %v6535_v10 = vld [vmem:[%s10239_s4 + $0x38] sm:$0xf0]  ;;  %v6525_v12 = vld [vmem:[%s10239_s4 + $0x20] sm:$0xf] }
  0x12   :  { %v6538_v11 = vor.u32 %v6947_v8, %v6535_v10  ;;  %v6946_v13 = vld [vmem:[%s10239_s4 + $0x24] sm:$0xf0]  ;;  %v6945_v15 = vld [vmem:[%s10239_s4 + $0x24] sm:$0xf]  ;;  %v6527_v16 = vld [vmem:[%s10239_s4 + $0x28] sm:$0xf0] }
  0x13   :  { %159 = vmatpush.bf16.msra.mxu1 %v6534_v9  ;;  %v6526_v14 = vor.u32 %v6946_v13, %v6525_v12  ;;  %v6530_v17 = vor.u32 %v6945_v15, %v6527_v16  ;;  %v6517_v18 = vld [vmem:[%s10239_s4 + $0x10] sm:$0xf]  ;;  %v6944_v19 = vld [vmem:[%s10239_s4 + $0x14] sm:$0xf0]  ;;  %v6943_v20 = vld [vmem:[%s10239_s4 + $0x14] sm:$0xf] }
  0x14   :  { %173 = vmatpush.bf16.msra.mxu2 %v6538_v11  ;;  %v6518_v21 = vor.u32 %v6944_v19, %v6517_v18  ;;  %v6519_v22 = vld [vmem:[%s10239_s4 + $0x18] sm:$0xf0]  ;;  %v6509_v24 = vld [vmem:[%s10239_s4] sm:$0xf]  ;;  %v6942_v25 = vld [vmem:[%s10239_s4 + $0x4] sm:$0xf0] }
  0x15   :  { %v6522_v23 = vor.u32 %v6943_v20, %v6519_v22  ;;  %v6941_v26 = vld [vmem:[%s10239_s4 + $0x4] sm:$0xf]  ;;  %v6510_v27 = vor.u32 %v6942_v25, %v6509_v24  ;;  %v6511_v28 = vld [vmem:[%s10239_s4 + $0x8] sm:$0xf0]  ;;  %v7211_v31 = vld [vmem:[%s10238_s3] ss:$0 sm:$0xff] }
  0x16   :  { %v6514_v29 = vor.u32 %v6941_v26, %v6511_v28  ;;  %s10271_s25 = sld [smem:[#allocation7_spill]]  ;;  %vm151_vm2 = vcmask 523264   ;;  %v7590_v39 = vld [vmem:[%s10240_s5] sm:$0x3]  ;;  %s7394_s27 = smov 88   ;;  %vm228_vm3 = vcmask 1047556  }
  0x17   :  { %160 = vmatpush.bf16.msra.mxu1 %v6526_v14  ;;  %v107_v40 = vperm.slane %v7590_v39, 0  ;;  %s7395_s28 = smov 96   ;;  %s7396_s29 = smov 120   ;;  %v7401_v54 = vmov 1983009808   ;;  %vm3034_vm4 = vcmask 130048  }
  0x18   :  { %174 = vmatpush.bf16.msra.mxu2 %v6530_v17  ;;  %s7397_s30 = smov 80   ;;  %s10264_s0 = smov 104   ;;  %v233_v55 = vunpack.c.l.s4 %v7401_v54  ;;  %v7403_v63 = vmov 1934713408   ;;  %vm3037_vm5 = vcmask 195584   ;;  %vm3040_vm6 = vcmask 261120  }
  0x19   :  { %s7399_s19 = smov 112   ;;  %s7400_s1 = smov 72   ;;  %v281_v0 = vunpack.c.l.s4 %v7403_v63  ;;  %vm3043_vm7 = vcmask 326656   ;;  %vm3046_vm8 = vcmask 392192   ;;  %vm3049_vm9 = vcmask 457728  }
  0x1a   :  { %s10262_s20 = smov 64   ;;  %v7615_v57 = vunpack.c.0.s8 %v233_v55  ;;  %s10258_s21 = smov 32  }
  0x1b   :  { %161 = vmatpush.bf16.msra.mxu1 %v6518_v21  ;;  %v7627_v14 = vunpack.c.0.s8 %v281_v0  ;;  %s10256_s22 = smov 8   ;;  %s10255_s17 = smov 40  }
  0x1c   :  { %175 = vmatpush.bf16.msra.mxu2 %v6522_v23  ;;  %v93_v33 = vld [vmem:[%s10271_s25] sm:$0xff]  ;;  %s10257_s2 = smov 24   ;;  %s10259_s23 = smov 16  }
  0x1d   :  { %s10260_s24 = smov 48   ;;  %s10261_s25 = smov 56  }
  0x1f   :  { %162 = vmatpush.bf16.msra.mxu1 %v6510_v27 }
  0x20   :  { %176 = vmatpush.bf16.msra.mxu2 %v6514_v29 }
  0x92   :  { %v88_v30 = vpop.f32.mrf.mxu3 }
  0x93   :  { %v89_v32 = vadd.f32 %v7211_v31, %v88_v30 }
  0x95   :  { %v7579_v36 = vadd.f32 %v93_v33, %v89_v32 }
  0x9a   :  { %v90_v34 = vpop.f32.mrf.mxu3 }
  0x9b   :  { %v91_v35 = vadd.f32 %v7211_v31, %v90_v34 }
  0x9d   :  { %v7581_v37 = vadd.f32 %v93_v33, %v91_v35  ;;  %v108_v35 = vperm.slane %v7590_v39, 1 }
  0x9f   :  { %v105_v38 = vpack.c.bf16 %v7581_v37, %v7579_v36 }
  0xa1   :  { %6539 = vmatmul.msk.bf16.vlgmr.msra.gmra.mxu1 %vm151_vm2, %v105_v38  ;;  %6540 = vmatmul.msk.bf16.vlgmr.msra.gmra.mxu2 %vm151_vm2, %v105_v38 }
 0x11e   :  { %v164_v41 = vpop.f32.mrf.mxu1 }
 0x11f   :  { %v165_v42 = vadd.f32 %v164_v41, %v107_v40 }
 0x121   :  { %209 = vrot.lane.b32.xlu2 %v165_v42, %s7394_s27  ;;  %203 = vrot.lane.b32.xlu1 %v165_v42, %s7395_s28  ;;  %v230_v59 = vrot.slane %v165_v42, 4 }
 0x122   :  { %185 = vrot.lane.b32.xlu0 %v165_v42, %s7396_s29 }
 0x124   :  { %v7631_v18 = vpop.f32.mrf.mxu2 }
 0x126   :  { %v166_v43 = vpop.f32.mrf.mxu1 }
 0x127   :  { %v7599_v44 = vadd.f32 %v166_v43, %v107_v40 }
 0x129   :  { %215 = vrot.lane.b32.xlu2 %v165_v42, %s7397_s30  ;;  %197 = vrot.lane.b32.xlu1 %v165_v42, %s10264_s0 }
 0x12a   :  { %191 = vrot.lane.b32.xlu0 %v165_v42, %s7399_s19 }
 0x131   :  { %205 = vrot.lane.b32.xlu2 %v7599_v44, %s7395_s28  ;;  %193 = vrot.lane.b32.xlu1 %v7599_v44, %s7399_s19 }
 0x132   :  { %221 = vrot.lane.b32.xlu0 %v165_v42, %s7400_s1 }
 0x13a   :  { %187 = vrot.lane.b32.xlu0 %v7599_v44, %s7396_s29 }
 0x17b   :  { %v210_v45 = vpop.permute.xlu2 %209 }
 0x17c   :  { %v266_v20 = vrot.slane %v210_v45, 4 }
 0x183   :  { %v7608_v46 = vpop.permute.xlu2 %215 }
 0x184   :  { %v252_v47 = vrot.slane %v7608_v46, 4 }
 0x18b   :  { %v7638_v27 = vpop.permute.xlu2 %205 }
 0x193   :  { %v204_v48 = vpop.permute.xlu1 %203 }
 0x194   :  { %v253_v49 = vsel %vm228_vm3, %v252_v47, %v204_v48  ;;  %v254_v50 = vrot.slane %v204_v48, 4  ;;  %v186_v51 = vpop.permute.xlu0 %185 }
 0x195   :  { %v7035_v52 = vpack.i.bf16 %v186_v51, %v165_v42  ;;  %v242_v56 = vrot.slane %v186_v51, 4  ;;  %v259_v21 = vperm.slane %v253_v49, %v7615_v57 }
 0x196   :  { %v255_v53 = vsel %vm228_vm3, %v7608_v46, %v254_v50 }
 0x197   :  { %7036 = vrot.lane.b32.xlu1 %v7035_v52, %s10262_s20  ;;  %v263_v15 = vperm.slane %v255_v53, %v7615_v57  ;;  %v302_v38 = vrot.slane %v259_v21, 4 }
 0x199   :  { %v314_v28 = vrot.slane %v263_v15, 4 }
 0x19b   :  { %v198_v58 = vpop.permute.xlu1 %197 }
 0x19c   :  { %v240_v60 = vrot.slane %v198_v58, 4  ;;  %v7045_v61 = vpack.i.bf16 %v210_v45, %v198_v58  ;;  %v243_v62 = vsel %vm228_vm3, %v198_v58, %v242_v56  ;;  %v192_v1 = vpop.permute.xlu0 %191 }
 0x19d   :  { %v251_v2 = vperm.slane %v243_v62, %v7615_v57  ;;  %v227_v3 = vrot.slane %v192_v1, 4  ;;  %v231_v4 = vsel %vm228_vm3, %v192_v1, %v230_v59  ;;  %v7040_v5 = vpack.i.bf16 %v204_v48, %v192_v1 }
 0x19e   :  { %v241_v6 = vsel %vm228_vm3, %v240_v60, %v186_v51  ;;  %v239_v7 = vperm.slane %v231_v4, %v7615_v57  ;;  %7046 = vrot.lane.b32.xlu0 %v7045_v61, %s10262_s20  ;;  %v180_v60 = vpop.f32.mrf.mxu2 }
 0x19f   :  { %v247_v8 = vperm.slane %v241_v6, %v7615_v57  ;;  %v288_v9 = vrot.slane %v251_v2, 4  ;;  %v229_v10 = vsel %vm228_vm3, %v227_v3, %v165_v42  ;;  %7041 = vrot.lane.b32.xlu2 %v7040_v5, %s10262_s20  ;;  %v7055_v42 = vpack.i.bf16 %v7638_v27, %v7599_v44 }
 0x1a0   :  { %v235_v11 = vperm.slane %v229_v10, %v7615_v57  ;;  %v290_v12 = vrot.slane %v239_v7, 4 }
 0x1a1   :  { %v276_v13 = vrot.slane %v247_v8, 4  ;;  %v289_v17 = vsel %vm228_vm3, %v288_v9, %v239_v7 }
 0x1a2   :  { %v278_v16 = vrot.slane %v235_v11, 4  ;;  %v291_v19 = vsel %vm228_vm3, %v251_v2, %v290_v12  ;;  %v295_v25 = vperm.slane %v289_v17, %v7627_v14 }
 0x1a3   :  { %v277_v22 = vsel %vm228_vm3, %v276_v13, %v235_v11  ;;  %v299_v29 = vperm.slane %v291_v19, %v7627_v14  ;;  %v7671_v6 = vpop.permute.xlu1 %193  ;;  %v7679_v11 = vadd.f32 %v180_v60, %v108_v35 }
 0x1a4   :  { %v279_v23 = vsel %vm228_vm3, %v247_v8, %v278_v16  ;;  %v222_v24 = vpop.permute.xlu0 %221  ;;  %v283_v31 = vperm.slane %v277_v22, %v7627_v14  ;;  %v334_v43 = vrot.slane %v295_v25, 4 }
 0x1a5   :  { %v264_v26 = vrot.slane %v222_v24, 4  ;;  %v267_v30 = vsel %vm228_vm3, %v222_v24, %v266_v20  ;;  %v287_v32 = vperm.slane %v279_v23, %v7627_v14  ;;  %v7050_v41 = vpack.i.bf16 %v222_v24, %v7608_v46 }
 0x1a6   :  { %217 = vrot.lane.b32.xlu0 %v7599_v44, %s7397_s30  ;;  %v275_v34 = vperm.slane %v267_v30, %v7615_v57  ;;  %v326_v52 = vrot.slane %v283_v31, 4 }
 0x1a7   :  { %v265_v33 = vsel %vm228_vm3, %v264_v26, %v210_v45  ;;  %211 = vrot.lane.b32.xlu2 %v7599_v44, %s7394_s27  ;;  %v338_v45 = vrot.slane %v299_v29, 4  ;;  %7051 = vrot.lane.b32.xlu1 %v7050_v41, %s10262_s20  ;;  %v330_v53 = vrot.slane %v287_v32, 4 }
 0x1a8   :  { %v271_v40 = vperm.slane %v265_v33, %v7615_v57  ;;  %v312_v47 = vrot.slane %v275_v34, 4  ;;  %v315_v48 = vsel %vm228_vm3, %v275_v34, %v314_v28 }
 0x1a9   :  { %v323_v51 = vperm.slane %v315_v48, %v7627_v14 }
 0x1aa   :  { %v300_v49 = vrot.slane %v271_v40, 4  ;;  %v303_v50 = vsel %vm228_vm3, %v271_v40, %v302_v38  ;;  %v313_v46 = vsel %vm228_vm3, %v312_v47, %v263_v15 }
 0x1ab   :  { %v311_v54 = vperm.slane %v303_v50, %v7627_v14  ;;  %v319_v56 = vperm.slane %v313_v46, %v7627_v14  ;;  %v336_v58 = vrot.slane %v323_v51, 4  ;;  %v339_v59 = vsel %vm228_vm3, %v323_v51, %v338_v45 }
 0x1ac   :  { %v301_v55 = vsel %vm228_vm3, %v300_v49, %v259_v21  ;;  %v488_v0 = vrot.slane %v339_v59, 4  ;;  %v7666_v1 = vpop.permute.xlu0 %187 }
 0x1ad   :  { %v307_v61 = vperm.slane %v301_v55, %v7627_v14  ;;  %v328_v62 = vrot.slane %v311_v54, 4  ;;  %v331_v63 = vsel %vm228_vm3, %v311_v54, %v330_v53  ;;  %v332_v2 = vrot.slane %v319_v56, 4 }
 0x1ae   :  { %v335_v3 = vsel %vm228_vm3, %v319_v56, %v334_v43  ;;  %v337_v4 = vsel %vm228_vm3, %v336_v58, %v299_v29  ;;  %v464_v5 = vrot.slane %v331_v63, 4  ;;  %7056 = vrot.lane.b32.xlu0 %v7055_v42, %s10262_s20  ;;  %v7060_v15 = vpack.i.bf16 %v7671_v6, %v7666_v1 }
 0x1af   :  { %v324_v7 = vrot.slane %v307_v61, 4  ;;  %v329_v8 = vsel %vm228_vm3, %v328_v62, %v287_v32  ;;  %v476_v9 = vrot.slane %v337_v4, 4  ;;  %v489_v10 = vsel %vm228_vm3, %v488_v0, %v335_v3  ;;  %223 = vrot.lane.b32.xlu2 %v7599_v44, %s7400_s1  ;;  %199 = vrot.lane.b32.xlu1 %v7599_v44, %s10264_s0 }
 0x1b0   :  { %v333_v12 = vsel %vm228_vm3, %v332_v2, %v295_v25  ;;  %v490_v13 = vrot.slane %v335_v3, 4  ;;  %v327_v19 = vsel %vm228_vm3, %v307_v61, %v326_v52  ;;  %v452_v20 = vrot.slane %v329_v8, 4 }
 0x1b1   :  { %v478_v16 = vrot.slane %v333_v12, 4  ;;  %v325_v17 = vsel %vm228_vm3, %v324_v7, %v283_v31  ;;  %v465_v23 = vsel %vm228_vm3, %v464_v5, %v327_v19  ;;  %v466_v24 = vrot.slane %v327_v19, 4 }
 0x1b2   :  { %v491_v21 = vsel %vm228_vm3, %v339_v59, %v490_v13  ;;  %v454_v22 = vrot.slane %v325_v17, 4  ;;  %v453_v26 = vsel %vm228_vm3, %v452_v20, %v325_v17  ;;  %v471_v28 = vperm.slane %v465_v23, %v7615_v57 }
 0x1b3   :  { %v499_v25 = vperm.slane %v491_v21, %v7615_v57  ;;  %v477_v29 = vsel %vm228_vm3, %v476_v9, %v333_v12  ;;  %v459_v30 = vperm.slane %v453_v26, %v7615_v57  ;;  %v495_v32 = vperm.slane %v489_v10, %v7615_v57 }
 0x1b4   :  { %v483_v31 = vperm.slane %v477_v29, %v7615_v57  ;;  %v455_v33 = vsel %vm228_vm3, %v329_v8, %v454_v22  ;;  %v500_v34 = vrot.slane %v471_v28, 4  ;;  %v467_v40 = vsel %vm228_vm3, %v331_v63, %v466_v24 }
 0x1b5   :  { %v463_v38 = vperm.slane %v455_v33, %v7615_v57  ;;  %v479_v41 = vsel %vm228_vm3, %v337_v4, %v478_v16  ;;  %v524_v42 = vrot.slane %v495_v32, 4  ;;  %v475_v43 = vperm.slane %v467_v40, %v7615_v57 }
 0x1b6   :  { %v487_v47 = vperm.slane %v479_v41, %v7615_v57  ;;  %v536_v48 = vrot.slane %v499_v25, 4  ;;  %v501_v45 = vsel %vm228_vm3, %v500_v34, %v459_v30  ;;  %v502_v50 = vrot.slane %v459_v30, 4 }
 0x1b7   :  { %v514_v49 = vrot.slane %v463_v38, 4  ;;  %v526_v51 = vrot.slane %v483_v31, 4  ;;  %v507_v52 = vperm.slane %v501_v45, %v7627_v14  ;;  %v525_v53 = vsel %vm228_vm3, %v524_v42, %v483_v31  ;;  %7061 = vrot.lane.b32.xlu1 %v7060_v15, %s10262_s20 }
 0x1b8   :  { %v512_v54 = vrot.slane %v475_v43, 4  ;;  %v537_v46 = vsel %vm228_vm3, %v536_v48, %v487_v47  ;;  %v531_v55 = vperm.slane %v525_v53, %v7627_v14  ;;  %v538_v56 = vrot.slane %v487_v47, 4 }
 0x1b9   :  { %v543_v58 = vperm.slane %v537_v46, %v7627_v14  ;;  %v503_v59 = vsel %vm228_vm3, %v471_v28, %v502_v50  ;;  %v550_v61 = vrot.slane %v507_v52, 4  ;;  %v527_v63 = vsel %vm228_vm3, %v495_v32, %v526_v51 }
 0x1ba   :  { %v513_v60 = vsel %vm228_vm3, %v512_v54, %v463_v38  ;;  %v511_v62 = vperm.slane %v503_v59, %v7627_v14  ;;  %v548_v0 = vrot.slane %v531_v55, 4  ;;  %v535_v4 = vperm.slane %v527_v63, %v7627_v14 }
 0x1bb   :  { %v519_v2 = vperm.slane %v513_v60, %v7627_v14  ;;  %v556_v3 = vrot.slane %v543_v58, 4  ;;  %v7717_v5 = vsel %vm228_vm3, %v531_v55, %v550_v61  ;;  %v515_v8 = vsel %vm228_vm3, %v475_v43, %v514_v49 }
 0x1bc   :  { %v554_v7 = vrot.slane %v511_v62, 4  ;;  %v539_v9 = vsel %vm228_vm3, %v499_v25, %v538_v56  ;;  %v7722_v10 = vsel %vm228_vm3, %v548_v0, %v507_v52  ;;  %v552_v13 = vrot.slane %v535_v4, 4 }
 0x1bd   :  { %v7725_v12 = vsel %vm228_vm3, %v556_v3, %v519_v2  ;;  %v7730_v15 = vadd.f32 %v7631_v18, %v108_v35  ;;  %v558_v17 = vrot.slane %v519_v2, 4  ;;  %v523_v20 = vperm.slane %v515_v8, %v7627_v14 }
 0x1be   :  { %v7733_v16 = vsel %vm228_vm3, %v535_v4, %v554_v7  ;;  %v7736_v19 = vsel %vm228_vm3, %v552_v13, %v511_v62  ;;  %v547_v21 = vperm.slane %v539_v9, %v7627_v14  ;;  %v340_v30 = vrot.slane %v7671_v6, 4 }
 0x1bf   :  { %v7742_v22 = vpack.i.bf16 %v7679_v11, %v7730_v15  ;;  %v7745_v39 = vsel %vm228_vm3, %v543_v58, %v558_v17  ;;  %v562_v18 = vrot.slane %v523_v20, 4  ;;  %v342_v31 = vrot.slane %v7599_v44, 4 }
 0x1c0   :  { %v560_v35 = vrot.slane %v547_v21, 4  ;;  %v341_v40 = vsel %vm228_vm3, %v340_v30, %v7599_v44  ;;  %v366_v49 = vrot.slane %v7638_v27, 4 }
 0x1c1   :  { %7086 = vrot.lane.b32.xlu1 %v7742_v22, %s7399_s19  ;;  %v7750_v23 = vsel %vm228_vm3, %v547_v21, %v562_v18  ;;  %v343_v41 = vsel %vm228_vm3, %v7671_v6, %v342_v31  ;;  %v7769_v50 = vperm.slane %v341_v40, %v7615_v57 }
 0x1c2   :  { %v7753_v24 = vsel %vm228_vm3, %v560_v35, %v523_v20  ;;  %v7772_v51 = vperm.slane %v343_v41, %v7615_v57 }
 0x1c4   :  { %v402_v0 = vrot.slane %v7772_v51, 4 }
 0x1f9   :  { %v7755_v25 = vpop.permute.xlu2 %7041 }
 0x1fa   :  { %v7043_v42 = vunpack.i.l.bf16 %v7755_v25  ;;  %v7044_v53 = vunpack.i.h.bf16 %v7755_v25 }
 0x1fc   :  { %v740_v6 = vrot.slane %v7043_v42, 4  ;;  %v766_v35 = vrot.slane %v7044_v53, 4 }
 0x201   :  { %v212_v26 = vpop.permute.xlu2 %211 }
 0x202   :  { %v378_v47 = vrot.slane %v212_v26, 4 }
 0x209   :  { %v7037_v28 = vpop.permute.xlu1 %7036  ;;  %v7759_v33 = vpop.permute.xlu2 %223 }
 0x20a   :  { %v7038_v32 = vunpack.i.l.bf16 %v7037_v28  ;;  %v7039_v38 = vunpack.i.h.bf16 %v7037_v28  ;;  %v376_v43 = vrot.slane %v7759_v33, 4  ;;  %v379_v54 = vsel %vm228_vm3, %v7759_v33, %v378_v47 }
 0x20b   :  { %v387_v2 = vperm.slane %v379_v54, %v7615_v57 }
 0x20c   :  { %v742_v48 = vrot.slane %v7038_v32, 4  ;;  %v754_v52 = vrot.slane %v7039_v38, 4  ;;  %v377_v55 = vsel %vm228_vm3, %v376_v43, %v212_v26  ;;  %v741_v60 = vsel %vm228_vm3, %v740_v6, %v7038_v32 }
 0x20d   :  { %v383_v8 = vperm.slane %v377_v55, %v7615_v57  ;;  %v747_v20 = vperm.slane %v741_v60, %v7615_v57  ;;  %v424_v30 = vrot.slane %v387_v2, 4  ;;  %v354_v6 = vrot.slane %v7666_v1, 4 }
 0x20e   :  { %v743_v61 = vsel %vm228_vm3, %v7043_v42, %v742_v48 }
 0x20f   :  { %v790_v42 = vrot.slane %v747_v20, 4 }
 0x210   :  { %v7047_v29 = vpop.permute.xlu0 %7046 }
 0x211   :  { %v7048_v34 = vunpack.i.l.bf16 %v7047_v29  ;;  %v7049_v56 = vunpack.i.h.bf16 %v7047_v29  ;;  %v390_v29 = vrot.slane %v7769_v50, 4 }
 0x213   :  { %v752_v45 = vrot.slane %v7048_v34, 4  ;;  %v755_v58 = vsel %vm228_vm3, %v7048_v34, %v754_v52  ;;  %v778_v21 = vrot.slane %v7049_v56, 4  ;;  %v412_v34 = vrot.slane %v383_v8, 4 }
 0x214   :  { %v763_v9 = vperm.slane %v755_v58, %v7615_v57 }
 0x215   :  { %v753_v62 = vsel %vm228_vm3, %v752_v45, %v7039_v38 }
 0x216   :  { %v759_v18 = vperm.slane %v753_v62, %v7615_v57  ;;  %v800_v38 = vrot.slane %v763_v9, 4 }
 0x218   :  { %v218_v44 = vpop.permute.xlu0 %217  ;;  %v788_v47 = vrot.slane %v759_v18, 4 }
 0x219   :  { %v364_v46 = vrot.slane %v218_v44, 4  ;;  %v7065_v59 = vpack.i.bf16 %v218_v44, %v212_v26  ;;  %v7052_v3 = vpop.permute.xlu1 %7051  ;;  %v367_v4 = vsel %vm228_vm3, %v218_v44, %v366_v49 }
 0x21a   :  { %v7054_v13 = vunpack.i.h.bf16 %v7052_v3  ;;  %v7053_v17 = vunpack.i.l.bf16 %v7052_v3  ;;  %v375_v28 = vperm.slane %v367_v4, %v7615_v57 }
 0x21b   :  { %v365_v63 = vsel %vm228_vm3, %v364_v46, %v7638_v27  ;;  %7066 = vrot.lane.b32.xlu2 %v7065_v59, %s10262_s20  ;;  %v751_v27 = vperm.slane %v743_v61, %v7615_v57  ;;  %v789_v61 = vsel %vm228_vm3, %v788_v47, %v747_v20 }
 0x21c   :  { %v371_v7 = vperm.slane %v365_v63, %v7615_v57  ;;  %v776_v25 = vrot.slane %v7054_v13, 4  ;;  %v764_v26 = vrot.slane %v7053_v17, 4  ;;  %v779_v31 = vsel %vm228_vm3, %v7054_v13, %v778_v21 }
 0x21d   :  { %v767_v40 = vsel %vm228_vm3, %v7053_v17, %v766_v35  ;;  %v802_v43 = vrot.slane %v751_v27, 4  ;;  %v787_v49 = vperm.slane %v779_v31, %v7615_v57  ;;  %v426_v44 = vrot.slane %v375_v28, 4 }
 0x21e   :  { %v414_v32 = vrot.slane %v371_v7, 4  ;;  %v777_v41 = vsel %vm228_vm3, %v776_v25, %v7049_v56  ;;  %v765_v48 = vsel %vm228_vm3, %v764_v26, %v7044_v53  ;;  %v413_v52 = vsel %vm228_vm3, %v412_v34, %v371_v7 }
 0x21f   :  { %v783_v45 = vperm.slane %v777_v41, %v7615_v57  ;;  %v803_v54 = vsel %vm228_vm3, %v763_v9, %v802_v43  ;;  %v775_v46 = vperm.slane %v767_v40, %v7615_v57  ;;  %v791_v53 = vsel %vm228_vm3, %v759_v18, %v790_v42 }
 0x220   :  { %v415_v55 = vsel %vm228_vm3, %v383_v8, %v414_v32  ;;  %v801_v58 = vsel %vm228_vm3, %v800_v38, %v751_v27  ;;  %v771_v59 = vperm.slane %v765_v48, %v7615_v57  ;;  %v425_v60 = vsel %vm228_vm3, %v424_v30, %v375_v28 }
 0x221   :  { %v200_v56 = vpop.permute.xlu1 %199  ;;  %v419_v62 = vperm.slane %v413_v52, %v7627_v14  ;;  %v812_v4 = vrot.slane %v783_v45, 4  ;;  %v824_v7 = vrot.slane %v787_v49, 4  ;;  %v423_v8 = vperm.slane %v415_v55, %v7627_v14 }
 0x222   :  { %v352_v63 = vrot.slane %v200_v56, 4  ;;  %v7070_v3 = vpack.i.bf16 %v7759_v33, %v200_v56  ;;  %v427_v9 = vsel %vm228_vm3, %v387_v2, %v426_v44  ;;  %v7819_v13 = vperm.slane %v803_v54, %v7627_v14 }
 0x223   :  { %7081 = vrot.lane.b32.xlu2 %v7742_v22, %s7396_s29  ;;  %v826_v17 = vrot.slane %v775_v46, 4  ;;  %v431_v27 = vperm.slane %v425_v60, %v7627_v14  ;;  %v7826_v21 = vperm.slane %v789_v61, %v7627_v14  ;;  %v7829_v33 = vperm.slane %v791_v53, %v7627_v14 }
 0x224   :  { %v353_v20 = vsel %vm228_vm3, %v352_v63, %v7666_v1  ;;  %7071 = vrot.lane.b32.xlu0 %v7070_v3, %s10262_s20  ;;  %v7832_v18 = vperm.slane %v801_v58, %v7627_v14  ;;  %v814_v2 = vrot.slane %v771_v59, 4  ;;  %v435_v35 = vperm.slane %v427_v9, %v7627_v14  ;;  %s10273_s20 = smov 64  }
 0x225   :  { %v436_v25 = vrot.slane %v419_v62, 4  ;;  %v355_v26 = vsel %vm228_vm3, %v200_v56, %v354_v6  ;;  %v359_v28 = vperm.slane %v353_v20, %v7615_v57  ;;  %v813_v1 = vsel %vm228_vm3, %v812_v4, %v771_v59 }
 0x226   :  { %v825_v30 = vsel %vm228_vm3, %v824_v7, %v775_v46  ;;  %v440_v31 = vrot.slane %v423_v8, 4  ;;  %v363_v32 = vperm.slane %v355_v26, %v7615_v57  ;;  %v827_v34 = vsel %vm228_vm3, %v787_v49, %v826_v17 }
 0x227   :  { %v444_v38 = vrot.slane %v431_v27, 4  ;;  %v388_v40 = vrot.slane %v359_v28, 4  ;;  %v391_v41 = vsel %vm228_vm3, %v359_v28, %v390_v29  ;;  %v815_v42 = vsel %vm228_vm3, %v783_v45, %v814_v2 }
 0x228   :  { %v399_v43 = vperm.slane %v391_v41, %v7627_v14  ;;  %v400_v47 = vrot.slane %v363_v32, 4  ;;  %v403_v48 = vsel %vm228_vm3, %v363_v32, %v402_v0  ;;  %v819_v52 = vperm.slane %v813_v1, %v7627_v14 }
 0x229   :  { %v448_v44 = vrot.slane %v435_v35, 4  ;;  %v389_v6 = vsel %vm228_vm3, %v388_v40, %v7769_v50  ;;  %v411_v49 = vperm.slane %v403_v48, %v7627_v14  ;;  %v823_v55 = vperm.slane %v815_v42, %v7627_v14 }
 0x22a   :  { %v395_v54 = vperm.slane %v389_v6, %v7627_v14  ;;  %v401_v29 = vsel %vm228_vm3, %v400_v47, %v7772_v51  ;;  %v7855_v45 = vsel %vm228_vm3, %v440_v31, %v399_v43  ;;  %v442_v46 = vrot.slane %v399_v43, 4 }
 0x22b   :  { %v407_v0 = vperm.slane %v401_v29, %v7627_v14  ;;  %v449_v56 = vsel %vm228_vm3, %v448_v44, %v411_v49  ;;  %v450_v53 = vrot.slane %v411_v49, 4  ;;  %v835_v4 = vperm.slane %v827_v34, %v7627_v14 }
 0x22c   :  { %7076 = vrot.lane.b32.xlu0 %v7742_v22, %s7395_s28  ;;  %v7863_v50 = vsel %vm228_vm3, %v436_v25, %v395_v54  ;;  %v438_v58 = vrot.slane %v395_v54, 4  ;;  %v7866_v51 = vsel %vm228_vm3, %v423_v8, %v442_v46  ;;  %v588_v59 = vrot.slane %v449_v56, 4 }
 0x22d   :  { %v445_v60 = vsel %vm228_vm3, %v444_v38, %v407_v0  ;;  %v446_v61 = vrot.slane %v407_v0, 4  ;;  %v451_v63 = vsel %vm228_vm3, %v435_v35, %v450_v53  ;;  %v566_v3 = vrot.slane %v7863_v50, 4 }
 0x22e   :  { %v7873_v7 = vsel %vm228_vm3, %v419_v62, %v438_v58  ;;  %v589_v9 = vsel %vm228_vm3, %v588_v59, %v445_v60  ;;  %v590_v17 = vrot.slane %v445_v60, 4  ;;  %v831_v20 = vperm.slane %v825_v30, %v7627_v14 }
 0x22f   :  { %v447_v8 = vsel %vm228_vm3, %v431_v27, %v446_v61  ;;  %v7880_v2 = vsel %vm228_vm3, %v7855_v45, %v566_v3  ;;  %v578_v35 = vrot.slane %v7873_v7, 4  ;;  %v840_v25 = vrot.slane %v823_v55, 4 }
 0x230   :  { %v591_v26 = vsel %vm228_vm3, %v449_v56, %v590_v17  ;;  %v600_v28 = vrot.slane %v451_v63, 4  ;;  %v602_v1 = vrot.slane %v447_v8, 4  ;;  %v846_v62 = vrot.slane %v7832_v18, 4 }
 0x231   :  { %v850_v31 = vrot.slane %v7819_v13, 4  ;;  %v836_v32 = vrot.slane %v819_v52, 4  ;;  %v7888_v30 = vsel %vm228_vm3, %v7866_v51, %v578_v35  ;;  %v842_v27 = vrot.slane %v7829_v33, 4 }
 0x232   :  { %v848_v34 = vrot.slane %v835_v4, 4  ;;  %v601_v38 = vsel %vm228_vm3, %v600_v28, %v447_v8  ;;  %v603_v40 = vsel %vm228_vm3, %v451_v63, %v602_v1  ;;  %v838_v41 = vrot.slane %v7826_v21, 4 }
 0x233   :  { %v844_v42 = vrot.slane %v831_v20, 4  ;;  %v847_v43 = vsel %vm228_vm3, %v831_v20, %v846_v62  ;;  %v677_v47 = vpack.c.bf16 %v7717_v5, %v7717_v5  ;;  %v843_v48 = vsel %vm228_vm3, %v823_v55, %v842_v27 }
 0x234   :  { %7091 = vrot.lane.b32.xlu0 %v7742_v22, %s7394_s27  ;;  %v851_v44 = vsel %vm228_vm3, %v835_v4, %v850_v31  ;;  %v841_v6 = vsel %vm228_vm3, %v840_v25, %v7829_v33  ;;  %v676_v49 = vpack.c.bf16 %v7722_v10, %v7722_v10  ;;  %v7906_v54 = vperm.slane %v589_v9, %v7615_v57 }
 0x235   :  { %v7909_v29 = vperm.slane %v591_v26, %v7615_v57  ;;  %v837_v46 = vsel %vm228_vm3, %v836_v32, %v7826_v21  ;;  %v839_v0 = vsel %vm228_vm3, %v819_v52, %v838_v41  ;;  %v849_v55 = vsel %vm228_vm3, %v848_v34, %v7819_v13 }
 0x236   :  { %v1002_v56 = vrot.slane %v847_v43, 4  ;;  %v680_v33 = vpack.c.bf16 %v7725_v12, %v7725_v12  ;;  %v679_v53 = vpack.c.bf16 %v7733_v16, %v7733_v16  ;;  %v7921_v58 = vperm.slane %v601_v38, %v7615_v57 }
 0x237   :  { %v7924_v59 = vperm.slane %v603_v40, %v7615_v57  ;;  %v845_v21 = vsel %vm228_vm3, %v844_v42, %v7832_v18  ;;  %v964_v52 = vrot.slane %v841_v6, 4  ;;  %v1000_v60 = vrot.slane %v851_v44, 4 }
 0x238   :  { %v966_v61 = vrot.slane %v837_v46, 4  ;;  %v976_v13 = vrot.slane %v843_v48, 4  ;;  %v978_v63 = vrot.slane %v839_v0, 4  ;;  %v564_v3 = vrot.slane %v7855_v45, 4 }
 0x239   :  { %v576_v4 = vrot.slane %v7866_v51, 4  ;;  %v638_v9 = vrot.slane %v7906_v54, 4  ;;  %v650_v17 = vrot.slane %v7909_v29, 4  ;;  %v965_v20 = vsel %vm228_vm3, %v964_v52, %v837_v46 }
 0x23a   :  { %v977_v8 = vsel %vm228_vm3, %v976_v13, %v839_v0  ;;  %v988_v35 = vrot.slane %v849_v55, 4  ;;  %v990_v25 = vrot.slane %v845_v21, 4  ;;  %v636_v18 = vrot.slane %v7921_v58, 4 }
 0x23b   :  { %v648_v26 = vrot.slane %v7924_v59, 4  ;;  %v971_v28 = vperm.slane %v965_v20, %v7615_v57  ;;  %v983_v1 = vperm.slane %v977_v8, %v7615_v57  ;;  %v1001_v31 = vsel %vm228_vm3, %v1000_v60, %v847_v43 }
 0x23c   :  { %v989_v62 = vsel %vm228_vm3, %v988_v35, %v845_v21  ;;  %v967_v32 = vsel %vm228_vm3, %v841_v6, %v966_v61  ;;  %v979_v27 = vsel %vm228_vm3, %v843_v48, %v978_v63  ;;  %v1007_v38 = vperm.slane %v1001_v31, %v7615_v57 }
 0x23d   :  { %v995_v34 = vperm.slane %v989_v62, %v7615_v57  ;;  %v1012_v40 = vrot.slane %v983_v1, 4  ;;  %v1014_v41 = vrot.slane %v971_v28, 4  ;;  %v975_v42 = vperm.slane %v967_v32, %v7615_v57 }
 0x23e   :  { %v987_v46 = vperm.slane %v979_v27, %v7615_v57  ;;  %v991_v0 = vsel %vm228_vm3, %v849_v55, %v990_v25  ;;  %v1003_v21 = vsel %vm228_vm3, %v851_v44, %v1002_v56  ;;  %v1036_v52 = vrot.slane %v1007_v38, 4 }
 0x23f   :  { %v1013_v43 = vsel %vm228_vm3, %v1012_v40, %v971_v28  ;;  %v1038_v6 = vrot.slane %v995_v34, 4  ;;  %v999_v48 = vperm.slane %v991_v0, %v7615_v57  ;;  %v1011_v61 = vperm.slane %v1003_v21, %v7615_v57 }
 0x240   :  { %v1019_v60 = vperm.slane %v1013_v43, %v7627_v14  ;;  %v1024_v13 = vrot.slane %v987_v46, 4  ;;  %v1026_v63 = vrot.slane %v975_v42, 4  ;;  %v1037_v20 = vsel %vm228_vm3, %v1036_v52, %v995_v34 }
 0x241   :  { %v1015_v8 = vsel %vm228_vm3, %v983_v1, %v1014_v41  ;;  %v1039_v55 = vsel %vm228_vm3, %v1007_v38, %v1038_v6  ;;  %v1050_v35 = vrot.slane %v999_v48, 4  ;;  %v1043_v44 = vperm.slane %v1037_v20, %v7627_v14 }
 0x242   :  { %v1025_v56 = vsel %vm228_vm3, %v1024_v13, %v975_v42  ;;  %v1048_v25 = vrot.slane %v1011_v61, 4  ;;  %v1062_v28 = vrot.slane %v1019_v60, 4  ;;  %v1023_v31 = vperm.slane %v1015_v8, %v7627_v14 }
 0x243   :  { %v1031_v62 = vperm.slane %v1025_v56, %v7627_v14  ;;  %v1047_v32 = vperm.slane %v1039_v55, %v7627_v14  ;;  %v1027_v27 = vsel %vm228_vm3, %v987_v46, %v1026_v63  ;;  %v1060_v34 = vrot.slane %v1043_v44, 4 }
 0x244   :  { %v1049_v1 = vsel %vm228_vm3, %v1048_v25, %v999_v48  ;;  %v1063_v38 = vsel %vm228_vm3, %v1043_v44, %v1062_v28  ;;  %v1035_v40 = vperm.slane %v1027_v27, %v7627_v14  ;;  %v1066_v52 = vrot.slane %v1023_v31, 4 }
 0x245   :  { %v1055_v41 = vperm.slane %v1049_v1, %v7627_v14  ;;  %v1189_v42 = vpack.c.bf16 %v1063_v38, %v1063_v38  ;;  %v1064_v0 = vrot.slane %v1047_v32, 4  ;;  %v1070_v21 = vrot.slane %v1031_v62, 4 }
 0x246   :  { %v1061_v43 = vsel %vm228_vm3, %v1060_v34, %v1019_v60  ;;  %v1051_v6 = vsel %vm228_vm3, %v1011_v61, %v1050_v35  ;;  %v1074_v13 = vrot.slane %v1035_v40, 4  ;;  %v1067_v44 = vsel %vm228_vm3, %v1047_v32, %v1066_v52 }
 0x247   :  { %v1188_v20 = vpack.c.bf16 %v1061_v43, %v1061_v43  ;;  %v1068_v46 = vrot.slane %v1055_v41, 4  ;;  %v1735_v63 = vsel %vm71_vm1, %v1189_v42, 0  ;;  %v1065_v48 = vsel %vm228_vm3, %v1064_v0, %v1023_v31 }
 0x248   :  { %1744 = vmatpush.bf16.xpose.msra.mxu0 %v1735_v63  ;;  %v1190_v8 = vpack.c.bf16 %v1065_v48, %v1065_v48  ;;  %v1071_v55 = vsel %vm228_vm3, %v1055_v41, %v1070_v21  ;;  %v1059_v56 = vperm.slane %v1051_v6, %v7627_v14  ;;  %v1191_v35 = vpack.c.bf16 %v1067_v44, %v1067_v44 }
 0x249   :  { %v1716_v60 = vsel %vm71_vm1, %v1188_v20, 0  ;;  %v1069_v25 = vsel %vm228_vm3, %v1068_v46, %v1031_v62  ;;  %v1193_v61 = vpack.c.bf16 %v1071_v55, %v1071_v55  ;;  %v565_v62 = vsel %vm228_vm3, %v564_v3, %v7863_v50 }
 0x24a   :  { %1725 = vmatpush.bf16.xpose.msrb.mxu3 %v1716_v60  ;;  %v1192_v28 = vpack.c.bf16 %v1069_v25, %v1069_v25  ;;  %v1754_v27 = vsel %vm71_vm1, %v1190_v8, 0  ;;  %v1075_v31 = vsel %vm228_vm3, %v1059_v56, %v1074_v13  ;;  %v1072_v34 = vrot.slane %v1059_v56, 4 }
 0x24b   :  { %v1811_v1 = vsel %vm71_vm1, %v1193_v61, 0  ;;  %v1773_v32 = vsel %vm71_vm1, %v1191_v35, 0  ;;  %v1195_v38 = vpack.c.bf16 %v1075_v31, %v1075_v31  ;;  %v571_v0 = vperm.slane %v565_v62, %v7615_v57 }
 0x24c   :  { %v1792_v41 = vsel %vm71_vm1, %v1192_v28, 0  ;;  %1782 = vmatpush.bf16.xpose.msrb.mxu1 %v1773_v32  ;;  %v1073_v42 = vsel %vm228_vm3, %v1072_v34, %v1035_v40  ;;  %v577_v21 = vsel %vm228_vm3, %v576_v4, %v7873_v7  ;;  %v637_v50 = vsel %vm228_vm3, %v636_v18, %v7906_v54  ;;  %v7062_v32 = vpop.permute.xlu1 %7061 }
 0x24d   :  { %1801 = vmatpush.bf16.xpose.msrb.mxu2 %v1792_v41  ;;  %v1849_v43 = vsel %vm71_vm1, %v1195_v38, 0  ;;  %v1194_v52 = vpack.c.bf16 %v1073_v42, %v1073_v42  ;;  %v583_v45 = vperm.slane %v577_v21, %v7615_v57  ;;  %v643_v3 = vperm.slane %v637_v50, %v7627_v14  ;;  %v7057_v38 = vpop.permute.xlu0 %7056 }
 0x24e   :  { %v614_v40 = vrot.slane %v571_v0, 4  ;;  %v639_v51 = vsel %vm228_vm3, %v7921_v58, %v638_v9  ;;  %v575_v7 = vperm.slane %v7880_v2, %v7615_v57  ;;  %v587_v13 = vperm.slane %v7888_v30, %v7615_v57 }
 0x24f   :  { %v1830_v4 = vsel %vm71_vm1, %v1194_v52, 0  ;;  %6542 = vmatmul.msk.bf16.vlgmr.msra.gmra.mxu0 %vm71_vm1, %v677_v47  ;;  %v612_v18 = vrot.slane %v583_v45, 4  ;;  %v647_v6 = vperm.slane %v639_v51, %v7627_v14  ;;  %v660_v54 = vrot.slane %v643_v3, 4 }
 0x250   :  { %1820 = vmatpush.bf16.xpose.msrb.mxu0 %v1811_v1  ;;  %v615_v20 = vsel %vm228_vm3, %v583_v45, %v614_v40  ;;  %v649_v2 = vsel %vm228_vm3, %v648_v26, %v7909_v29  ;;  %v626_v58 = vrot.slane %v575_v7, 4  ;;  %v624_v30 = vrot.slane %v587_v13, 4 }
 0x251   :  { %6541 = vmatmul.msk.bf16.vlgmr.msrb.gmra.mxu3 %vm71_vm1, %v676_v49  ;;  %v613_v5 = vsel %vm228_vm3, %v612_v18, %v571_v0  ;;  %v623_v47 = vperm.slane %v615_v20, %v7627_v14  ;;  %v664_v9 = vrot.slane %v647_v6, 4  ;;  %v655_v63 = vperm.slane %v649_v2, %v7627_v14 }
 0x252   :  { %1763 = vmatpush.bf16.xpose.msra.mxu3 %v1754_v27  ;;  %v619_v46 = vperm.slane %v613_v5, %v7627_v14  ;;  %v627_v48 = vsel %vm228_vm3, %v587_v13, %v626_v58  ;;  %v651_v10 = vsel %vm228_vm3, %v7924_v59, %v650_v17  ;;  %v625_v8 = vsel %vm228_vm3, %v624_v30, %v575_v7 }
 0x253   :  { %6544 = vmatmul.msk.bf16.vlgmr.msrb.gmra.mxu1 %vm71_vm1, %v679_v53  ;;  %v8033_v49 = vsel %vm228_vm3, %v664_v9, %v623_v47  ;;  %v666_v26 = vrot.slane %v623_v47, 4  ;;  %v635_v55 = vperm.slane %v627_v48, %v7627_v14  ;;  %v631_v16 = vperm.slane %v625_v8, %v7627_v14 }
 0x254   :  { %1858 = vmatpush.bf16.xpose.msra.mxu1 %v1849_v43  ;;  %6545 = vmatmul.msk.bf16.vlgmr.msrb.gmra.mxu2 %vm71_vm1, %v680_v33  ;;  %v8042_v29 = vsel %vm228_vm3, %v660_v54, %v619_v46  ;;  %v662_v59 = vrot.slane %v619_v46, 4  ;;  %v668_v17 = vrot.slane %v655_v63, 4  ;;  %v659_v44 = vperm.slane %v651_v10, %v7627_v14 }
 0x255   :  { %v8046_v53 = vsel %vm228_vm3, %v647_v6, %v666_v26  ;;  %v670_v60 = vrot.slane %v631_v16, 4  ;;  %v674_v25 = vrot.slane %v635_v55, 4  ;;  %v681_v27 = vpack.c.bf16 %v7745_v39, %v7745_v39 }
 0x256   :  { %v8050_v56 = vsel %vm228_vm3, %v643_v3, %v662_v59  ;;  %v8053_v12 = vsel %vm228_vm3, %v668_v17, %v631_v16  ;;  %v672_v33 = vrot.slane %v659_v44, 4  ;;  %v678_v31 = vpack.c.bf16 %v7736_v19, %v7736_v19 }
 0x257   :  { %v8056_v61 = vsel %vm228_vm3, %v655_v63, %v670_v60  ;;  %v8059_v35 = vsel %vm228_vm3, %v659_v44, %v674_v25  ;;  %v683_v34 = vpack.c.bf16 %v7750_v23, %v7750_v23  ;;  %v682_v1 = vpack.c.bf16 %v7753_v24, %v7753_v24 }
 0x258   :  { %v8062_v28 = vsel %vm228_vm3, %v672_v33, %v635_v55  ;;  %v7064_v62 = vunpack.i.h.bf16 %v7062_v32  ;;  %v7058_v41 = vunpack.i.l.bf16 %v7057_v38  ;;  %v7059_v42 = vunpack.i.h.bf16 %v7057_v38 }
 0x259   :  { %v7063_v45 = vunpack.i.l.bf16 %v7062_v32 }
 0x25a   :  { %1839 = vmatpush.bf16.xpose.msrb.mxu3 %v1830_v4  ;;  %v852_v0 = vrot.slane %v7064_v62, 4  ;;  %v854_v21 = vrot.slane %v7058_v41, 4  ;;  %v878_v52 = vrot.slane %v7059_v42, 4 }
 0x25b   :  { %v866_v4 = vrot.slane %v7063_v45, 4 }
 0x25c   :  { %v853_v23 = vsel %vm228_vm3, %v852_v0, %v7058_v41  ;;  %v855_v50 = vsel %vm228_vm3, %v7064_v62, %v854_v21 }
 0x25d   :  { %v859_v51 = vperm.slane %v853_v23, %v7615_v57  ;;  %v863_v7 = vperm.slane %v855_v50, %v7615_v57 }
 0x25f   :  { %6546 = vmatmul.msk.bf16.vlgmr.msrb.gmra.mxu0 %vm71_vm1, %v681_v27  ;;  %v914_v30 = vrot.slane %v863_v7, 4  ;;  %v902_v48 = vrot.slane %v859_v51, 4 }
 0x261   :  { %6543 = vmatmul.msk.bf16.vlgmr.msra.gmra.mxu3 %vm71_vm1, %v678_v31 }
 0x263   :  { %6548 = vmatmul.msk.bf16.vlgmr.msra.gmra.mxu1 %vm71_vm1, %v683_v34 }
 0x271   :  { %6547 = vmatmul.msk.bf16.vlgmr.msrb.gmra.mxu3 %vm71_vm1, %v682_v1 }
 0x275   :  { %v7067_v39 = vpop.permute.xlu2 %7066 }
 0x276   :  { %v7069_v19 = vunpack.i.h.bf16 %v7067_v39  ;;  %v7068_v3 = vunpack.i.l.bf16 %v7067_v39 }
 0x278   :  { %v876_v43 = vrot.slane %v7069_v19, 4  ;;  %v879_v24 = vsel %vm228_vm3, %v7069_v19, %v878_v52  ;;  %v890_v13 = vrot.slane %v7068_v3, 4 }
 0x279   :  { %v887_v6 = vperm.slane %v879_v24, %v7615_v57 }
 0x27a   :  { %v877_v40 = vsel %vm228_vm3, %v876_v43, %v7059_v42 }
 0x27b   :  { %v883_v2 = vperm.slane %v877_v40, %v7615_v57  ;;  %v938_v10 = vrot.slane %v887_v6, 4 }
 0x27d   :  { %v926_v44 = vrot.slane %v883_v2, 4 }
 0x296   :  { %v7072_v18 = vpop.permute.xlu0 %7071 }
 0x297   :  { %v7074_v54 = vunpack.i.h.bf16 %v7072_v18  ;;  %v7073_v20 = vunpack.i.l.bf16 %v7072_v18 }
 0x299   :  { %v888_v58 = vrot.slane %v7074_v54, 4  ;;  %v891_v5 = vsel %vm228_vm3, %v7074_v54, %v890_v13  ;;  %v864_v47 = vrot.slane %v7073_v20, 4  ;;  %v867_v9 = vsel %vm228_vm3, %v7073_v20, %v866_v4 }
 0x29a   :  { %v899_v46 = vperm.slane %v891_v5, %v7615_v57  ;;  %v875_v63 = vperm.slane %v867_v9, %v7615_v57 }
 0x29b   :  { %v889_v26 = vsel %vm228_vm3, %v888_v58, %v7068_v3  ;;  %v865_v8 = vsel %vm228_vm3, %v864_v47, %v7063_v45 }
 0x29c   :  { %v895_v55 = vperm.slane %v889_v26, %v7615_v57  ;;  %v936_v59 = vrot.slane %v899_v46, 4  ;;  %v871_v16 = vperm.slane %v865_v8, %v7615_v57  ;;  %v912_v17 = vrot.slane %v875_v63, 4 }
 0x29d   :  { %v915_v60 = vsel %vm228_vm3, %v875_v63, %v914_v30  ;;  %v939_v25 = vsel %vm228_vm3, %v899_v46, %v938_v10 }
 0x29e   :  { %v924_v33 = vrot.slane %v895_v55, 4  ;;  %v900_v27 = vrot.slane %v871_v16, 4  ;;  %v903_v31 = vsel %vm228_vm3, %v871_v16, %v902_v48  ;;  %v913_v34 = vsel %vm228_vm3, %v912_v17, %v863_v7 }
 0x29f   :  { %v911_v1 = vperm.slane %v903_v31, %v7627_v14  ;;  %v919_v32 = vperm.slane %v913_v34, %v7627_v14  ;;  %v923_v38 = vperm.slane %v915_v60, %v7627_v14  ;;  %v927_v39 = vsel %vm228_vm3, %v895_v55, %v926_v44 }
 0x2a0   :  { %v901_v62 = vsel %vm228_vm3, %v900_v27, %v859_v51  ;;  %v925_v41 = vsel %vm228_vm3, %v924_v33, %v883_v2  ;;  %v935_v19 = vperm.slane %v927_v39, %v7627_v14  ;;  %v937_v42 = vsel %vm228_vm3, %v936_v59, %v887_v6 }
 0x2a1   :  { %v907_v0 = vperm.slane %v901_v62, %v7627_v14  ;;  %v931_v21 = vperm.slane %v925_v41, %v7627_v14  ;;  %v943_v43 = vperm.slane %v937_v42, %v7627_v14  ;;  %v947_v52 = vperm.slane %v939_v25, %v7627_v14 }
 0x2a2   :  { %v952_v45 = vrot.slane %v935_v19, 4  ;;  %v954_v23 = vrot.slane %v911_v1, 4  ;;  %v958_v50 = vrot.slane %v919_v32, 4  ;;  %v962_v3 = vrot.slane %v923_v38, 4 }
 0x2a3   :  { %v948_v24 = vrot.slane %v931_v21, 4  ;;  %v950_v40 = vrot.slane %v907_v0, 4  ;;  %v956_v51 = vrot.slane %v943_v43, 4  ;;  %v960_v7 = vrot.slane %v947_v52, 4 }
 0x2a4   :  { %v955_v4 = vsel %vm228_vm3, %v935_v19, %v954_v23  ;;  %v963_v18 = vsel %vm228_vm3, %v947_v52, %v962_v3  ;;  %v953_v6 = vsel %vm228_vm3, %v952_v45, %v911_v1  ;;  %v959_v20 = vsel %vm228_vm3, %v943_v43, %v958_v50 }
 0x2a5   :  { %v961_v13 = vsel %vm228_vm3, %v960_v7, %v923_v38  ;;  %v1088_v54 = vrot.slane %v955_v4, 4  ;;  %v949_v58 = vsel %vm228_vm3, %v948_v24, %v907_v0  ;;  %v1112_v5 = vrot.slane %v963_v18, 4 }
 0x2a6   :  { %v1100_v2 = vrot.slane %v961_v13, 4  ;;  %v951_v47 = vsel %vm228_vm3, %v931_v21, %v950_v40  ;;  %v957_v9 = vsel %vm228_vm3, %v956_v51, %v919_v32  ;;  %v1076_v30 = vrot.slane %v953_v6, 4 }
 0x2a7   :  { %v1078_v46 = vrot.slane %v949_v58, 4  ;;  %v1114_v63 = vrot.slane %v959_v20, 4  ;;  %v1089_v48 = vsel %vm228_vm3, %v1088_v54, %v951_v47  ;;  %v1090_v10 = vrot.slane %v951_v47, 4 }
 0x2a8   :  { %v1077_v26 = vsel %vm228_vm3, %v1076_v30, %v949_v58  ;;  %v1095_v8 = vperm.slane %v1089_v48, %v7615_v57  ;;  %v1101_v55 = vsel %vm228_vm3, %v1100_v2, %v957_v9  ;;  %v1102_v59 = vrot.slane %v957_v9, 4 }
 0x2a9   :  { %v1083_v16 = vperm.slane %v1077_v26, %v7615_v57  ;;  %v1107_v17 = vperm.slane %v1101_v55, %v7615_v57  ;;  %v1113_v44 = vsel %vm228_vm3, %v1112_v5, %v959_v20  ;;  %v1079_v60 = vsel %vm228_vm3, %v953_v6, %v1078_v46 }
 0x2aa   :  { %v1119_v25 = vperm.slane %v1113_v44, %v7615_v57  ;;  %v1124_v33 = vrot.slane %v1095_v8, 4  ;;  %v1087_v27 = vperm.slane %v1079_v60, %v7615_v57  ;;  %v1091_v31 = vsel %vm228_vm3, %v955_v4, %v1090_v10 }
 0x2ab   :  { %v1126_v34 = vrot.slane %v1083_v16, 4  ;;  %v1150_v1 = vrot.slane %v1107_v17, 4  ;;  %v1099_v32 = vperm.slane %v1091_v31, %v7615_v57  ;;  %v1103_v38 = vsel %vm228_vm3, %v961_v13, %v1102_v59 }
 0x2ac   :  { %v1125_v39 = vsel %vm228_vm3, %v1124_v33, %v1083_v16  ;;  %v1148_v62 = vrot.slane %v1119_v25, 4  ;;  %v1111_v41 = vperm.slane %v1103_v38, %v7615_v57  ;;  %v1115_v19 = vsel %vm228_vm3, %v963_v18, %v1114_v63 }
 0x2ad   :  { %v1131_v42 = vperm.slane %v1125_v39, %v7627_v14  ;;  %v1127_v0 = vsel %vm228_vm3, %v1095_v8, %v1126_v34  ;;  %v1151_v21 = vsel %vm228_vm3, %v1119_v25, %v1150_v1  ;;  %v1123_v43 = vperm.slane %v1115_v19, %v7615_v57 }
 0x2ae   :  { %v1149_v52 = vsel %vm228_vm3, %v1148_v62, %v1107_v17  ;;  %v1135_v45 = vperm.slane %v1127_v0, %v7627_v14  ;;  %v1159_v23 = vperm.slane %v1151_v21, %v7627_v14  ;;  %v1136_v50 = vrot.slane %v1099_v32, 4 }
 0x2af   :  { %v1155_v3 = vperm.slane %v1149_v52, %v7627_v14  ;;  %v1174_v24 = vrot.slane %v1131_v42, 4  ;;  %v1160_v40 = vrot.slane %v1123_v43, 4  ;;  %v1138_v51 = vrot.slane %v1087_v27, 4 }
 0x2b0   :  { %v1176_v7 = vrot.slane %v1159_v23, 4  ;;  %v1178_v4 = vrot.slane %v1135_v45, 4  ;;  %v1137_v18 = vsel %vm228_vm3, %v1136_v50, %v1087_v27  ;;  %v1162_v6 = vrot.slane %v1111_v41, 4 }
 0x2b1   :  { %v1172_v13 = vrot.slane %v1155_v3, 4  ;;  %v1175_v54 = vsel %vm228_vm3, %v1155_v3, %v1174_v24  ;;  %v1143_v20 = vperm.slane %v1137_v18, %v7627_v14  ;;  %v1161_v2 = vsel %vm228_vm3, %v1160_v40, %v1111_v41 }
 0x2b2   :  { %v1177_v58 = vsel %vm228_vm3, %v1176_v7, %v1135_v45  ;;  %v1197_v5 = vpack.c.bf16 %v1175_v54, %v1175_v54  ;;  %v1179_v47 = vsel %vm228_vm3, %v1159_v23, %v1178_v4  ;;  %v1167_v9 = vperm.slane %v1161_v2, %v7627_v14 }
 0x2b3   :  { %v1173_v30 = vsel %vm228_vm3, %v1172_v13, %v1131_v42  ;;  %v1198_v46 = vpack.c.bf16 %v1177_v58, %v1177_v58  ;;  %v1199_v63 = vpack.c.bf16 %v1179_v47, %v1179_v47  ;;  %v1139_v48 = vsel %vm228_vm3, %v1099_v32, %v1138_v51 }
 0x2b4   :  { %v1196_v10 = vpack.c.bf16 %v1173_v30, %v1173_v30  ;;  %v1887_v26 = vsel %vm71_vm1, %v1197_v5, 0  ;;  %v1180_v8 = vrot.slane %v1167_v9, 4  ;;  %v1147_v55 = vperm.slane %v1139_v48, %v7627_v14 }
 0x2b5   :  { %v1906_v59 = vsel %vm71_vm1, %v1198_v46, 0  ;;  %1896 = vmatpush.bf16.xpose.msra.mxu0 %v1887_v26  ;;  %v1925_v16 = vsel %vm71_vm1, %v1199_v63, 0  ;;  %v1163_v17 = vsel %vm228_vm3, %v1123_v43, %v1162_v6  ;;  %v1182_v44 = vrot.slane %v1143_v20, 4 }
 0x2b6   :  { %v1868_v60 = vsel %vm71_vm1, %v1196_v10, 0  ;;  %1915 = vmatpush.bf16.xpose.msra.mxu3 %v1906_v59  ;;  %1934 = vmatpush.bf16.xpose.msrb.mxu1 %v1925_v16  ;;  %v1181_v25 = vsel %vm228_vm3, %v1180_v8, %v1143_v20  ;;  %v1171_v33 = vperm.slane %v1163_v17, %v7627_v14  ;;  %v1186_v27 = vrot.slane %v1147_v55, 4 }
 0x2b7   :  { %1877 = vmatpush.bf16.xpose.msra.mxu2 %v1868_v60  ;;  %v1200_v31 = vpack.c.bf16 %v1181_v25, %v1181_v25  ;;  %v1183_v34 = vsel %vm228_vm3, %v1167_v9, %v1182_v44  ;;  %v685_v42 = vpack.c.bf16 %v8050_v56, %v8050_v56  ;;  %v686_v43 = vpack.c.bf16 %v8033_v49, %v8033_v49  ;;  %v8223_v25 = vpop.permute.xlu0 %7076 }
 0x2b8   :  { %v1184_v1 = vrot.slane %v1171_v33, 4  ;;  %v1201_v32 = vpack.c.bf16 %v1183_v34, %v1183_v34  ;;  %v1187_v38 = vsel %vm228_vm3, %v1171_v33, %v1186_v27  ;;  %v687_v52 = vpack.c.bf16 %v8046_v53, %v8046_v53 }
 0x2b9   :  { %v1944_v39 = vsel %vm71_vm1, %v1200_v31, 0  ;;  %v1203_v62 = vpack.c.bf16 %v1187_v38, %v1187_v38  ;;  %v684_v45 = vpack.c.bf16 %v8042_v29, %v8042_v29  ;;  %v689_v49 = vpack.c.bf16 %v8056_v61, %v8056_v61  ;;  %v8229_v38 = vpop.permute.xlu2 %7081 }
 0x2ba   :  { %v1185_v41 = vsel %vm228_vm3, %v1184_v1, %v1147_v55  ;;  %v1963_v19 = vsel %vm71_vm1, %v1201_v32, 0  ;;  %v690_v53 = vpack.c.bf16 %v8062_v28, %v8062_v28  ;;  %v691_v29 = vpack.c.bf16 %v8059_v35, %v8059_v35 }
 0x2bb   :  { %v1202_v0 = vpack.c.bf16 %v1185_v41, %v1185_v41  ;;  %v2001_v21 = vsel %vm71_vm1, %v1203_v62, 0  ;;  %v688_v3 = vpack.c.bf16 %v8053_v12, %v8053_v12 }
 0x2bc   :  { %6550 = vmatmul.msk.bf16.vlgmr.msra.gmra.mxu0 %vm71_vm1, %v685_v42 }
 0x2bd   :  { %1972 = vmatpush.bf16.xpose.msrb.mxu0 %v1963_v19  ;;  %v1982_v23 = vsel %vm71_vm1, %v1202_v0, 0  ;;  %6551 = vmatmul.msk.bf16.vlgmr.msra.gmra.mxu3 %vm71_vm1, %v686_v43 }
 0x2be   :  { %2010 = vmatpush.bf16.xpose.msra.mxu1 %v2001_v21  ;;  %1991 = vmatpush.bf16.xpose.msrb.mxu3 %v1982_v23 }
 0x2bf   :  { %1953 = vmatpush.bf16.xpose.msrb.mxu2 %v1944_v39  ;;  %6552 = vmatmul.msk.bf16.vlgmr.msrb.gmra.mxu1 %vm71_vm1, %v687_v52  ;;  %v8231_v39 = vpop.permute.xlu0 %7091 }
 0x2c0   :  { %6549 = vmatmul.msk.bf16.vlgmr.msra.gmra.mxu2 %vm71_vm1, %v684_v45 }
 0x2cc   :  { %v1746_v56 = vpop.f32.mrf.mxu0  ;;  %6554 = vmatmul.msk.bf16.vlgmr.msrb.gmra.mxu0 %vm71_vm1, %v689_v49 }
 0x2cd   :  { %v8182_v50 = vmul.f32 0.35355338, %v1746_v56  ;;  %6555 = vmatmul.msk.bf16.vlgmr.msrb.gmra.mxu3 %vm71_vm1, %v690_v53 }
 0x2cf   :  { %6556 = vmatmul.msk.bf16.vlgmr.msra.gmra.mxu1 %vm71_vm1, %v691_v29  ;;  %v2035_v61 = vsel %vm71_vm1, %v8182_v50, -inf }
 0x2d0   :  { %6553 = vmatmul.msk.bf16.vlgmr.msrb.gmra.mxu2 %vm71_vm1, %v688_v3  ;;  %v1784_v28 = vpop.f32.mrf.mxu1  ;;  %2036 = vmax.xlane.f32.xlu0 %v2035_v61 }
 0x2d1   :  { %v8192_v24 = vmul.f32 0.35355338, %v1784_v28 }
 0x2d3   :  { %v2041_v35 = vsel %vm71_vm1, %v8192_v24, -inf }
 0x2d4   :  { %v1727_v40 = vpop.f32.mrf.mxu3  ;;  %2042 = vmax.xlane.f32.xlu2 %v2041_v35  ;;  %v1748_v12 = vpop.f32.mrf.mxu0 }
 0x2d5   :  { %v8196_v51 = vmul.f32 0.35355338, %v1727_v40 }
 0x2d7   :  { %v1803_v7 = vpop.f32.mrf.mxu2  ;;  %v2032_v4 = vsel %vm71_vm1, %v8196_v51, -inf }
 0x2d8   :  { %2033 = vmax.xlane.f32.xlu1 %v2032_v4  ;;  %v1786_v18 = vpop.f32.mrf.mxu1  ;;  %v8200_v6 = vmul.f32 0.35355338, %v1803_v7 }
 0x2da   :  { %v2044_v58 = vsel %vm71_vm1, %v8200_v6, -inf }
 0x2dc   :  { %v1729_v13 = vpop.f32.mrf.mxu3  ;;  %v1822_v54 = vpop.f32.mrf.mxu0 }
 0x2dd   :  { %v8202_v20 = vmul.f32 0.35355338, %v1822_v54 }
 0x2df   :  { %v1805_v2 = vpop.f32.mrf.mxu2  ;;  %v2047_v5 = vsel %vm71_vm1, %v8202_v20, -inf }
 0x2e0   :  { %2045 = vmax.xlane.f32.xlu1 %v2044_v58  ;;  %v1860_v47 = vpop.f32.mrf.mxu1  ;;  %2048 = vmax.xlane.f32.xlu0 %v2047_v5 }
 0x2e1   :  { %v8208_v9 = vmul.f32 0.35355338, %v1860_v47 }
 0x2e3   :  { %v2053_v48 = vsel %vm71_vm1, %v8208_v9, -inf }
 0x2e4   :  { %v1765_v30 = vpop.f32.mrf.mxu3  ;;  %v1824_v46 = vpop.f32.mrf.mxu0 }
 0x2e5   :  { %v2018_v63 = vmul.f32 0.35355338, %v1765_v30 }
 0x2e7   :  { %v2038_v10 = vsel %vm71_vm1, %v2018_v63, -inf }
 0x2e8   :  { %2054 = vmax.xlane.f32.xlu1 %v2053_v48  ;;  %2039 = vmax.xlane.f32.xlu2 %v2038_v10  ;;  %v1862_v26 = vpop.f32.mrf.mxu1  ;;  %v8269_v10 = vpop.permute.xlu1 %7086 }
 0x2ec   :  { %v1767_v8 = vpop.f32.mrf.mxu3 }
 0x2f4   :  { %v1841_v55 = vpop.f32.mrf.mxu3  ;;  %7096 = vrot.lane.b32.xlu0 %v7742_v22, %s7397_s30 }
 0x2f5   :  { %v8233_v62 = vmul.f32 0.35355338, %v1841_v55 }
 0x2f7   :  { %v2050_v21 = vsel %vm71_vm1, %v8233_v62, -inf }
 0x2fc   :  { %v1843_v59 = vpop.f32.mrf.mxu3 }
 0x301   :  { %1242 = vrot.lane.b32.xlu1 %v7730_v15, %s7400_s1 }
 0x339   :  { %v1898_v16 = vpop.f32.mrf.mxu0 }
 0x33a   :  { %v8217_v17 = vmul.f32 0.35355338, %v1898_v16 }
 0x33c   :  { %v8219_v44 = vpop.f32.mrf.mxu1  ;;  %v2059_v60 = vsel %vm71_vm1, %v8217_v17, -inf }
 0x33d   :  { %2060 = vmax.xlane.f32.xlu0 %v2059_v60  ;;  %v8275_v59 = vmul.f32 0.35355338, %v8219_v44 }
 0x340   :  { %v1917_v33 = vpop.f32.mrf.mxu3 }
 0x341   :  { %v1900_v31 = vpop.f32.mrf.mxu0  ;;  %v8249_v4 = vmul.f32 0.35355338, %v1917_v33 }
 0x343   :  { %v1879_v27 = vpop.f32.mrf.mxu2  ;;  %v2037_v52 = vpop.xlane.xlu0 %2036  ;;  %v2062_v2 = vsel %vm71_vm1, %v8249_v4, -inf }
 0x344   :  { %v8225_v34 = vmul.f32 0.35355338, %v1879_v27  ;;  %v1938_v1 = vpop.f32.mrf.mxu1  ;;  %v2081_v3 = vsub.f32 %v8182_v50, %v2037_v52 }
 0x346   :  { %v2056_v32 = vsel %vm71_vm1, %v8225_v34, -inf  ;;  %v2098_v12 = vmul.f32 1.442695, %v2081_v3 }
 0x347   :  { %2057 = vmax.xlane.f32.xlu2 %v2056_v32  ;;  %v2043_v43 = vpop.xlane.xlu2 %2042 }
 0x348   :  { %v1919_v41 = vpop.f32.mrf.mxu3  ;;  %v2083_v53 = vsub.f32 %v8192_v24, %v2043_v43  ;;  %v7078_v43 = vunpack.i.l.bf16 %v8223_v25 }
 0x349   :  { %v1974_v42 = vpop.f32.mrf.mxu0 }
 0x34a   :  { %v2102_v40 = vmul.f32 1.442695, %v2083_v53  ;;  %v8247_v7 = vmul.f32 0.35355338, %v1974_v42 }
 0x34b   :  { %v1881_v19 = vpop.f32.mrf.mxu2  ;;  %v2034_v26 = vpop.xlane.xlu1 %2033 }
 0x34c   :  { %v2012_v0 = vpop.f32.mrf.mxu1  ;;  %7226 = vpow2.f32 %v2102_v40  ;;  %v2071_v54 = vsel %vm71_vm1, %v8247_v7, -inf  ;;  %v2080_v8 = vsub.f32 %v8196_v51, %v2034_v26 }
 0x34d   :  { %7228 = vpow2.f32 %v2098_v12  ;;  %v8284_v1 = vmul.f32 0.35355338, %v2012_v0  ;;  %v7088_v12 = vunpack.i.l.bf16 %v8269_v10 }
 0x34e   :  { %v2096_v55 = vmul.f32 1.442695, %v2080_v8 }
 0x34f   :  { %2051 = vmax.xlane.f32.xlu2 %v2050_v21  ;;  %v2077_v32 = vsel %vm71_vm1, %v8284_v1, -inf }
 0x350   :  { %v1993_v45 = vpop.f32.mrf.mxu3 }
 0x351   :  { %v8237_v49 = vmul.f32 0.35355338, %v1993_v45  ;;  %v1976_v56 = vpop.f32.mrf.mxu0 }
 0x352   :  { %v8255_v5 = vpop.eup %7226  ;;  %v7093_v56 = vunpack.i.l.bf16 %v8231_v39 }
 0x353   :  { %v1955_v23 = vpop.f32.mrf.mxu2  ;;  %v2074_v28 = vsel %vm71_vm1, %v8237_v49, -inf  ;;  %v8257_v47 = vpop.eup %7228  ;;  %v2137_v30 = vsel %vm71_vm1, %v8255_v5, 0.0 }
 0x354   :  { %v8240_v29 = vmul.f32 0.35355338, %v1955_v23  ;;  %v2014_v61 = vpop.f32.mrf.mxu1  ;;  %2075 = vmax.xlane.f32.xlu0 %v2074_v28  ;;  %v2131_v46 = vsel %vm71_vm1, %v8257_v47, 0.0  ;;  %v2046_v16 = vpop.xlane.xlu1 %2045 }
 0x355   :  { %v2084_v33 = vsub.f32 %v8200_v6, %v2046_v16  ;;  %v2049_v31 = vpop.xlane.xlu0 %2048  ;;  %v1250_v16 = vrot.slane %v7730_v15, 4 }
 0x356   :  { %v2068_v35 = vsel %vm71_vm1, %v8240_v29, -inf  ;;  %v2085_v44 = vsub.f32 %v8202_v20, %v2049_v31  ;;  %v1362_v31 = vrot.slane %v7679_v11, 4 }
 0x357   :  { %2069 = vmax.xlane.f32.xlu1 %v2068_v35  ;;  %v2104_v27 = vmul.f32 1.442695, %v2084_v33  ;;  %v1274_v35 = vrot.slane %v7078_v43, 4 }
 0x358   :  { %v1995_v24 = vpop.f32.mrf.mxu3  ;;  %v2106_v41 = vmul.f32 1.442695, %v2085_v44  ;;  %v1251_v44 = vsel %vm228_vm3, %v7088_v12, %v1250_v16 }
 0x359   :  { %v1286_v24 = vrot.slane %v7093_v56, 4 }
 0x35b   :  { %v1957_v18 = vpop.f32.mrf.mxu2  ;;  %v2040_v13 = vpop.xlane.xlu2 %2039 }
 0x35c   :  { %v2082_v50 = vsub.f32 %v2018_v63, %v2040_v13  ;;  %2072 = vmax.xlane.f32.xlu0 %v2071_v54  ;;  %v2055_v20 = vpop.xlane.xlu1 %2054 }
 0x35e   :  { %v2100_v58 = vmul.f32 1.442695, %v2082_v50  ;;  %v2087_v50 = vsub.f32 %v8208_v9, %v2055_v20 }
 0x35f   :  { %2063 = vmax.xlane.f32.xlu1 %v2062_v2 }
 0x360   :  { %7230 = vpow2.f32 %v2100_v58  ;;  %v7089_v58 = vunpack.i.h.bf16 %v8269_v10 }
 0x361   :  { %7232 = vpow2.f32 %v2096_v55  ;;  %v2110_v55 = vmul.f32 1.442695, %v2087_v50 }
 0x362   :  { %7234 = vpow2.f32 %v2104_v27 }
 0x363   :  { %7236 = vpow2.f32 %v2106_v41 }
 0x364   :  { %2138 = vadd.xlane.f32.xlu0 %v2137_v30 }
 0x366   :  { %v8265_v63 = vpop.eup %7230  ;;  %v8297_v21 = vpop.permute.xlu0 %7096 }
 0x367   :  { %7101 = vrot.lane.b32.xlu2 %v7742_v22, %s10264_s0  ;;  %2132 = vadd.xlane.f32.xlu1 %v2131_v46  ;;  %v2134_v48 = vsel %vm71_vm1, %v8265_v63, 0.0  ;;  %v2065_v22 = vsel %vm71_vm1, %v8275_v59, -inf  ;;  %v8279_v60 = vpop.eup %7232  ;;  %v7098_v53 = vunpack.i.l.bf16 %v8297_v21 }
 0x368   :  { %v2128_v51 = vsel %vm71_vm1, %v8279_v60, 0.0  ;;  %v8289_v19 = vpop.eup %7234 }
 0x369   :  { %v2140_v6 = vsel %vm71_vm1, %v8289_v19, 0.0  ;;  %v8293_v42 = vpop.eup %7236  ;;  %v1272_v18 = vrot.slane %v7098_v53, 4  ;;  %v1275_v13 = vsel %vm228_vm3, %v7098_v53, %v1274_v35 }
 0x36a   :  { %v2143_v0 = vsel %vm71_vm1, %v8293_v42, 0.0 }
 0x36b   :  { %v1273_v26 = vsel %vm228_vm3, %v1272_v18, %v7078_v43  ;;  %v8328_v43 = vsel %vm228_vm3, %v7089_v58, %v1362_v31 }
 0x36f   :  { %2135 = vadd.xlane.f32.xlu1 %v2134_v48  ;;  %v1248_v48 = vrot.slane %v7088_v12, 4 }
 0x371   :  { %v1249_v41 = vsel %vm228_vm3, %v1248_v48, %v7730_v15  ;;  %v1259_v15 = vperm.slane %v1251_v44, %v7615_v57 }
 0x372   :  { %v1255_v35 = vperm.slane %v1249_v41, %v7615_v57 }
 0x373   :  { %v1243_v3 = vpop.permute.xlu1 %1242 }
 0x374   :  { %v1284_v40 = vrot.slane %v1243_v3, 4  ;;  %v1287_v54 = vsel %vm228_vm3, %v1243_v3, %v1286_v24 }
 0x375   :  { %v1295_v9 = vperm.slane %v1287_v54, %v7615_v57 }
 0x376   :  { %v1285_v30 = vsel %vm228_vm3, %v1284_v40, %v7093_v56  ;;  %v7084_v40 = vunpack.i.h.bf16 %v8229_v38 }
 0x377   :  { %v1291_v10 = vperm.slane %v1285_v30, %v7615_v57 }
 0x388   :  { %1244 = vrot.lane.b32.xlu1 %v7679_v11, %s7400_s1 }
 0x390   :  { %2066 = vmax.xlane.f32.xlu2 %v2065_v22 }
 0x398   :  { %2129 = vadd.xlane.f32.xlu2 %v2128_v51  ;;  %v1360_v51 = vrot.slane %v7089_v58, 4 }
 0x39a   :  { %v8337_v3 = vsel %vm228_vm3, %v1360_v51, %v7679_v11 }
 0x3a0   :  { %2078 = vmax.xlane.f32.xlu2 %v2077_v32  ;;  %v7083_v32 = vunpack.i.l.bf16 %v8229_v38 }
 0x3a2   :  { %v1262_v12 = vrot.slane %v7083_v32, 4 }
 0x3a8   :  { %2141 = vadd.xlane.f32.xlu2 %v2140_v6  ;;  %v1332_v6 = vrot.slane %v1295_v9, 4 }
 0x3b0   :  { %2144 = vadd.xlane.f32.xlu2 %v2143_v0  ;;  %v2061_v52 = vpop.xlane.xlu0 %2060 }
 0x3b1   :  { %v2089_v61 = vsub.f32 %v8217_v17, %v2061_v52  ;;  %v1283_v17 = vperm.slane %v1275_v13, %v7615_v57  ;;  %v1320_v52 = vrot.slane %v1291_v10, 4 }
 0x3b3   :  { %v1334_v27 = vrot.slane %v1283_v17, 4  ;;  %v1333_v11 = vsel %vm228_vm3, %v1332_v6, %v1283_v17 }
 0x3b5   :  { %v1335_v0 = vsel %vm228_vm3, %v1295_v9, %v1334_v27 }
 0x3b6   :  { %v8344_v24 = vperm.slane %v1335_v0, %v7627_v14 }
 0x3ba   :  { %v2058_v45 = vpop.xlane.xlu2 %2057 }
 0x3bb   :  { %v2088_v23 = vsub.f32 %v8225_v34, %v2058_v45  ;;  %v2114_v34 = vmul.f32 1.442695, %v2089_v61 }
 0x3bd   :  { %v2112_v28 = vmul.f32 1.442695, %v2088_v23 }
 0x3bf   :  { %7238 = vpow2.f32 %v2112_v28 }
 0x3c0   :  { %7240 = vpow2.f32 %v2114_v34 }
 0x3c2   :  { %v2052_v2 = vpop.xlane.xlu2 %2051 }
 0x3c3   :  { %v2086_v46 = vsub.f32 %v8233_v62, %v2052_v2  ;;  %v1279_v62 = vperm.slane %v1273_v26, %v7615_v57  ;;  %v1298_v26 = vrot.slane %v1255_v35, 4 }
 0x3c5   :  { %v8313_v8 = vpop.eup %7238  ;;  %v2108_v22 = vmul.f32 1.442695, %v2086_v46  ;;  %v1322_v61 = vrot.slane %v1279_v62, 4  ;;  %v1321_v34 = vsel %vm228_vm3, %v1320_v52, %v1279_v62  ;;  %v7099_v62 = vunpack.i.h.bf16 %v8297_v21 }
 0x3c6   :  { %v2152_v33 = vsel %vm71_vm1, %v8313_v8, 0.0  ;;  %v8333_v53 = vpop.eup %7240  ;;  %v1327_v16 = vperm.slane %v1321_v34, %v7627_v14 }
 0x3c7   :  { %7242 = vpow2.f32 %v2108_v22  ;;  %2153 = vadd.xlane.f32.xlu2 %v2152_v33  ;;  %v2076_v20 = vpop.xlane.xlu0 %2075  ;;  %v1323_v18 = vsel %vm228_vm3, %v1291_v10, %v1322_v61  ;;  %v2155_v2 = vsel %vm71_vm1, %v8333_v53, 0.0  ;;  %v1339_v10 = vperm.slane %v1333_v11, %v7627_v14 }
 0x3c8   :  { %7244 = vpow2.f32 %v2110_v55  ;;  %v2094_v56 = vsub.f32 %v8237_v49, %v2076_v20  ;;  %v1310_v55 = vrot.slane %v1259_v15, 4  ;;  %v1331_v9 = vperm.slane %v1323_v18, %v7627_v14 }
 0x3c9   :  { %v1344_v61 = vrot.slane %v1327_v16, 4 }
 0x3ca   :  { %v2070_v45 = vpop.xlane.xlu1 %2069  ;;  %v8330_v23 = vpop.permute.xlu2 %7101  ;;  %v2124_v50 = vmul.f32 1.442695, %v2094_v56  ;;  %v1348_v20 = vrot.slane %v1331_v9, 4 }
 0x3cb   :  { %v7103_v28 = vunpack.i.l.bf16 %v8330_v23  ;;  %v2092_v46 = vsub.f32 %v8240_v29, %v2070_v45  ;;  %v8367_v29 = vrot.slane %v7084_v40, 4 }
 0x3cc   :  { %7246 = vpow2.f32 %v2124_v50 }
 0x3cd   :  { %v8346_v49 = vpop.eup %7242  ;;  %v1260_v13 = vrot.slane %v7103_v28, 4  ;;  %v1263_v54 = vsel %vm228_vm3, %v7103_v28, %v1262_v12  ;;  %v2120_v41 = vmul.f32 1.442695, %v2092_v46  ;;  %v1352_v28 = vrot.slane %v1339_v10, 4 }
 0x3ce   :  { %v2146_v58 = vsel %vm71_vm1, %v8346_v49, 0.0  ;;  %v8356_v30 = vpop.eup %7244  ;;  %v1271_v17 = vperm.slane %v1263_v54, %v7615_v57  ;;  %v7104_v12 = vunpack.i.h.bf16 %v8330_v23 }
 0x3cf   :  { %v1261_v48 = vsel %vm228_vm3, %v1260_v13, %v7083_v32  ;;  %2156 = vadd.xlane.f32.xlu2 %v2155_v2  ;;  %2147 = vadd.xlane.f32.xlu0 %v2146_v58  ;;  %v2073_v51 = vpop.xlane.xlu0 %2072  ;;  %v2149_v44 = vsel %vm71_vm1, %v8356_v30, 0.0  ;;  %v1356_v32 = vrot.slane %v8344_v24, 4  ;;  %7248 = vpow2.f32 %v2120_v41 }
 0x3d0   :  { %v1267_v22 = vperm.slane %v1261_v48, %v7615_v57  ;;  %v1308_v33 = vrot.slane %v1271_v17, 4  ;;  %v1311_v0 = vsel %vm228_vm3, %v1271_v17, %v1310_v55 }
 0x3d1   :  { %v1319_v13 = vperm.slane %v1311_v0, %v7627_v14 }
 0x3d2   :  { %v1296_v27 = vrot.slane %v1267_v22, 4  ;;  %v2064_v31 = vpop.xlane.xlu1 %2063  ;;  %v1299_v6 = vsel %vm228_vm3, %v1267_v22, %v1298_v26  ;;  %v1309_v56 = vsel %vm228_vm3, %v1308_v33, %v1259_v15  ;;  %v8383_v54 = vpop.eup %7246 }
 0x3d3   :  { %v1307_v45 = vperm.slane %v1299_v6, %v7627_v14  ;;  %v1315_v11 = vperm.slane %v1309_v56, %v7627_v14  ;;  %v2090_v15 = vsub.f32 %v8249_v4, %v2064_v31  ;;  %v1357_v17 = vsel %vm228_vm3, %v1356_v32, %v1319_v13 }
 0x3d4   :  { %v1297_v52 = vsel %vm228_vm3, %v1296_v27, %v1255_v35  ;;  %v1358_v26 = vrot.slane %v1319_v13, 4  ;;  %v1496_v55 = vrot.slane %v1357_v17, 4  ;;  %v2093_v6 = vsub.f32 %v8247_v7, %v2073_v51 }
 0x3d5   :  { %v1303_v18 = vperm.slane %v1297_v52, %v7627_v14  ;;  %v1349_v50 = vsel %vm228_vm3, %v1348_v20, %v1307_v45  ;;  %v1350_v34 = vrot.slane %v1307_v45, 4  ;;  %v1353_v46 = vsel %vm228_vm3, %v1352_v28, %v1315_v11  ;;  %v8401_v20 = vpop.eup %7248 }
 0x3d6   :  { %v1472_v2 = vrot.slane %v1349_v50, 4  ;;  %v1354_v48 = vrot.slane %v1315_v11, 4  ;;  %v1498_v22 = vrot.slane %v1353_v46, 4  ;;  %v2116_v33 = vmul.f32 1.442695, %v2090_v15 }
 0x3d7   :  { %v1346_v35 = vrot.slane %v1303_v18, 4  ;;  %2150 = vadd.xlane.f32.xlu0 %v2149_v44  ;;  %v1351_v58 = vsel %vm228_vm3, %v1331_v9, %v1350_v34  ;;  %v2139_v27 = vpop.xlane.xlu0 %2138  ;;  %v2170_v41 = vsel %vm71_vm1, %v8383_v54, 0.0  ;;  %v1345_v4 = vsel %vm228_vm3, %v1344_v61, %v1303_v18 }
 0x3d8   :  { %7250 = vrcp.f32 %v2139_v27  ;;  %v8395_v9 = vrot.slane %v7104_v12, 4  ;;  %v1359_v31 = vsel %vm228_vm3, %v8344_v24, %v1358_v26  ;;  %2171 = vadd.xlane.f32.xlu2 %v2170_v41  ;;  %v2122_v7 = vmul.f32 1.442695, %v2093_v6 }
 0x3d9   :  { %7252 = vpow2.f32 %v2116_v33  ;;  %v1347_v44 = vsel %vm228_vm3, %v1327_v16, %v1346_v35  ;;  %v1508_v32 = vrot.slane %v1359_v31, 4  ;;  %v1355_v51 = vsel %vm228_vm3, %v1339_v10, %v1354_v48 }
 0x3da   :  { %v2133_v0 = vpop.xlane.xlu1 %2132  ;;  %v1473_v52 = vsel %vm228_vm3, %v1472_v2, %v1345_v4  ;;  %v1474_v45 = vrot.slane %v1345_v4, 4  ;;  %v1484_v56 = vrot.slane %v1351_v58, 4  ;;  %v1486_v61 = vrot.slane %v1347_v44, 4 }
 0x3db   :  { %7254 = vrcp.f32 %v2133_v0  ;;  %v1499_v28 = vsel %vm228_vm3, %v1357_v17, %v1498_v22  ;;  %v1479_v24 = vperm.slane %v1473_v52, %v7615_v57  ;;  %v1497_v18 = vsel %vm228_vm3, %v1496_v55, %v1353_v46 }
 0x3dc   :  { %v1509_v16 = vsel %vm228_vm3, %v1508_v32, %v1355_v51  ;;  %7256 = vpow2.f32 %v2122_v7  ;;  %v1485_v11 = vsel %vm228_vm3, %v1484_v56, %v1347_v44  ;;  %v1503_v10 = vperm.slane %v1497_v18, %v7615_v57 }
 0x3dd   :  { %v1515_v13 = vperm.slane %v1509_v16, %v7615_v57  ;;  %v1491_v35 = vperm.slane %v1485_v11, %v7615_v57  ;;  %v1522_v2 = vrot.slane %v1479_v24, 4  ;;  %v1475_v15 = vsel %vm228_vm3, %v1349_v50, %v1474_v45 }
 0x3de   :  { %v7251_v34 = vpop.eup %7250  ;;  %v1487_v48 = vsel %vm228_vm3, %v1351_v58, %v1486_v61  ;;  %v1510_v26 = vrot.slane %v1355_v51, 4  ;;  %v1546_v55 = vrot.slane %v1503_v10, 4  ;;  %v1483_v50 = vperm.slane %v1475_v15, %v7615_v57 }
 0x3df   :  { %v8414_v17 = vpop.eup %7252  ;;  %v8417_v46 = vmul.f32 %v7251_v34, %v8255_v5  ;;  %v1544_v22 = vrot.slane %v1515_v13, 4  ;;  %v1523_v41 = vsel %vm228_vm3, %v1491_v35, %v1522_v2  ;;  %v1520_v0 = vrot.slane %v1491_v35, 4 }
 0x3e0   :  { %v2158_v27 = vsel %vm71_vm1, %v8414_v17, 0.0  ;;  %v1531_v5 = vperm.slane %v1523_v41, %v7627_v14  ;;  %v1495_v4 = vperm.slane %v1487_v48, %v7615_v57  ;;  %v1547_v44 = vsel %vm228_vm3, %v1515_v13, %v1546_v55 }
 0x3e1   :  { %v7255_v33 = vpop.eup %7254  ;;  %2159 = vadd.xlane.f32.xlu0 %v2158_v27  ;;  %v1521_v32 = vsel %vm228_vm3, %v1520_v0, %v1479_v24  ;;  %v1545_v7 = vsel %vm228_vm3, %v1544_v22, %v1503_v10  ;;  %v1507_v51 = vperm.slane %v1499_v28, %v7615_v57  ;;  %v1555_v45 = vperm.slane %v1547_v44, %v7627_v14 }
 0x3e2   :  { %v2136_v6 = vpop.xlane.xlu1 %2135  ;;  %v8424_v58 = vmul.f32 %v7255_v33, %v8257_v47  ;;  %v8432_v52 = vpop.eup %7256  ;;  %v2211_v47 = vpack.c.bf16 %v8417_v46, %v8417_v46  ;;  %v1527_v56 = vperm.slane %v1521_v32, %v7627_v14  ;;  %v1551_v61 = vperm.slane %v1545_v7, %v7627_v14 }
 0x3e3   :  { %7258 = vrcp.f32 %v2136_v6  ;;  %v1574_v18 = vrot.slane %v1531_v5, 4  ;;  %v1511_v16 = vsel %vm228_vm3, %v1359_v31, %v1510_v26  ;;  %v1534_v11 = vrot.slane %v1483_v50, 4 }
 0x3e4   :  { %v1558_v24 = vrot.slane %v1507_v51, 4  ;;  %v1572_v13 = vrot.slane %v1555_v45, 4  ;;  %v1568_v10 = vrot.slane %v1551_v61, 4  ;;  %v1519_v28 = vperm.slane %v1511_v16, %v7615_v57 }
 0x3e5   :  { %v2164_v34 = vsel %vm71_vm1, %v8401_v20, 0.0  ;;  %v1575_v35 = vsel %vm228_vm3, %v1555_v45, %v1574_v18  ;;  %v1535_v2 = vsel %vm228_vm3, %v1495_v4, %v1534_v11  ;;  %v1570_v15 = vrot.slane %v1527_v56, 4 }
 0x3e6   :  { %v1532_v48 = vrot.slane %v1495_v4, 4  ;;  %v1573_v55 = vsel %vm228_vm3, %v1572_v13, %v1531_v5  ;;  %v1569_v31 = vsel %vm228_vm3, %v1568_v10, %v1527_v56  ;;  %v1699_v26 = vpack.c.bf16 %v1575_v35, %v1575_v35 }
 0x3e7   :  { %v1543_v22 = vperm.slane %v1535_v2, %v7627_v14  ;;  %v1698_v27 = vpack.c.bf16 %v1573_v55, %v1573_v55  ;;  %v1696_v6 = vpack.c.bf16 %v1569_v31, %v1569_v31  ;;  %v1559_v41 = vsel %vm228_vm3, %v1519_v28, %v1558_v24 }
 0x3e8   :  { %v2285_v0 = vsel %vm75_vm0, %v1699_v26, 0  ;;  %v1567_v44 = vperm.slane %v1559_v41, %v7627_v14  ;;  %v1571_v4 = vsel %vm228_vm3, %v1551_v61, %v1570_v15  ;;  %v1533_v5 = vsel %vm228_vm3, %v1532_v48, %v1483_v50 }
 0x3e9   :  { %v7259_v46 = vpop.eup %7258  ;;  %2165 = vadd.xlane.f32.xlu0 %v2164_v34  ;;  %v2266_v7 = vsel %vm75_vm0, %v1698_v27, 0  ;;  %v2228_v45 = vsel %vm75_vm0, %v1696_v6, 0  ;;  %2294 = vmatpush.bf16.msrb.mxu1 %v2285_v0  ;;  %v1539_v18 = vperm.slane %v1533_v5, %v7627_v14  ;;  %v1556_v16 = vrot.slane %v1519_v28, 4 }
 0x3ea   :  { %v2194_v33 = vmul.f32 %v7259_v46, %v8265_v63  ;;  %v1697_v63 = vpack.c.bf16 %v1571_v4, %v1571_v4  ;;  %2275 = vmatpush.bf16.msra.mxu3 %v2266_v7  ;;  %2237 = vmatpush.bf16.msra.mxu2 %v2228_v45  ;;  %v1580_v56 = vrot.slane %v1567_v44, 4  ;;  %v1582_v11 = vrot.slane %v1543_v22, 4 }
 0x3eb   :  { %v7079_v24 = vunpack.i.h.bf16 %v8223_v25  ;;  %v1373_v50 = vsel %vm228_vm3, %v8395_v9, %v7084_v40  ;;  %v1375_v61 = vsel %vm228_vm3, %v7104_v12, %v8367_v29  ;;  %v1557_v28 = vsel %vm228_vm3, %v1556_v16, %v1507_v51 }
 0x3ec   :  { %v2210_v32 = vpack.c.bf16 %v2194_v33, %v2194_v33  ;;  %v2247_v13 = vsel %vm75_vm0, %v1697_v63, 0  ;;  %v1581_v10 = vsel %vm228_vm3, %v1580_v56, %v1543_v22  ;;  %v1583_v34 = vsel %vm228_vm3, %v1567_v44, %v1582_v11  ;;  %6560 = vmatmul.msk.bf16.vlgmr.msrb.gmra.mxu1 %vm71_vm1, %v2211_v47 }
 0x3ed   :  { %2256 = vmatpush.bf16.msra.mxu0 %v2247_v13  ;;  %v1578_v25 = vrot.slane %v1539_v18, 4  ;;  %v2209_v38 = vpack.c.bf16 %v8424_v58, %v8424_v58  ;;  %v1702_v40 = vpack.c.bf16 %v1581_v10, %v1581_v10  ;;  %v1563_v23 = vperm.slane %v1557_v28, %v7627_v14 }
 0x3ee   :  { %v1703_v9 = vpack.c.bf16 %v1583_v34, %v1583_v34  ;;  %6559 = vmatmul.msk.bf16.vlgmr.msra.gmra.mxu3 %vm71_vm1, %v2210_v32  ;;  %v1367_v29 = vperm.slane %v8337_v3, %v7615_v57  ;;  %v1371_v12 = vperm.slane %v8328_v43, %v7615_v57  ;;  %v1384_v51 = vrot.slane %v7099_v62, 4 }
 0x3ef   :  { %v1383_v47 = vperm.slane %v1375_v61, %v7615_v57  ;;  %v2342_v35 = vsel %vm75_vm0, %v1702_v40, 0  ;;  %v1576_v58 = vrot.slane %v1563_v23, 4  ;;  %v1579_v15 = vsel %vm228_vm3, %v1563_v23, %v1578_v25 }
 0x3f0   :  { %v2361_v2 = vsel %vm75_vm0, %v1703_v9, 0  ;;  %6558 = vmatmul.msk.bf16.vlgmr.msra.gmra.mxu0 %vm71_vm1, %v2209_v38  ;;  %v1386_v48 = vrot.slane %v7079_v24, 4  ;;  %v1379_v3 = vperm.slane %v1373_v50, %v7615_v57  ;;  %2351 = vmatpush.bf16.msrb.mxu3 %v2342_v35  ;;  %v1701_v43 = vpack.c.bf16 %v1579_v15, %v1579_v15 }
 0x3f1   :  { %2370 = vmatpush.bf16.msra.mxu1 %v2361_v2  ;;  %v2167_v46 = vsel %vm71_vm1, %v8432_v52, 0.0  ;;  %v1577_v55 = vsel %vm228_vm3, %v1576_v58, %v1539_v18  ;;  %v7094_v31 = vunpack.i.h.bf16 %v8231_v39  ;;  %v1422_v27 = vrot.slane %v1371_v12, 4 }
 0x3f2   :  { %2168 = vadd.xlane.f32.xlu0 %v2167_v46  ;;  %v1387_v26 = vsel %vm228_vm3, %v7099_v62, %v1386_v48  ;;  %v1700_v22 = vpack.c.bf16 %v1577_v55, %v1577_v55  ;;  %v2323_v33 = vsel %vm75_vm0, %v1701_v43, 0  ;;  %v1385_v6 = vsel %vm228_vm3, %v1384_v51, %v7079_v24 }
 0x3f3   :  { %v1420_v41 = vrot.slane %v1383_v47, 4  ;;  %2332 = vmatpush.bf16.msrb.mxu0 %v2323_v33  ;;  %v1410_v0 = vrot.slane %v1367_v29, 4  ;;  %v1408_v44 = vrot.slane %v1379_v3, 4  ;;  %v1395_v5 = vperm.slane %v1387_v26, %v7615_v57 }
 0x3f4   :  { %v2304_v4 = vsel %vm75_vm0, %v1700_v22, 0  ;;  %v1423_v39 = vsel %vm228_vm3, %v1383_v47, %v1422_v27  ;;  %v1398_v21 = vrot.slane %v7094_v31, 4  ;;  %v1391_v62 = vperm.slane %v1385_v6, %v7615_v57 }
 0x3f5   :  { %2313 = vmatpush.bf16.msrb.mxu2 %v2304_v4  ;;  %v1411_v32 = vsel %vm228_vm3, %v1379_v3, %v1410_v0  ;;  %v1421_v7 = vsel %vm228_vm3, %v1420_v41, %v1371_v12  ;;  %v1409_v63 = vsel %vm228_vm3, %v1408_v44, %v1367_v29  ;;  %v1431_v56 = vperm.slane %v1423_v39, %v7627_v14 }
 0x3f6   :  { %v1446_v11 = vrot.slane %v1395_v5, 4  ;;  %v1419_v24 = vperm.slane %v1411_v32, %v7627_v14  ;;  %v1434_v61 = vrot.slane %v1391_v62, 4  ;;  %v1427_v13 = vperm.slane %v1421_v7, %v7627_v14 }
 0x3f7   :  { %v1415_v28 = vperm.slane %v1409_v63, %v7627_v14  ;;  %v1470_v40 = vrot.slane %v1431_v56, 4 }
 0x3f8   :  { %v1462_v9 = vrot.slane %v1419_v24, 4  ;;  %v1466_v48 = vrot.slane %v1427_v13, 4 }
 0x3f9   :  { %v1458_v15 = vrot.slane %v1415_v28, 4 }
 0x3fa   :  { %v1245_v45 = vpop.permute.xlu1 %1244 }
 0x3fb   :  { %v1396_v18 = vrot.slane %v1245_v45, 4  ;;  %v1399_v16 = vsel %vm228_vm3, %v1245_v45, %v1398_v21 }
 0x3fc   :  { %v1407_v50 = vperm.slane %v1399_v16, %v7615_v57 }
 0x3fd   :  { %v1397_v10 = vsel %vm228_vm3, %v1396_v18, %v7094_v31 }
 0x3fe   :  { %v1403_v34 = vperm.slane %v1397_v10, %v7615_v57  ;;  %v1444_v25 = vrot.slane %v1407_v50, 4  ;;  %v1447_v38 = vsel %vm228_vm3, %v1407_v50, %v1446_v11 }
 0x3ff   :  { %v1455_v23 = vperm.slane %v1447_v38, %v7627_v14 }
 0x400   :  { %v1432_v29 = vrot.slane %v1403_v34, 4  ;;  %v1435_v12 = vsel %vm228_vm3, %v1403_v34, %v1434_v61  ;;  %v1445_v51 = vsel %vm228_vm3, %v1444_v25, %v1395_v5 }
 0x401   :  { %v1443_v47 = vperm.slane %v1435_v12, %v7627_v14  ;;  %v1451_v35 = vperm.slane %v1445_v51, %v7627_v14  ;;  %v1468_v58 = vrot.slane %v1455_v23, 4  ;;  %v1471_v2 = vsel %vm228_vm3, %v1455_v23, %v1470_v40 }
 0x402   :  { %v1433_v3 = vsel %vm228_vm3, %v1432_v29, %v1391_v62  ;;  %v1620_v43 = vrot.slane %v1471_v2, 4 }
 0x403   :  { %v1439_v46 = vperm.slane %v1433_v3, %v7627_v14  ;;  %v1460_v55 = vrot.slane %v1443_v47, 4  ;;  %v1463_v31 = vsel %vm228_vm3, %v1443_v47, %v1462_v9  ;;  %v1464_v26 = vrot.slane %v1451_v35, 4  ;;  %v2067_v22 = vpop.xlane.xlu2 %2066 }
 0x404   :  { %v1467_v33 = vsel %vm228_vm3, %v1451_v35, %v1466_v48  ;;  %v1469_v27 = vsel %vm228_vm3, %v1468_v58, %v1431_v56  ;;  %v1596_v6 = vrot.slane %v1463_v31, 4  ;;  %v2091_v41 = vsub.f32 %v8275_v59, %v2067_v22 }
 0x405   :  { %v1456_v0 = vrot.slane %v1439_v46, 4  ;;  %v1459_v44 = vsel %vm228_vm3, %v1439_v46, %v1458_v15  ;;  %v1461_v4 = vsel %vm228_vm3, %v1460_v55, %v1419_v24  ;;  %v1465_v5 = vsel %vm228_vm3, %v1464_v26, %v1427_v13 }
 0x406   :  { %v1584_v39 = vrot.slane %v1461_v4, 4  ;;  %v1598_v21 = vrot.slane %v1459_v44, 4  ;;  %v1608_v62 = vrot.slane %v1469_v27, 4  ;;  %v1610_v32 = vrot.slane %v1465_v5, 4 }
 0x407   :  { %v1621_v7 = vsel %vm228_vm3, %v1620_v43, %v1467_v33  ;;  %v1622_v45 = vrot.slane %v1467_v33, 4  ;;  %v2118_v63 = vmul.f32 1.442695, %v2091_v41  ;;  %v1457_v56 = vsel %vm228_vm3, %v1456_v0, %v1415_v28 }
 0x408   :  { %v1585_v18 = vsel %vm228_vm3, %v1584_v39, %v1457_v56  ;;  %v1597_v59 = vsel %vm228_vm3, %v1596_v6, %v1459_v44  ;;  %v1609_v16 = vsel %vm228_vm3, %v1608_v62, %v1465_v5  ;;  %v1611_v61 = vsel %vm228_vm3, %v1469_v27, %v1610_v32 }
 0x409   :  { %v1623_v11 = vsel %vm228_vm3, %v1471_v2, %v1622_v45  ;;  %7260 = vpow2.f32 %v2118_v63  ;;  %v1591_v24 = vperm.slane %v1585_v18, %v7615_v57  ;;  %v1603_v50 = vperm.slane %v1597_v59, %v7615_v57 }
 0x40a   :  { %v1615_v13 = vperm.slane %v1609_v16, %v7615_v57  ;;  %v1627_v10 = vperm.slane %v1621_v7, %v7615_v57  ;;  %v1586_v38 = vrot.slane %v1457_v56, 4  ;;  %v1599_v40 = vsel %vm228_vm3, %v1463_v31, %v1598_v21 }
 0x40b   :  { %v2130_v28 = vpop.xlane.xlu2 %2129  ;;  %v1632_v34 = vrot.slane %v1603_v50, 4  ;;  %v1634_v25 = vrot.slane %v1591_v24, 4  ;;  %v8540_v23 = vperm.slane %v1623_v11, %v7615_v57  ;;  %v8545_v47 = vperm.slane %v1599_v40, %v7615_v57 }
 0x40c   :  { %7262 = vrcp.f32 %v2130_v28  ;;  %v1656_v9 = vrot.slane %v1627_v10, 4  ;;  %v1658_v29 = vrot.slane %v1615_v13, 4  ;;  %v1587_v46 = vsel %vm228_vm3, %v1461_v4, %v1586_v38 }
 0x40d   :  { %v1633_v12 = vsel %vm228_vm3, %v1632_v34, %v1591_v24  ;;  %v1635_v51 = vsel %vm228_vm3, %v1603_v50, %v1634_v25  ;;  %v8557_v55 = vperm.slane %v1611_v61, %v7615_v57  ;;  %v1668_v33 = vrot.slane %v8540_v23, 4 }
 0x40e   :  { %v1639_v35 = vperm.slane %v1633_v12, %v7627_v14  ;;  %v1657_v58 = vsel %vm228_vm3, %v1656_v9, %v1615_v13  ;;  %v1643_v2 = vperm.slane %v1635_v51, %v7627_v14  ;;  %v1659_v15 = vsel %vm228_vm3, %v1627_v10, %v1658_v29 }
 0x40f   :  { %v8551_v48 = vpop.eup %7260  ;;  %v1663_v3 = vperm.slane %v1657_v58, %v7627_v14  ;;  %v1667_v43 = vperm.slane %v1659_v15, %v7627_v14  ;;  %v1595_v4 = vperm.slane %v1587_v46, %v7615_v57  ;;  %v1644_v5 = vrot.slane %v8545_v47, 4 }
 0x410   :  { %v2161_v31 = vsel %vm71_vm1, %v8551_v48, 0.0  ;;  %v1682_v26 = vrot.slane %v1639_v35, 4  ;;  %v1686_v22 = vrot.slane %v1643_v2, 4  ;;  %v1669_v18 = vsel %vm228_vm3, %v1668_v33, %v8557_v55 }
 0x411   :  { %2162 = vadd.xlane.f32.xlu1 %v2161_v31  ;;  %v1684_v27 = vrot.slane %v1667_v43, 4  ;;  %v1680_v6 = vrot.slane %v1663_v3, 4  ;;  %v1675_v61 = vperm.slane %v1669_v18, %v7627_v14  ;;  %v1645_v13 = vsel %vm228_vm3, %v1644_v5, %v1595_v4 }
 0x412   :  { %v7263_v41 = vpop.eup %7262  ;;  %v1683_v0 = vsel %vm228_vm3, %v1663_v3, %v1682_v26  ;;  %v1687_v44 = vsel %vm228_vm3, %v1667_v43, %v1686_v22  ;;  %v1651_v28 = vperm.slane %v1645_v13, %v7627_v14  ;;  %v1670_v26 = vrot.slane %v8557_v55, 4 }
 0x413   :  { %v2192_v39 = vmul.f32 %v7263_v41, %v8279_v60  ;;  %v2079_v21 = vpop.xlane.xlu2 %2078  ;;  %v1705_v62 = vpack.c.bf16 %v1683_v0, %v1683_v0  ;;  %v1685_v32 = vsel %vm228_vm3, %v1684_v27, %v1643_v2  ;;  %v1707_v7 = vpack.c.bf16 %v1687_v44, %v1687_v44 }
 0x414   :  { %v2095_v45 = vsub.f32 %v8284_v1, %v2079_v21  ;;  %v1706_v63 = vpack.c.bf16 %v1685_v32, %v1685_v32  ;;  %v1681_v56 = vsel %vm228_vm3, %v1680_v6, %v1639_v35  ;;  %v1688_v34 = vrot.slane %v1675_v61, 4 }
 0x415   :  { %v2208_v59 = vpack.c.bf16 %v2192_v39, %v2192_v39  ;;  %v2399_v16 = vsel %vm75_vm0, %v1705_v62, 0  ;;  %v2437_v11 = vsel %vm75_vm0, %v1707_v7, 0  ;;  %v1704_v24 = vpack.c.bf16 %v1681_v56, %v1681_v56 }
 0x416   :  { %v2126_v60 = vmul.f32 1.442695, %v2095_v45  ;;  %2408 = vmatpush.bf16.msra.mxu0 %v2399_v16  ;;  %v2418_v50 = vsel %vm75_vm0, %v1706_v63, 0  ;;  %2446 = vmatpush.bf16.msrb.mxu1 %v2437_v11  ;;  %v1689_v40 = vsel %vm228_vm3, %v1688_v34, %v1651_v28  ;;  %v1690_v35 = vrot.slane %v1651_v28, 4 }
 0x417   :  { %2427 = vmatpush.bf16.msra.mxu3 %v2418_v50  ;;  %6557 = vmatmul.msk.bf16.vlgmr.msra.gmra.mxu2 %vm71_vm1, %v2208_v59  ;;  %v2380_v1 = vsel %vm75_vm0, %v1704_v24, 0  ;;  %v1708_v51 = vpack.c.bf16 %v1689_v40, %v1689_v40  ;;  %v1646_v33 = vrot.slane %v1595_v4, 4  ;;  %v1671_v27 = vsel %vm228_vm3, %v8540_v23, %v1670_v26 }
 0x418   :  { %7264 = vpow2.f32 %v2126_v60  ;;  %2389 = vmatpush.bf16.msra.mxu2 %v2380_v1  ;;  %v1691_v15 = vsel %vm228_vm3, %v1675_v61, %v1690_v35  ;;  %v1679_v6 = vperm.slane %v1671_v27, %v7627_v14 }
 0x419   :  { %v2456_v2 = vsel %vm75_vm0, %v1708_v51, 0  ;;  %v1709_v46 = vpack.c.bf16 %v1691_v15, %v1691_v15 }
 0x41a   :  { %v1692_v21 = vrot.slane %v1679_v6, 4 }
 0x41b   :  { %v2142_v10 = vpop.xlane.xlu2 %2141 }
 0x41c   :  { %7266 = vrcp.f32 %v2142_v10 }
 0x41e   :  { %v8580_v25 = vpop.eup %7264 }
 0x41f   :  { %v2173_v38 = vsel %vm71_vm1, %v8580_v25, 0.0 }
 0x420   :  { %2174 = vadd.xlane.f32.xlu2 %v2173_v38 }
 0x422   :  { %v7267_v9 = vpop.eup %7266 }
 0x423   :  { %v2196_v29 = vmul.f32 %v7267_v9, %v8289_v19  ;;  %v2145_v12 = vpop.xlane.xlu2 %2144  ;;  %v2475_v19 = vsel %vm75_vm0, %v1709_v46, 0 }
 0x424   :  { %7268 = vrcp.f32 %v2145_v12 }
 0x425   :  { %v2212_v58 = vpack.c.bf16 %v2196_v29, %v2196_v29 }
 0x427   :  { %6561 = vmatmul.msk.bf16.vlgmr.msrb.gmra.mxu2 %vm71_vm1, %v2212_v58 }
 0x428   :  { %2465 = vmatpush.bf16.msrb.mxu2 %v2456_v2 }
 0x42a   :  { %v7269_v3 = vpop.eup %7268 }
 0x42b   :  { %v2197_v43 = vmul.f32 %v7269_v3, %v8293_v42  ;;  %v1647_v42 = vsel %vm228_vm3, %v8545_v47, %v1646_v33 }
 0x42c   :  { %v1655_v55 = vperm.slane %v1647_v42, %v7627_v14 }
 0x42d   :  { %v2213_v31 = vpack.c.bf16 %v2197_v43, %v2197_v43 }
 0x42e   :  { %v1693_v23 = vsel %vm228_vm3, %v1692_v21, %v1655_v55  ;;  %v1694_v45 = vrot.slane %v1655_v55, 4 }
 0x42f   :  { %6562 = vmatmul.msk.bf16.vlgmr.msrb.gmra.mxu0 %vm71_vm1, %v2213_v31 }
 0x430   :  { %2484 = vmatpush.bf16.msrb.mxu0 %v2475_v19  ;;  %v1695_v59 = vsel %vm228_vm3, %v1679_v6, %v1694_v45 }
 0x431   :  { %v1711_v11 = vpack.c.bf16 %v1695_v59, %v1695_v59 }
 0x433   :  { %v2513_v60 = vsel %vm75_vm0, %v1711_v11, 0 }
 0x43a   :  { %v2154_v22 = vpop.xlane.xlu2 %2153 }
 0x43b   :  { %7270 = vrcp.f32 %v2154_v22 }
 0x441   :  { %v7271_v41 = vpop.eup %7270 }
 0x442   :  { %v2200_v0 = vmul.f32 %v7271_v41, %v8313_v8  ;;  %v2157_v44 = vpop.xlane.xlu2 %2156  ;;  %v2148_v5 = vpop.xlane.xlu0 %2147  ;;  %v1710_v8 = vpack.c.bf16 %v1693_v23, %v1693_v23 }
 0x443   :  { %7272 = vrcp.f32 %v2157_v44 }
 0x444   :  { %v2216_v39 = vpack.c.bf16 %v2200_v0, %v2200_v0  ;;  %7274 = vrcp.f32 %v2148_v5  ;;  %v2494_v18 = vsel %vm75_vm0, %v1710_v8, 0 }
 0x446   :  { %6565 = vmatmul.msk.bf16.vlgmr.msra.gmra.mxu2 %vm71_vm1, %v2216_v39 }
 0x449   :  { %v7273_v4 = vpop.eup %7272 }
 0x44a   :  { %v7275_v62 = vpop.eup %7274  ;;  %v2201_v32 = vmul.f32 %v7273_v4, %v8333_v53  ;;  %v2151_v7 = vpop.xlane.xlu0 %2150 }
 0x44b   :  { %v2198_v47 = vmul.f32 %v7275_v62, %v8346_v49  ;;  %7276 = vrcp.f32 %v2151_v7  ;;  %v2172_v13 = vpop.xlane.xlu2 %2171 }
 0x44c   :  { %v2217_v63 = vpack.c.bf16 %v2201_v32, %v2201_v32 }
 0x44d   :  { %v2214_v56 = vpack.c.bf16 %v2198_v47, %v2198_v47 }
 0x44e   :  { %6566 = vmatmul.msk.bf16.vlgmr.msra.gmra.mxu0 %vm71_vm1, %v2217_v63 }
 0x44f   :  { %6563 = vmatmul.msk.bf16.vlgmr.msrb.gmra.mxu3 %vm71_vm1, %v2214_v56 }
 0x450   :  { %2503 = vmatpush.bf16.msrb.mxu3 %v2494_v18 }
 0x451   :  { %v7277_v16 = vpop.eup %7276 }
 0x452   :  { %v2199_v53 = vmul.f32 %v7277_v16, %v8356_v30 }
 0x454   :  { %v2215_v24 = vpack.c.bf16 %v2199_v53, %v2199_v53  ;;  %v2160_v49 = vpop.xlane.xlu0 %2159 }
 0x455   :  { %7278 = vrcp.f32 %v2160_v49 }
 0x456   :  { %6564 = vmatmul.msk.bf16.vlgmr.msra.gmra.mxu1 %vm71_vm1, %v2215_v24 }
 0x457   :  { %2522 = vmatpush.bf16.msra.mxu1 %v2513_v60 }
 0x45b   :  { %v7279_v50 = vpop.eup %7278 }
 0x45c   :  { %v2202_v1 = vmul.f32 %v7279_v50, %v8414_v17  ;;  %v2166_v61 = vpop.xlane.xlu0 %2165 }
 0x45d   :  { %7280 = vrcp.f32 %v2166_v61 }
 0x45e   :  { %v2218_v10 = vpack.c.bf16 %v2202_v1, %v2202_v1  ;;  %7282 = vrcp.f32 %v2172_v13 }
 0x460   :  { %6567 = vmatmul.msk.bf16.vlgmr.msra.gmra.mxu3 %vm71_vm1, %v2218_v10 }
 0x463   :  { %v7281_v30 = vpop.eup %7280 }
 0x464   :  { %v2204_v28 = vmul.f32 %v7281_v30, %v8401_v20  ;;  %v7283_v40 = vpop.eup %7282 }
 0x465   :  { %v2169_v34 = vpop.xlane.xlu0 %2168  ;;  %v2206_v9 = vmul.f32 %v7283_v40, %v8383_v54 }
 0x466   :  { %v2220_v38 = vpack.c.bf16 %v2204_v28, %v2204_v28  ;;  %7284 = vrcp.f32 %v2169_v34 }
 0x467   :  { %v2222_v58 = vpack.c.bf16 %v2206_v9, %v2206_v9 }
 0x468   :  { %6569 = vmatmul.msk.bf16.vlgmr.msrb.gmra.mxu2 %vm71_vm1, %v2220_v38 }
 0x469   :  { %v2296_v29 = vpop.f32.mrf.mxu1 }
 0x46a   :  { %v2540_v17 = vrot.slane %v2296_v29, 4 }
 0x46c   :  { %v7285_v12 = vpop.eup %7284 }
 0x46d   :  { %v2205_v51 = vmul.f32 %v7285_v12, %v8432_v52  ;;  %v2258_v35 = vpop.f32.mrf.mxu0 }
 0x46e   :  { %v2541_v2 = vsel %vm228_vm3, %v2540_v17, %v2258_v35  ;;  %v2542_v15 = vrot.slane %v2258_v35, 4 }
 0x46f   :  { %v2221_v3 = vpack.c.bf16 %v2205_v51, %v2205_v51  ;;  %v2547_v27 = vperm.slane %v2541_v2, %v7615_v57 }
 0x470   :  { %v2543_v20 = vsel %vm228_vm3, %v2296_v29, %v2542_v15  ;;  %6571 = vmatmul.msk.bf16.vlgmr.msrb.gmra.mxu3 %vm71_vm1, %v2222_v58 }
 0x471   :  { %6570 = vmatmul.msk.bf16.vlgmr.msrb.gmra.mxu0 %vm71_vm1, %v2221_v3  ;;  %v2277_v43 = vpop.f32.mrf.mxu3  ;;  %v2298_v46 = vpop.f32.mrf.mxu1  ;;  %v2551_v42 = vperm.slane %v2543_v20, %v7615_v57  ;;  %v2576_v55 = vrot.slane %v2547_v27, 4 }
 0x472   :  { %v2528_v6 = vrot.slane %v2277_v43, 4 }
 0x473   :  { %v2588_v4 = vrot.slane %v2551_v42, 4 }
 0x475   :  { %v2260_v54 = vpop.f32.mrf.mxu0 }
 0x479   :  { %v2279_v31 = vpop.f32.mrf.mxu3 }
 0x484   :  { %v2163_v19 = vpop.xlane.xlu1 %2162 }
 0x485   :  { %7286 = vrcp.f32 %v2163_v19 }
 0x48b   :  { %v7287_v26 = vpop.eup %7286 }
 0x48c   :  { %v2203_v52 = vmul.f32 %v7287_v26, %v8551_v48 }
 0x48e   :  { %v2219_v22 = vpack.c.bf16 %v2203_v52, %v2203_v52 }
 0x490   :  { %6568 = vmatmul.msk.bf16.vlgmr.msrb.gmra.mxu1 %vm71_vm1, %v2219_v22 }
 0x493   :  { %v2175_v33 = vpop.xlane.xlu2 %2174 }
 0x494   :  { %7288 = vrcp.f32 %v2175_v33 }
 0x49a   :  { %v7289_v41 = vpop.eup %7288  ;;  %v2239_v0 = vpop.f32.mrf.mxu2 }
 0x49b   :  { %v2207_v44 = vmul.f32 %v7289_v41, %v8580_v25  ;;  %v2529_v5 = vsel %vm228_vm3, %v2528_v6, %v2239_v0  ;;  %v2530_v39 = vrot.slane %v2239_v0, 4 }
 0x49c   :  { %v2535_v48 = vperm.slane %v2529_v5, %v7615_v57 }
 0x49d   :  { %v2223_v21 = vpack.c.bf16 %v2207_v44, %v2207_v44  ;;  %v2531_v23 = vsel %vm228_vm3, %v2277_v43, %v2530_v39 }
 0x49e   :  { %v2539_v62 = vperm.slane %v2531_v23, %v7615_v57  ;;  %v2577_v32 = vsel %vm228_vm3, %v2576_v55, %v2535_v48  ;;  %v2578_v7 = vrot.slane %v2535_v48, 4 }
 0x49f   :  { %v2583_v30 = vperm.slane %v2577_v32, %v7627_v14 }
 0x4a0   :  { %v2579_v47 = vsel %vm228_vm3, %v2547_v27, %v2578_v7  ;;  %v2589_v8 = vsel %vm228_vm3, %v2588_v4, %v2539_v62  ;;  %v2590_v25 = vrot.slane %v2539_v62, 4  ;;  %6572 = vmatmul.msk.bf16.vlgmr.msra.gmra.mxu1 %vm71_vm1, %v2223_v21 }
 0x4a1   :  { %v2587_v40 = vperm.slane %v2579_v47, %v7627_v14  ;;  %v2595_v12 = vperm.slane %v2589_v8, %v7627_v14  ;;  %v2626_v3 = vrot.slane %v2583_v30, 4 }
 0x4a2   :  { %v2591_v45 = vsel %vm228_vm3, %v2551_v42, %v2590_v25  ;;  %v2241_v63 = vpop.f32.mrf.mxu2 }
 0x4a3   :  { %v2599_v9 = vperm.slane %v2591_v45, %v7627_v14  ;;  %v2630_v26 = vrot.slane %v2587_v40, 4  ;;  %v2634_v52 = vrot.slane %v2595_v12, 4 }
 0x4a5   :  { %v2638_v46 = vrot.slane %v2599_v9, 4 }
 0x4aa   :  { %v2315_v56 = vpop.f32.mrf.mxu2 }
 0x4ab   :  { %v2554_v24 = vrot.slane %v2315_v56, 4 }
 0x4ac   :  { %v2334_v18 = vpop.f32.mrf.mxu0 }
 0x4ad   :  { %v2566_v60 = vrot.slane %v2334_v18, 4 }
 0x4b2   :  { %v2317_v59 = vpop.f32.mrf.mxu2 }
 0x4b4   :  { %v2336_v16 = vpop.f32.mrf.mxu0 }
 0x4c9   :  { %v8635_v53 = vpop.f32.mrf.mxu2 }
 0x4cb   :  { %v8637_v11 = vpop.f32.mrf.mxu0 }
 0x4d1   :  { %v2393_v49 = vpop.f32.mrf.mxu2 }
 0x4d2   :  { %v2353_v50 = vpop.f32.mrf.mxu3 }
 0x4d3   :  { %v2552_v1 = vrot.slane %v2353_v50, 4  ;;  %v2555_v61 = vsel %vm228_vm3, %v2353_v50, %v2554_v24  ;;  %v2372_v13 = vpop.f32.mrf.mxu1  ;;  %v2412_v10 = vpop.f32.mrf.mxu0 }
 0x4d4   :  { %v2563_v28 = vperm.slane %v2555_v61, %v7615_v57  ;;  %v2564_v34 = vrot.slane %v2372_v13, 4  ;;  %v2567_v38 = vsel %vm228_vm3, %v2372_v13, %v2566_v60 }
 0x4d5   :  { %v2553_v29 = vsel %vm228_vm3, %v2552_v1, %v2315_v56  ;;  %v2575_v17 = vperm.slane %v2567_v38, %v7615_v57 }
 0x4d6   :  { %v2559_v51 = vperm.slane %v2553_v29, %v7615_v57  ;;  %v2614_v35 = vrot.slane %v2563_v28, 4  ;;  %v2565_v58 = vsel %vm228_vm3, %v2564_v34, %v2334_v18 }
 0x4d7   :  { %v2571_v2 = vperm.slane %v2565_v58, %v7615_v57  ;;  %v2612_v15 = vrot.slane %v2575_v17, 4 }
 0x4d8   :  { %v2602_v20 = vrot.slane %v2559_v51, 4  ;;  %v2615_v43 = vsel %vm228_vm3, %v2575_v17, %v2614_v35 }
 0x4d9   :  { %v2600_v54 = vrot.slane %v2571_v2, 4  ;;  %v2613_v31 = vsel %vm228_vm3, %v2612_v15, %v2563_v28  ;;  %v2623_v19 = vperm.slane %v2615_v43, %v7627_v14 }
 0x4da   :  { %v2603_v22 = vsel %vm228_vm3, %v2571_v2, %v2602_v20  ;;  %v2619_v33 = vperm.slane %v2613_v31, %v7627_v14  ;;  %v2355_v27 = vpop.f32.mrf.mxu3 }
 0x4db   :  { %v2601_v6 = vsel %vm228_vm3, %v2600_v54, %v2559_v51  ;;  %v2611_v41 = vperm.slane %v2603_v22, %v7627_v14  ;;  %v2636_v42 = vrot.slane %v2623_v19, 4  ;;  %v2639_v0 = vsel %vm228_vm3, %v2623_v19, %v2638_v46  ;;  %v2374_v44 = vpop.f32.mrf.mxu1 }
 0x4dc   :  { %v2607_v5 = vperm.slane %v2601_v6, %v7627_v14  ;;  %v2632_v39 = vrot.slane %v2619_v33, 4  ;;  %v2635_v55 = vsel %vm228_vm3, %v2619_v33, %v2634_v52  ;;  %v2788_v48 = vrot.slane %v2639_v0, 4 }
 0x4dd   :  { %v2628_v21 = vrot.slane %v2611_v41, 4  ;;  %v2631_v23 = vsel %vm228_vm3, %v2611_v41, %v2630_v26  ;;  %v2637_v4 = vsel %vm228_vm3, %v2636_v42, %v2599_v9  ;;  %v2790_v62 = vrot.slane %v2635_v55, 4 }
 0x4de   :  { %v2624_v32 = vrot.slane %v2607_v5, 4  ;;  %v2627_v7 = vsel %vm228_vm3, %v2607_v5, %v2626_v3  ;;  %v2633_v47 = vsel %vm228_vm3, %v2632_v39, %v2595_v12  ;;  %v2764_v8 = vrot.slane %v2631_v23, 4 }
 0x4df   :  { %v2766_v25 = vrot.slane %v2627_v7, 4  ;;  %v2776_v45 = vrot.slane %v2637_v4, 4  ;;  %v2778_v63 = vrot.slane %v2633_v47, 4  ;;  %v2789_v56 = vsel %vm228_vm3, %v2788_v48, %v2635_v55 }
 0x4e0   :  { %v2625_v18 = vsel %vm228_vm3, %v2624_v32, %v2583_v30  ;;  %v2791_v59 = vsel %vm228_vm3, %v2639_v0, %v2790_v62  ;;  %v2629_v16 = vsel %vm228_vm3, %v2628_v21, %v2587_v40  ;;  %v2765_v24 = vsel %vm228_vm3, %v2764_v8, %v2627_v7 }
 0x4e1   :  { %v2779_v49 = vsel %vm228_vm3, %v2637_v4, %v2778_v63  ;;  %v2799_v60 = vperm.slane %v2791_v59, %v7615_v57  ;;  %v2752_v50 = vrot.slane %v2629_v16, 4  ;;  %v2754_v1 = vrot.slane %v2625_v18, 4 }
 0x4e2   :  { %v2767_v61 = vsel %vm228_vm3, %v2631_v23, %v2766_v25  ;;  %v2787_v13 = vperm.slane %v2779_v49, %v7615_v57  ;;  %v2771_v10 = vperm.slane %v2765_v24, %v7615_v57  ;;  %v2777_v30 = vsel %vm228_vm3, %v2776_v45, %v2633_v47 }
 0x4e3   :  { %v2755_v28 = vsel %vm228_vm3, %v2629_v16, %v2754_v1  ;;  %v2775_v34 = vperm.slane %v2767_v61, %v7615_v57  ;;  %v2836_v38 = vrot.slane %v2799_v60, 4  ;;  %v2753_v40 = vsel %vm228_vm3, %v2752_v50, %v2625_v18  ;;  %v2429_v12 = vpop.f32.mrf.mxu3 }
 0x4e4   :  { %v2763_v9 = vperm.slane %v2755_v28, %v7615_v57  ;;  %v2759_v29 = vperm.slane %v2753_v40, %v7615_v57  ;;  %v2795_v17 = vperm.slane %v2789_v56, %v7615_v57  ;;  %v2783_v58 = vperm.slane %v2777_v30, %v7615_v57 }
 0x4e5   :  { %v2812_v51 = vrot.slane %v2775_v34, 4  ;;  %v2837_v35 = vsel %vm228_vm3, %v2836_v38, %v2787_v13  ;;  %v2800_v2 = vrot.slane %v2771_v10, 4  ;;  %v2838_v26 = vrot.slane %v2787_v13, 4 }
 0x4e6   :  { %v2843_v15 = vperm.slane %v2837_v35, %v7627_v14  ;;  %v2824_v3 = vrot.slane %v2795_v17, 4  ;;  %v2802_v46 = vrot.slane %v2759_v29, 4  ;;  %v2826_v0 = vrot.slane %v2783_v58, 4 }
 0x4e7   :  { %v2813_v20 = vsel %vm228_vm3, %v2812_v51, %v2763_v9  ;;  %v2801_v43 = vsel %vm228_vm3, %v2800_v2, %v2759_v29  ;;  %v2814_v44 = vrot.slane %v2763_v9, 4  ;;  %v2839_v48 = vsel %vm228_vm3, %v2799_v60, %v2838_v26 }
 0x4e8   :  { %v2819_v54 = vperm.slane %v2813_v20, %v7627_v14  ;;  %v2856_v31 = vrot.slane %v2843_v15, 4  ;;  %v2807_v19 = vperm.slane %v2801_v43, %v7627_v14  ;;  %v2825_v52 = vsel %vm228_vm3, %v2824_v3, %v2783_v58 }
 0x4e9   :  { %v2803_v22 = vsel %vm228_vm3, %v2771_v10, %v2802_v46  ;;  %v2831_v27 = vperm.slane %v2825_v52, %v7627_v14  ;;  %v2827_v4 = vsel %vm228_vm3, %v2795_v17, %v2826_v0  ;;  %v2815_v32 = vsel %vm228_vm3, %v2775_v34, %v2814_v44 }
 0x4ea   :  { %v8692_v33 = vsel %vm228_vm3, %v2856_v31, %v2819_v54  ;;  %v2850_v6 = vrot.slane %v2807_v19, 4  ;;  %v2858_v41 = vrot.slane %v2819_v54, 4  ;;  %v2811_v42 = vperm.slane %v2803_v22, %v7627_v14 }
 0x4eb   :  { %v2848_v5 = vrot.slane %v2831_v27, 4  ;;  %v2431_v21 = vpop.f32.mrf.mxu3  ;;  %v2467_v23 = vpop.f32.mrf.mxu2  ;;  %v2847_v7 = vperm.slane %v2839_v48, %v7627_v14  ;;  %v2835_v47 = vperm.slane %v2827_v4, %v7627_v14  ;;  %v2823_v8 = vperm.slane %v2815_v32, %v7627_v14 }
 0x4ec   :  { %v8697_v39 = vsel %vm228_vm3, %v2831_v27, %v2850_v6  ;;  %v8700_v55 = vsel %vm228_vm3, %v2843_v15, %v2858_v41  ;;  %v2854_v62 = vrot.slane %v2811_v42, 4  ;;  %v2640_v10 = vrot.slane %v2429_v12, 4 }
 0x4ed   :  { %v8709_v25 = vsel %vm228_vm3, %v2848_v5, %v2807_v19  ;;  %v2860_v45 = vrot.slane %v2847_v7, 4  ;;  %v2852_v18 = vrot.slane %v2835_v47, 4  ;;  %v2862_v59 = vrot.slane %v2823_v8, 4 }
 0x4ee   :  { %v2486_v63 = vpop.f32.mrf.mxu0  ;;  %v8712_v56 = vsel %vm228_vm3, %v2835_v47, %v2854_v62  ;;  %v2642_v28 = vrot.slane %v8635_v53, 4  ;;  %v2654_v34 = vrot.slane %v8637_v11, 4  ;;  %v2641_v9 = vsel %vm228_vm3, %v2640_v10, %v8635_v53 }
 0x4ef   :  { %v8715_v16 = vsel %vm228_vm3, %v2860_v45, %v2823_v8  ;;  %v8718_v24 = vsel %vm228_vm3, %v2852_v18, %v2811_v42  ;;  %v8721_v49 = vsel %vm228_vm3, %v2847_v7, %v2862_v59  ;;  %v2647_v2 = vperm.slane %v2641_v9, %v7615_v57 }
 0x4f0   :  { %v2643_v38 = vsel %vm228_vm3, %v2429_v12, %v2642_v28  ;;  %v2666_v15 = vrot.slane %v2467_v23, 4  ;;  %v2678_v19 = vrot.slane %v2486_v63, 4 }
 0x4f1   :  { %v2651_v17 = vperm.slane %v2643_v38, %v7615_v57  ;;  %v2690_v46 = vrot.slane %v2647_v2, 4 }
 0x4f3   :  { %v2469_v60 = vpop.f32.mrf.mxu2  ;;  %v2505_v50 = vpop.f32.mrf.mxu3  ;;  %v2702_v20 = vrot.slane %v2651_v17, 4 }
 0x4f4   :  { %v2664_v51 = vrot.slane %v2505_v50, 4  ;;  %v2667_v12 = vsel %vm228_vm3, %v2505_v50, %v2666_v15 }
 0x4f6   :  { %v2488_v1 = vpop.f32.mrf.mxu0  ;;  %v2665_v43 = vsel %vm228_vm3, %v2664_v51, %v2467_v23 }
 0x4f7   :  { %v2671_v26 = vperm.slane %v2665_v43, %v7615_v57 }
 0x4f9   :  { %v2714_v21 = vrot.slane %v2671_v26, 4 }
 0x4fb   :  { %v2507_v61 = vpop.f32.mrf.mxu3 }
 0x50d   :  { %v2448_v13 = vpop.f32.mrf.mxu1 }
 0x50e   :  { %v2652_v30 = vrot.slane %v2448_v13, 4  ;;  %v2655_v40 = vsel %vm228_vm3, %v2448_v13, %v2654_v34 }
 0x50f   :  { %v2663_v35 = vperm.slane %v2655_v40, %v7615_v57 }
 0x510   :  { %v2653_v29 = vsel %vm228_vm3, %v2652_v30, %v8637_v11  ;;  %v2675_v11 = vperm.slane %v2667_v12, %v7615_v57 }
 0x511   :  { %v2659_v3 = vperm.slane %v2653_v29, %v7615_v57  ;;  %v2700_v53 = vrot.slane %v2663_v35, 4  ;;  %v2703_v31 = vsel %vm228_vm3, %v2663_v35, %v2702_v20 }
 0x512   :  { %v2711_v41 = vperm.slane %v2703_v31, %v7627_v14  ;;  %v2726_v44 = vrot.slane %v2675_v11, 4 }
 0x513   :  { %v2688_v54 = vrot.slane %v2659_v3, 4  ;;  %v2691_v52 = vsel %vm228_vm3, %v2659_v3, %v2690_v46  ;;  %v2701_v22 = vsel %vm228_vm3, %v2700_v53, %v2651_v17 }
 0x514   :  { %v2699_v5 = vperm.slane %v2691_v52, %v7627_v14  ;;  %v2707_v23 = vperm.slane %v2701_v22, %v7627_v14  ;;  %v2750_v8 = vrot.slane %v2711_v41, 4 }
 0x515   :  { %v2450_v58 = vpop.f32.mrf.mxu1  ;;  %v2689_v6 = vsel %vm228_vm3, %v2688_v54, %v2647_v2 }
 0x516   :  { %v2695_v62 = vperm.slane %v2689_v6, %v7627_v14  ;;  %v2742_v18 = vrot.slane %v2699_v5, 4  ;;  %v2746_v30 = vrot.slane %v2707_v23, 4 }
 0x518   :  { %v2738_v10 = vrot.slane %v2695_v62, 4 }
 0x51d   :  { %v2524_v27 = vpop.f32.mrf.mxu1 }
 0x51e   :  { %v2676_v42 = vrot.slane %v2524_v27, 4  ;;  %v2679_v0 = vsel %vm228_vm3, %v2524_v27, %v2678_v19 }
 0x51f   :  { %v2687_v48 = vperm.slane %v2679_v0, %v7615_v57 }
 0x520   :  { %v2677_v4 = vsel %vm228_vm3, %v2676_v42, %v2486_v63 }
 0x521   :  { %v2683_v32 = vperm.slane %v2677_v4, %v7615_v57  ;;  %v2724_v7 = vrot.slane %v2687_v48, 4  ;;  %v2727_v47 = vsel %vm228_vm3, %v2687_v48, %v2726_v44 }
 0x522   :  { %v2735_v45 = vperm.slane %v2727_v47, %v7627_v14 }
 0x523   :  { %v2712_v59 = vrot.slane %v2683_v32, 4  ;;  %v2715_v60 = vsel %vm228_vm3, %v2683_v32, %v2714_v21  ;;  %v2725_v50 = vsel %vm228_vm3, %v2724_v7, %v2675_v11 }
 0x524   :  { %v2723_v1 = vperm.slane %v2715_v60, %v7627_v14  ;;  %v2731_v63 = vperm.slane %v2725_v50, %v7627_v14  ;;  %v2748_v61 = vrot.slane %v2735_v45, 4  ;;  %v2751_v13 = vsel %vm228_vm3, %v2735_v45, %v2750_v8 }
 0x525   :  { %v2713_v28 = vsel %vm228_vm3, %v2712_v59, %v2671_v26  ;;  %v2900_v34 = vrot.slane %v2751_v13, 4  ;;  %v2526_v38 = vpop.f32.mrf.mxu1 }
 0x526   :  { %v2719_v40 = vperm.slane %v2713_v28, %v7627_v14  ;;  %v2740_v9 = vrot.slane %v2723_v1, 4  ;;  %v2743_v29 = vsel %vm228_vm3, %v2723_v1, %v2742_v18  ;;  %v2744_v17 = vrot.slane %v2731_v63, 4 }
 0x527   :  { %v2747_v51 = vsel %vm228_vm3, %v2731_v63, %v2746_v30  ;;  %v2749_v35 = vsel %vm228_vm3, %v2748_v61, %v2711_v41  ;;  %v2876_v58 = vrot.slane %v2743_v29, 4 }
 0x528   :  { %v2736_v2 = vrot.slane %v2719_v40, 4  ;;  %v2739_v15 = vsel %vm228_vm3, %v2719_v40, %v2738_v10  ;;  %v2745_v3 = vsel %vm228_vm3, %v2744_v17, %v2707_v23  ;;  %v2888_v12 = vrot.slane %v2749_v35, 4 }
 0x529   :  { %v2878_v20 = vrot.slane %v2739_v15, 4  ;;  %v2890_v43 = vrot.slane %v2745_v3, 4  ;;  %v2901_v53 = vsel %vm228_vm3, %v2900_v34, %v2747_v51  ;;  %v2902_v46 = vrot.slane %v2747_v51, 4 }
 0x52a   :  { %v2737_v54 = vsel %vm228_vm3, %v2736_v2, %v2695_v62  ;;  %v2741_v11 = vsel %vm228_vm3, %v2740_v9, %v2699_v5  ;;  %v2877_v31 = vsel %vm228_vm3, %v2876_v58, %v2739_v15  ;;  %v2889_v19 = vsel %vm228_vm3, %v2888_v12, %v2745_v3 }
 0x52b   :  { %v2891_v26 = vsel %vm228_vm3, %v2749_v35, %v2890_v43  ;;  %v2903_v52 = vsel %vm228_vm3, %v2751_v13, %v2902_v46  ;;  %v2864_v22 = vrot.slane %v2741_v11, 4  ;;  %v2866_v27 = vrot.slane %v2737_v54, 4 }
 0x52c   :  { %v2911_v6 = vperm.slane %v2903_v52, %v7615_v57  ;;  %v2879_v41 = vsel %vm228_vm3, %v2743_v29, %v2878_v20  ;;  %v2899_v42 = vperm.slane %v2891_v26, %v7615_v57  ;;  %v2883_v0 = vperm.slane %v2877_v31, %v7615_v57 }
 0x52d   :  { %v2867_v44 = vsel %vm228_vm3, %v2741_v11, %v2866_v27  ;;  %v2887_v5 = vperm.slane %v2879_v41, %v7615_v57  ;;  %v2865_v48 = vsel %vm228_vm3, %v2864_v22, %v2737_v54  ;;  %v2895_v21 = vperm.slane %v2889_v19, %v7615_v57  ;;  %v6950_v41 = vld [vmem:[%s10241_s6 + $0x8] sm:$0xff] }
 0x52e   :  { %v2875_v23 = vperm.slane %v2867_v44, %v7615_v57  ;;  %v2948_v4 = vrot.slane %v2911_v6, 4  ;;  %v2871_v62 = vperm.slane %v2865_v48, %v7615_v57  ;;  %v2907_v32 = vperm.slane %v2901_v53, %v7615_v57 }
 0x52f   :  { %v2924_v7 = vrot.slane %v2887_v5, 4  ;;  %v2912_v47 = vrot.slane %v2883_v0, 4  ;;  %v2938_v8 = vrot.slane %v2895_v21, 4  ;;  %v2950_v45 = vrot.slane %v2899_v42, 4 }
 0x530   :  { %v2949_v18 = vsel %vm228_vm3, %v2948_v4, %v2899_v42  ;;  %v2936_v59 = vrot.slane %v2907_v32, 4  ;;  %v2914_v60 = vrot.slane %v2871_v62, 4  ;;  %v2926_v50 = vrot.slane %v2875_v23, 4  ;;  %v6949_v42 = vld [vmem:[%s10241_s6] sm:$0xff] }
 0x531   :  { %v2925_v1 = vsel %vm228_vm3, %v2924_v7, %v2875_v23  ;;  %v2955_v63 = vperm.slane %v2949_v18, %v7627_v14  ;;  %v2913_v61 = vsel %vm228_vm3, %v2912_v47, %v2871_v62  ;;  %v2939_v13 = vsel %vm228_vm3, %v2907_v32, %v2938_v8 }
 0x532   :  { %v2931_v10 = vperm.slane %v2925_v1, %v7627_v14  ;;  %v2919_v30 = vperm.slane %v2913_v61, %v7627_v14  ;;  %v2937_v28 = vsel %vm228_vm3, %v2936_v59, %v2895_v21  ;;  %v2915_v34 = vsel %vm228_vm3, %v2883_v0, %v2914_v60 }
 0x533   :  { %v2968_v38 = vrot.slane %v2955_v63, 4  ;;  %v2943_v40 = vperm.slane %v2937_v28, %v7627_v14  ;;  %v2923_v9 = vperm.slane %v2915_v34, %v7627_v14  ;;  %v2947_v29 = vperm.slane %v2939_v13, %v7627_v14 }
 0x534   :  { %v2962_v17 = vrot.slane %v2919_v30, 4  ;;  %v2970_v51 = vrot.slane %v2931_v10, 4  ;;  %v2927_v35 = vsel %vm228_vm3, %v2887_v5, %v2926_v50  ;;  %v2951_v58 = vsel %vm228_vm3, %v2911_v6, %v2950_v45 }
 0x535   :  { %v2969_v2 = vsel %vm228_vm3, %v2968_v38, %v2931_v10  ;;  %v2960_v15 = vrot.slane %v2943_v40, 4  ;;  %v2966_v3 = vrot.slane %v2923_v9, 4  ;;  %v2964_v12 = vrot.slane %v2947_v29, 4 }
 0x536   :  { %v7105_v20 = vpack.i.bf16 %v2969_v2, %v8692_v33  ;;  %v2963_v43 = vsel %vm228_vm3, %v2943_v40, %v2962_v17  ;;  %v2971_v53 = vsel %vm228_vm3, %v2955_v63, %v2970_v51  ;;  %v2935_v46 = vperm.slane %v2927_v35, %v7627_v14 }
 0x537   :  { %v7115_v54 = vpack.i.bf16 %v2963_v43, %v8697_v39  ;;  %v7110_v11 = vpack.i.bf16 %v2971_v53, %v8700_v55  ;;  %v2967_v31 = vsel %vm228_vm3, %v2947_v29, %v2966_v3  ;;  %v2965_v19 = vsel %vm228_vm3, %v2964_v12, %v2923_v9  ;;  %v7212_v3 = vld [vmem:[%s10242_s7] ss:$0 sm:$0xff] }
 0x538   :  { %7106 = vrot.lane.b32.xlu1 %v7105_v20, %s10258_s21  ;;  %v7125_v26 = vpack.i.bf16 %v2967_v31, %v8712_v56  ;;  %v7120_v33 = vpack.i.bf16 %v2965_v19, %v8718_v24  ;;  %v2959_v52 = vperm.slane %v2951_v58, %v7627_v14  ;;  %v2974_v22 = vrot.slane %v2935_v46, 4 }
 0x539   :  { %7116 = vrot.lane.b32.xlu0 %v7115_v54, %s10256_s22  ;;  %7111 = vrot.lane.b32.xlu2 %v7110_v11, %s10255_s17  ;;  %v2961_v39 = vsel %vm228_vm3, %v2960_v15, %v2919_v30  ;;  %v7411_v19 = vmov 64.0  }
 0x53a   :  { %v2972_v55 = vrot.slane %v2959_v52, 4  ;;  %v2975_v27 = vsel %vm228_vm3, %v2959_v52, %v2974_v22  ;;  %7290 = vrcp.f32 %v7411_v19 }
 0x53b   :  { %v7135_v6 = vpack.i.bf16 %v2975_v27, %v8721_v49  ;;  %v6952_v49 = vld [vmem:[%s10241_s6 + $0x18] sm:$0xff] }
 0x53c   :  { %v2973_v56 = vsel %vm228_vm3, %v2972_v55, %v2935_v46  ;;  %3096 = vmatpush.bf16.msra.mxu2 %v6952_v49 }
 0x53d   :  { %v7130_v24 = vpack.i.bf16 %v2973_v56, %v8715_v16  ;;  %v6951_v16 = vld [vmem:[%s10241_s6 + $0x10] sm:$0xff] }
 0x540   :  { %3097 = vmatpush.bf16.msra.mxu2 %v6951_v16 }
 0x541   :  { %7126 = vrot.lane.b32.xlu0 %v7125_v26, %s10257_s2  ;;  %7121 = vrot.lane.b32.xlu2 %v7120_v33, %s10259_s23  ;;  %v7291_v26 = vpop.eup %7290 }
 0x542   :  { %v3117_v33 = vmul.f32 64.0, %v7291_v26  ;;  %vm3121_vm10 = vweird.f32 %v7291_v26 }
 0x544   :  { %3098 = vmatpush.bf16.msra.mxu2 %v6950_v41  ;;  %v3118_v52 = vsub.f32 1.0, %v3117_v33 }
 0x546   :  { %v3119_v22 = vmul.f32 %v7291_v26, %v3118_v52 }
 0x548   :  { %3099 = vmatpush.bf16.msra.mxu2 %v6949_v42 }
 0x549   :  { %7131 = vrot.lane.b32.xlu0 %v7130_v24, %s10260_s24  ;;  %7136 = vrot.lane.b32.xlu2 %v7135_v6, %s10261_s25  ;;  %s10280_s25 = smov 48  }
 0x593   :  { %v7112_v0 = vpop.permute.xlu2 %7111 }
 0x594   :  { %v7114_v10 = vunpack.i.h.bf16 %v7112_v0  ;;  %v7113_v30 = vunpack.i.l.bf16 %v7112_v0 }
 0x59b   :  { %v7122_v21 = vpop.permute.xlu2 %7121 }
 0x59c   :  { %v7124_v32 = vunpack.i.h.bf16 %v7122_v21  ;;  %v7123_v7 = vunpack.i.l.bf16 %v7122_v21  ;;  %v6960_v21 = vld [vmem:[%s10245_s10 + $0x34] sm:$0xf0] }
 0x5a3   :  { %v7137_v63 = vpop.permute.xlu2 %7136 }
 0x5a4   :  { %v7139_v40 = vunpack.i.h.bf16 %v7137_v63  ;;  %v7138_v9 = vunpack.i.l.bf16 %v7137_v63  ;;  %v6602_v63 = vld [vmem:[%s10245_s10 + $0x18] sm:$0xf0] }
 0x5aa   :  { %v7107_v45 = vpop.permute.xlu1 %7106 }
 0x5ab   :  { %v7117_v44 = vpop.permute.xlu0 %7116  ;;  %v7108_v1 = vunpack.i.l.bf16 %v7107_v45 }
 0x5ac   :  { %v7119_v5 = vunpack.i.h.bf16 %v7117_v44  ;;  %v7118_v48 = vunpack.i.l.bf16 %v7117_v44 }
 0x5ae   :  { %v3032_v23 = vsel %vm71_vm1, %v8709_v25, %v7118_v48  ;;  %v3033_v4 = vsel %vm71_vm1, %v2961_v39, %v7119_v5  ;;  %v7109_v25 = vunpack.i.h.bf16 %v7107_v45  ;;  %v3120_v39 = vadd.f32 %v7291_v26, %v3119_v22  ;;  %v6616_v48 = vld [vmem:[%s10245_s10 + $0x30] sm:$0xf]  ;;  %v6610_v45 = vld [vmem:[%s10245_s10 + $0x28] sm:$0xf0]  ;;  %v7213_v22 = vld [vmem:[%s10243_s8] ss:$0 sm:$0xff] }
 0x5af   :  { %v3035_v18 = vsel %vm3034_vm4, %v3032_v23, %v7123_v7  ;;  %v3036_v59 = vsel %vm3034_vm4, %v3033_v4, %v7124_v32  ;;  %v6617_v23 = vor.u32 %v6960_v21, %v6616_v48  ;;  %v6959_v4 = vld [vmem:[%s10245_s10 + $0x34] sm:$0xf]  ;;  %v6608_v32 = vld [vmem:[%s10245_s10 + $0x20] sm:$0xf]  ;;  %v6962_v48 = vld [vmem:[%s10247_s12 + $0x8] sm:$0xff] }
 0x5b0   :  { %v8856_v55 = vsel %vm3121_vm10, %v7291_v26, %v3120_v39  ;;  %v6971_v21 = vld [vmem:[%s10247_s12 + $0x50] sm:$0xff] }
 0x5b1   :  { %3233 = vmatpush.bf16.msra.mxu0 %v6617_v23  ;;  %v6961_v23 = vld [vmem:[%s10247_s12] sm:$0xff] }
 0x5b3   :  { %v7127_v62 = vpop.permute.xlu0 %7126 }
 0x5b4   :  { %v7129_v47 = vunpack.i.h.bf16 %v7127_v62  ;;  %v7128_v8 = vunpack.i.l.bf16 %v7127_v62  ;;  %v6618_v62 = vld [vmem:[%s10245_s10 + $0x38] sm:$0xf0] }
 0x5b5   :  { %v6621_v7 = vor.u32 %v6959_v4, %v6618_v62  ;;  %v6970_v4 = vld [vmem:[%s10247_s12 + $0x48] sm:$0xff]  ;;  %v6969_v62 = vld [vmem:[%s10247_s12 + $0x40] sm:$0xff] }
 0x5b6   :  { %v3038_v60 = vsel %vm3037_vm5, %v3035_v18, %v7128_v8  ;;  %v3039_v50 = vsel %vm3037_vm5, %v3036_v59, %v7129_v47  ;;  %v6958_v47 = vld [vmem:[%s10245_s10 + $0x24] sm:$0xf0]  ;;  %v6957_v8 = vld [vmem:[%s10245_s10 + $0x24] sm:$0xf] }
 0x5b7   :  { %v3041_v61 = vsel %vm3040_vm6, %v3038_v60, %v7108_v1  ;;  %v3042_v13 = vsel %vm3040_vm6, %v3039_v50, %v7109_v25  ;;  %v6609_v18 = vor.u32 %v6958_v47, %v6608_v32  ;;  %3247 = vmatpush.bf16.msra.mxu3 %v6621_v7  ;;  %v6613_v59 = vor.u32 %v6957_v8, %v6610_v45  ;;  %v6600_v60 = vld [vmem:[%s10245_s10 + $0x10] sm:$0xf]  ;;  %v6956_v50 = vld [vmem:[%s10245_s10 + $0x14] sm:$0xf0]  ;;  %v6955_v1 = vld [vmem:[%s10245_s10 + $0x14] sm:$0xf] }
 0x5b8   :  { %v3044_v29 = vsel %vm3043_vm7, %v3041_v61, %v7113_v30  ;;  %v3045_v17 = vsel %vm3043_vm7, %v3042_v13, %v7114_v10  ;;  %v6968_v61 = vld [vmem:[%s10247_s12 + $0x38] sm:$0xff]  ;;  %v6601_v30 = vor.u32 %v6956_v50, %v6600_v60  ;;  %v3179_v32 = vld [vmem:[%s10246_s11] sm:$0x3] }
 0x5b9   :  { %v6976_v10 = vld [vmem:[%s10247_s12 + $0x78] sm:$0xff]  ;;  %3234 = vmatpush.bf16.msra.mxu0 %v6609_v18  ;;  %3395 = vmatpush.bf16.msrb.mxu1 %v6968_v61  ;;  %v3182_v47 = vperm.slane %v3179_v32, 0 }
 0x5ba   :  { %3409 = vmatpush.bf16.msrb.mxu2 %v6976_v10 }
 0x5bb   :  { %v7132_v28 = vpop.permute.xlu0 %7131  ;;  %3248 = vmatpush.bf16.msra.mxu3 %v6613_v59  ;;  %v3183_v59 = vperm.slane %v3179_v32, 1 }
 0x5bc   :  { %v7134_v34 = vunpack.i.h.bf16 %v7132_v28  ;;  %v7133_v38 = vunpack.i.l.bf16 %v7132_v28  ;;  %v6592_v28 = vld [vmem:[%s10245_s10] sm:$0xf] }
 0x5bd   :  { %3235 = vmatpush.bf16.msra.mxu0 %v6601_v30 }
 0x5be   :  { %v3047_v51 = vsel %vm3046_vm8, %v3044_v29, %v7133_v38  ;;  %v3048_v35 = vsel %vm3046_vm8, %v3045_v17, %v7134_v34  ;;  %v6967_v34 = vld [vmem:[%s10247_s12 + $0x30] sm:$0xff]  ;;  %v6954_v29 = vld [vmem:[%s10245_s10 + $0x4] sm:$0xf0] }
 0x5bf   :  { %v3050_v58 = vsel %vm3049_vm9, %v3047_v51, %v7138_v9  ;;  %v3051_v2 = vsel %vm3049_vm9, %v3048_v35, %v7139_v40  ;;  %v6605_v9 = vor.u32 %v6955_v1, %v6602_v63  ;;  %v6975_v17 = vld [vmem:[%s10247_s12 + $0x70] sm:$0xff]  ;;  %v6953_v35 = vld [vmem:[%s10245_s10 + $0x4] sm:$0xf]  ;;  %3396 = vmatpush.bf16.msrb.mxu1 %v6967_v34 }
 0x5c0   :  { %v3061_v15 = vpack.c.bf16 %v3051_v2, %v3050_v58  ;;  %v6594_v58 = vld [vmem:[%s10245_s10 + $0x8] sm:$0xf0]  ;;  %3410 = vmatpush.bf16.msrb.mxu2 %v6975_v17 }
 0x5c1   :  { %3249 = vmatpush.bf16.msra.mxu3 %v6605_v9 }
 0x5c2   :  { %6589 = vmatmul.msk.bf16.vlgmr.msra.gmra.mxu2 %vm151_vm2, %v3061_v15  ;;  %v6593_v15 = vor.u32 %v6954_v29, %v6592_v28 }
 0x5c4   :  { %3236 = vmatpush.bf16.msra.mxu0 %v6593_v15 }
 0x645   :  { %v3101_v12 = vpop.f32.mrf.mxu2 }
 0x646   :  { %v3102_v20 = vadd.f32 %v7212_v3, %v3101_v12  ;;  %v6597_v12 = vor.u32 %v6953_v35, %v6594_v58 }
 0x648   :  { %v3106_v43 = vadd.f32 %v3102_v20, %v7579_v36  ;;  %v6974_v20 = vld [vmem:[%s10247_s12 + $0x68] sm:$0xff]  ;;  %3250 = vmatpush.bf16.msra.mxu3 %v6597_v12 }
 0x649   :  { %3411 = vmatpush.bf16.msrb.mxu2 %v6974_v20 }
 0x64a   :  { %v3110_v53 = vsel %vm151_vm2, %v3106_v43, 0.0 }
 0x64b   :  { %3111 = vadd.xlane.f32.xlu0 %v3110_v53 }
 0x64d   :  { %v3103_v46 = vpop.f32.mrf.mxu2 }
 0x64e   :  { %v3104_v54 = vadd.f32 %v7212_v3, %v3103_v46  ;;  %v6966_v3 = vld [vmem:[%s10247_s12 + $0x28] sm:$0xff]  ;;  %v6965_v46 = vld [vmem:[%s10247_s12 + $0x20] sm:$0xff] }
 0x64f   :  { %3397 = vmatpush.bf16.msrb.mxu1 %v6966_v3 }
 0x650   :  { %v3107_v11 = vadd.f32 %v3104_v54, %v7581_v37 }
 0x652   :  { %v3113_v31 = vsel %vm151_vm2, %v3107_v11, 0.0 }
 0x653   :  { %3114 = vadd.xlane.f32.xlu2 %v3113_v31  ;;  %3398 = vmatpush.bf16.msrb.mxu1 %v6965_v46 }
 0x6be   :  { %v3112_v36 = vpop.xlane.xlu0 %3111 }
 0x6bf   :  { %v3123_v27 = vmul.f32 %v8856_v55, %v3112_v36 }
 0x6c1   :  { %v8859_v6 = vsub.f32 %v3106_v43, %v3123_v27 }
 0x6c3   :  { %v3127_v37 = vmul.f32 %v8859_v6, %v8859_v6 }
 0x6c5   :  { %v3129_v56 = vsel %vm151_vm2, %v3127_v37, 0.0  ;;  %v7214_v37 = vld [vmem:[%s10244_s9] ss:$0 sm:$0xff] }
 0x6c6   :  { %v3115_v24 = vpop.xlane.xlu2 %3114  ;;  %3130 = vadd.xlane.f32.xlu1 %v3129_v56 }
 0x6c7   :  { %v3124_v49 = vmul.f32 %v8856_v55, %v3115_v24 }
 0x6c9   :  { %v8865_v16 = vsub.f32 %v3107_v11, %v3124_v49 }
 0x6cb   :  { %v3128_v41 = vmul.f32 %v8865_v16, %v8865_v16 }
 0x6cd   :  { %v3132_v42 = vsel %vm151_vm2, %v3128_v41, 0.0 }
 0x6ce   :  { %3133 = vadd.xlane.f32.xlu0 %v3132_v42 }
 0x739   :  { %v3131_v0 = vpop.xlane.xlu1 %3130 }
 0x73a   :  { %v3135_v44 = vmul.f32 %v3131_v0, %v8856_v55 }
 0x73c   :  { %v8871_v5 = vadd.f32 1e-05, %v3135_v44  ;;  %v6973_v44 = vld [vmem:[%s10247_s12 + $0x60] sm:$0xff] }
 0x73d   :  { %3412 = vmatpush.bf16.msrb.mxu2 %v6973_v44 }
 0x73e   :  { %7292 = vrsqrt.f32 %v8871_v5  ;;  %vm3145_vm12 = vweird.f32 %v8871_v5 }
 0x741   :  { %v3134_v25 = vpop.xlane.xlu0 %3133 }
 0x742   :  { %v3136_v13 = vmul.f32 %v3134_v25, %v8856_v55 }
 0x744   :  { %v7293_v38 = vpop.eup %7292  ;;  %v3138_v40 = vadd.f32 1e-05, %v3136_v13 }
 0x745   :  { %v3140_v51 = vmul.f32 %v7293_v38, %v8871_v5  ;;  %vm3146_vm11 = vweird.f32 %v7293_v38  ;;  %v6972_v5 = vld [vmem:[%s10247_s12 + $0x58] sm:$0xff] }
 0x746   :  { %7294 = vrsqrt.f32 %v3138_v40  ;;  %vm3147_vm13 = vmor %vm3145_vm12, %vm3146_vm11  ;;  %vm3155_vm15 = vweird.f32 %v3138_v40  ;;  %3413 = vmatpush.bf16.msrb.mxu2 %v6972_v5 }
 0x747   :  { %v3141_v2 = vmul.f32 %v7293_v38, %v3140_v51 }
 0x749   :  { %v3142_v43 = vmul.f32 0.5, %v3141_v2 }
 0x74a   :  { %3414 = vmatpush.bf16.msrb.mxu2 %v6971_v21  ;;  %v6707_v21 = vld [vmem:[%s10239_s4 + $0x50] sm:$0xf] }
 0x74b   :  { %v3143_v53 = vsub.f32 1.5, %v3142_v43 }
 0x74c   :  { %v7295_v54 = vpop.eup %7294 }
 0x74d   :  { %v3144_v11 = vmul.f32 %v7293_v38, %v3143_v53  ;;  %v3150_v31 = vmul.f32 %v7295_v54, %v3138_v40  ;;  %vm3156_vm14 = vweird.f32 %v7295_v54 }
 0x74e   :  { %vm3157_vm10 = vmor %vm3155_vm15, %vm3156_vm14  ;;  %3415 = vmatpush.bf16.msrb.mxu2 %v6970_v4  ;;  %v6979_v4 = vld [vmem:[%s10239_s4 + $0x54] sm:$0xf] }
 0x74f   :  { %v3151_v19 = vmul.f32 %v7295_v54, %v3150_v31  ;;  %v3148_v26 = vsel %vm3147_vm13, %v7293_v38, %v3144_v11  ;;  %v7215_v38 = vld [vmem:[%s10248_s13] ss:$0 sm:$0xff] }
 0x750   :  { %v3159_v39 = vmul.f32 %v3148_v26, %v8859_v6  ;;  %v6964_v6 = vld [vmem:[%s10247_s12 + $0x18] sm:$0xff] }
 0x751   :  { %v3152_v33 = vmul.f32 0.5, %v3151_v19  ;;  %3399 = vmatpush.bf16.msrb.mxu1 %v6964_v6  ;;  %v6717_v6 = vld [vmem:[%s10239_s4 + $0x68] sm:$0xf0] }
 0x752   :  { %v3164_v56 = vmul.f32 %v7213_v22, %v3159_v39  ;;  %3416 = vmatpush.bf16.msrb.mxu2 %v6969_v62  ;;  %v6709_v62 = vld [vmem:[%s10239_s4 + $0x58] sm:$0xf0] }
 0x753   :  { %v3153_v52 = vsub.f32 1.5, %v3152_v33 }
 0x754   :  { %v3169_v41 = vadd.f32 %v7214_v37, %v3164_v56 }
 0x755   :  { %v3154_v36 = vmul.f32 %v7295_v54, %v3153_v52 }
 0x757   :  { %v3158_v27 = vsel %vm3157_vm10, %v7295_v54, %v3154_v36  ;;  %v6723_v36 = vld [vmem:[%s10239_s4 + $0x70] sm:$0xf] }
 0x758   :  { %v3160_v24 = vmul.f32 %v3158_v27, %v8865_v16  ;;  %v6963_v16 = vld [vmem:[%s10247_s12 + $0x10] sm:$0xff]  ;;  %v6984_v27 = vld [vmem:[%s10239_s4 + $0x74] sm:$0xf0] }
 0x759   :  { %3400 = vmatpush.bf16.msrb.mxu1 %v6963_v16  ;;  %v6724_v56 = vor.u32 %v6984_v27, %v6723_v36 }
 0x75a   :  { %v3165_v49 = vmul.f32 %v7213_v22, %v3160_v24  ;;  %v6725_v24 = vld [vmem:[%s10239_s4 + $0x78] sm:$0xf0] }
 0x75b   :  { %3555 = vmatpush.bf16.msrb.mxu0 %v6724_v56 }
 0x75c   :  { %v3170_v42 = vadd.f32 %v7214_v37, %v3165_v49  ;;  %v6983_v37 = vld [vmem:[%s10239_s4 + $0x74] sm:$0xf]  ;;  %v6715_v49 = vld [vmem:[%s10239_s4 + $0x60] sm:$0xf] }
 0x75d   :  { %3401 = vmatpush.bf16.msrb.mxu1 %v6962_v48 }
 0x75e   :  { %v3180_v0 = vpack.c.bf16 %v3170_v42, %v3169_v41 }
 0x760   :  { %6622 = vmatmul.msk.bf16.vlgmr.msra.gmra.mxu0 %vm151_vm2, %v3180_v0  ;;  %6623 = vmatmul.msk.bf16.vlgmr.msra.gmra.mxu3 %vm151_vm2, %v3180_v0  ;;  %v6981_v0 = vld [vmem:[%s10239_s4 + $0x64] sm:$0xf] }
 0x761   :  { %3402 = vmatpush.bf16.msrb.mxu1 %v6961_v23  ;;  %v6720_v48 = vor.u32 %v6981_v0, %v6717_v6  ;;  %v6980_v23 = vld [vmem:[%s10239_s4 + $0x54] sm:$0xf0] }
 0x7dd   :  { %v3238_v7 = vpop.f32.mrf.mxu0 }
 0x7de   :  { %v3239_v45 = vadd.f32 %v3238_v7, %v3182_v47 }
 0x7e0   :  { %v3257_v50 = vmax.f32 %v3239_v45, 0.0  ;;  %v6712_v45 = vor.u32 %v6979_v4, %v6709_v62 }
 0x7e3   :  { %v3252_v8 = vpop.f32.mrf.mxu3 }
 0x7e4   :  { %v3253_v1 = vadd.f32 %v3252_v8, %v3183_v59  ;;  %v6708_v8 = vor.u32 %v6980_v23, %v6707_v21 }
 0x7e5   :  { %v3240_v18 = vpop.f32.mrf.mxu0 }
 0x7e6   :  { %v3241_v60 = vadd.f32 %v3240_v18, %v3182_v47  ;;  %v3258_v10 = vmax.f32 %v3253_v1, 0.0  ;;  %v6699_v18 = vld [vmem:[%s10239_s4 + $0x40] sm:$0xf] }
 0x7e8   :  { %v3259_v25 = vmax.f32 %v3241_v60, 0.0 }
 0x7ea   :  { %v3294_v63 = vpack.c.bf16 %v3259_v25, %v3257_v50  ;;  %v6977_v50 = vld [vmem:[%s10239_s4 + $0x44] sm:$0xf]  ;;  %v6701_v25 = vld [vmem:[%s10239_s4 + $0x48] sm:$0xf0] }
 0x7eb   :  { %v3254_v61 = vpop.f32.mrf.mxu3 }
 0x7ec   :  { %v3255_v13 = vadd.f32 %v3254_v61, %v3183_v59  ;;  %3403 = vmatmul.bf16.vlgmr.msrb.gmra.mxu1 %v3294_v63  ;;  %v6978_v59 = vld [vmem:[%s10239_s4 + $0x44] sm:$0xf0]  ;;  %v6704_v61 = vor.u32 %v6977_v50, %v6701_v25 }
 0x7ed   :  { %v6700_v63 = vor.u32 %v6978_v59, %v6699_v18 }
 0x7ee   :  { %v3260_v30 = vmax.f32 %v3255_v13, 0.0 }
 0x7f0   :  { %v3295_v28 = vpack.c.bf16 %v3260_v30, %v3258_v10 }
 0x7f2   :  { %3417 = vmatmul.bf16.vlgmr.msrb.gmra.mxu2 %v3295_v28 }
 0x869   :  { %v3404_v34 = vpop.f32.mrf.mxu1 }
 0x86a   :  { %v3405_v40 = vadd.f32 %v7215_v38, %v3404_v34  ;;  %v7216_v34 = vld [vmem:[%s10249_s14] ss:$0 sm:$0xff] }
 0x871   :  { %v3406_v51 = vpop.f32.mrf.mxu1 }
 0x872   :  { %v3407_v58 = vadd.f32 %v7215_v38, %v3406_v51 }
 0x875   :  { %v3418_v9 = vpop.f32.mrf.mxu2 }
 0x876   :  { %v3419_v29 = vadd.f32 %v3418_v9, %v3405_v40  ;;  %v7217_v9 = vld [vmem:[%s10250_s15] ss:$0 sm:$0xff] }
 0x878   :  { %v3423_v17 = vadd.f32 %v3419_v29, %v3169_v41  ;;  %v6982_v41 = vld [vmem:[%s10239_s4 + $0x64] sm:$0xf0] }
 0x879   :  { %v6716_v16 = vor.u32 %v6982_v41, %v6715_v49 }
 0x87a   :  { %v3427_v35 = vsel %vm151_vm2, %v3423_v17, 0.0 }
 0x87b   :  { %3428 = vadd.xlane.f32.xlu2 %v3427_v35  ;;  %3556 = vmatpush.bf16.msrb.mxu0 %v6716_v16 }
 0x87d   :  { %v3420_v2 = vpop.f32.mrf.mxu2 }
 0x87e   :  { %v3421_v15 = vadd.f32 %v3420_v2, %v3407_v58 }
 0x87f   :  { %3557 = vmatpush.bf16.msrb.mxu0 %v6708_v8 }
 0x880   :  { %v3424_v3 = vadd.f32 %v3421_v15, %v3170_v42  ;;  %v6728_v42 = vor.u32 %v6983_v37, %v6725_v24 }
 0x882   :  { %v3430_v12 = vsel %vm151_vm2, %v3424_v3, 0.0  ;;  %3569 = vmatpush.bf16.msrb.mxu3 %v6728_v42 }
 0x883   :  { %3431 = vadd.xlane.f32.xlu0 %v3430_v12  ;;  %3558 = vmatpush.bf16.msrb.mxu0 %v6700_v63 }
 0x886   :  { %3570 = vmatpush.bf16.msrb.mxu3 %v6720_v48 }
 0x88a   :  { %3571 = vmatpush.bf16.msrb.mxu3 %v6712_v45 }
 0x88e   :  { %3572 = vmatpush.bf16.msrb.mxu3 %v6704_v61 }
 0x8ee   :  { %v3429_v20 = vpop.xlane.xlu2 %3428 }
 0x8ef   :  { %v3433_v43 = vmul.f32 %v3429_v20, %v8856_v55 }
 0x8f1   :  { %v8992_v53 = vsub.f32 %v3423_v17, %v3433_v43 }
 0x8f3   :  { %v3437_v46 = vmul.f32 %v8992_v53, %v8992_v53 }
 0x8f5   :  { %v3439_v54 = vsel %vm151_vm2, %v3437_v46, 0.0 }
 0x8f6   :  { %v3432_v11 = vpop.xlane.xlu0 %3431  ;;  %3440 = vadd.xlane.f32.xlu1 %v3439_v54 }
 0x8f7   :  { %v3434_v31 = vmul.f32 %v3432_v11, %v8856_v55 }
 0x8f9   :  { %v8998_v19 = vsub.f32 %v3424_v3, %v3434_v31 }
 0x8fb   :  { %v3438_v26 = vmul.f32 %v8998_v19, %v8998_v19 }
 0x8fd   :  { %v3442_v33 = vsel %vm151_vm2, %v3438_v26, 0.0 }
 0x8fe   :  { %3443 = vadd.xlane.f32.xlu2 %v3442_v33 }
 0x969   :  { %v3441_v52 = vpop.xlane.xlu1 %3440 }
 0x96a   :  { %v3445_v22 = vmul.f32 %v3441_v52, %v8856_v55 }
 0x96c   :  { %v3447_v39 = vadd.f32 1e-05, %v3445_v22 }
 0x96e   :  { %7296 = vrsqrt.f32 %v3447_v39  ;;  %vm3455_vm12 = vweird.f32 %v3447_v39 }
 0x971   :  { %v3444_v44 = vpop.xlane.xlu2 %3443 }
 0x972   :  { %v3446_v5 = vmul.f32 %v3444_v44, %v8856_v55 }
 0x974   :  { %v7297_v32 = vpop.eup %7296  ;;  %v3448_v7 = vadd.f32 1e-05, %v3446_v5 }
 0x975   :  { %v3450_v47 = vmul.f32 %v7297_v32, %v3447_v39  ;;  %vm3456_vm11 = vweird.f32 %v7297_v32 }
 0x976   :  { %7298 = vrsqrt.f32 %v3448_v7  ;;  %vm3457_vm13 = vmor %vm3455_vm12, %vm3456_vm11  ;;  %vm3465_vm15 = vweird.f32 %v3448_v7  ;;  %vm5221_vm11 = vcmask 60416  }
 0x977   :  { %v3451_v60 = vmul.f32 %v7297_v32, %v3450_v47 }
 0x979   :  { %v3452_v1 = vmul.f32 0.5, %v3451_v60 }
 0x97b   :  { %v3453_v13 = vsub.f32 1.5, %v3452_v1 }
 0x97c   :  { %v7299_v10 = vpop.eup %7298 }
 0x97d   :  { %v3454_v30 = vmul.f32 %v7297_v32, %v3453_v13  ;;  %v3460_v28 = vmul.f32 %v7299_v10, %v3448_v7  ;;  %vm3466_vm14 = vweird.f32 %v7299_v10 }
 0x97e   :  { %vm3467_vm10 = vmor %vm3465_vm15, %vm3466_vm14 }
 0x97f   :  { %v3458_v38 = vsel %vm3457_vm13, %v7297_v32, %v3454_v30  ;;  %v3461_v40 = vmul.f32 %v7299_v10, %v3460_v28 }
 0x980   :  { %v3469_v29 = vmul.f32 %v3458_v38, %v8992_v53  ;;  %v9066_v53 = vld [vmem:[%s10240_s5 + $0x2] sm:$0x3]  ;;  %s10272_s5 = smov 104  }
 0x981   :  { %v3462_v17 = vmul.f32 0.5, %v3461_v40  ;;  %v3504_v46 = vperm.slane %v9066_v53, 0  ;;  %v3505_v25 = vperm.slane %v9066_v53, 1 }
 0x982   :  { %v3474_v51 = vmul.f32 %v7216_v34, %v3469_v29 }
 0x983   :  { %v3463_v35 = vsub.f32 1.5, %v3462_v17 }
 0x984   :  { %v3479_v58 = vadd.f32 %v7217_v9, %v3474_v51 }
 0x985   :  { %v3464_v2 = vmul.f32 %v7299_v10, %v3463_v35 }
 0x986   :  { %3483 = vst.sshfl [vmem:[#allocation1] sm:$0xff pattern:$0x75316420] %v3479_v58 }
 0x987   :  { %v3468_v15 = vsel %vm3467_vm10, %v7299_v10, %v3464_v2 }
 0x988   :  { %v3470_v3 = vmul.f32 %v3468_v15, %v8998_v19 }
 0x98a   :  { %v3475_v12 = vmul.f32 %v7216_v34, %v3470_v3 }
 0x98c   :  { %v3480_v20 = vadd.f32 %v7217_v9, %v3475_v12 }
 0x98e   :  { %3486 = vst.sshfl [vmem:[#allocation1 + $0x10] sm:$0xff pattern:$0x75316420] %v3480_v20  ;;  %v3502_v43 = vpack.c.bf16 %v3480_v20, %v3479_v58 }
 0x990   :  { %6729 = vmatmul.msk.bf16.vlgmr.msrb.gmra.mxu0 %vm151_vm2, %v3502_v43  ;;  %6730 = vmatmul.msk.bf16.vlgmr.msrb.gmra.mxu3 %vm151_vm2, %v3502_v43 }
 0xa0d   :  { %v3560_v54 = vpop.f32.mrf.mxu0 }
 0xa0e   :  { %v3561_v11 = vadd.f32 %v3560_v54, %v3504_v46 }
 0xa10   :  { %3593 = vrot.lane.b32.xlu2 %v3561_v11, %s7395_s28  ;;  %3585 = vrot.lane.b32.xlu1 %v3561_v11, %s7399_s19  ;;  %v3609_v6 = vrot.slane %v3561_v11, 4 }
 0xa11   :  { %3601 = vrot.lane.b32.xlu0 %v3561_v11, %s7397_s30 }
 0xa13   :  { %v3574_v24 = vpop.f32.mrf.mxu3 }
 0xa14   :  { %v9120_v40 = vadd.f32 %v3574_v24, %v3505_v25 }
 0xa15   :  { %v3562_v31 = vpop.f32.mrf.mxu0 }
 0xa16   :  { %v9075_v19 = vadd.f32 %v3562_v31, %v3504_v46 }
 0xa18   :  { %3597 = vrot.lane.b32.xlu2 %v3561_v11, %s7394_s27  ;;  %3581 = vrot.lane.b32.xlu1 %v3561_v11, %s7396_s29 }
 0xa19   :  { %3605 = vrot.lane.b32.xlu0 %v3561_v11, %s7400_s1 }
 0xa1b   :  { %v3576_v45 = vpop.f32.mrf.mxu3 }
 0xa1c   :  { %v9116_v10 = vadd.f32 %v3576_v45, %v3505_v25 }
 0xa1e   :  { %v9127_v3 = vpack.i.bf16 %v9116_v10, %v9120_v40 }
 0xa20   :  { %3587 = vrot.lane.b32.xlu2 %v9075_v19, %s7399_s19  ;;  %3595 = vrot.lane.b32.xlu1 %v9075_v19, %s7395_s28 }
 0xa21   :  { %3589 = vrot.lane.b32.xlu0 %v3561_v11, %s10272_s5 }
 0xa28   :  { %3591 = vrot.lane.b32.xlu2 %v9075_v19, %s10272_s5  ;;  %3599 = vrot.lane.b32.xlu1 %v9075_v19, %s7394_s27 }
 0xa29   :  { %3603 = vrot.lane.b32.xlu0 %v9075_v19, %s7397_s30 }
 0xa31   :  { %3607 = vrot.lane.b32.xlu0 %v9075_v19, %s7400_s1 }
 0xa39   :  { %3583 = vrot.lane.b32.xlu0 %v9075_v19, %s7396_s29 }
 0xa6a   :  { %v3594_v26 = vpop.permute.xlu2 %3593 }
 0xa6b   :  { %v3613_v52 = vrot.slane %v3594_v26, 4 }
 0xa72   :  { %v3598_v33 = vpop.permute.xlu2 %3597 }
 0xa73   :  { %v3614_v49 = vrot.slane %v3598_v33, 4 }
 0xa7a   :  { %v9094_v37 = vpop.permute.xlu2 %3587 }
 0xa82   :  { %v3586_v22 = vpop.permute.xlu1 %3585  ;;  %v9103_v62 = vpop.permute.xlu2 %3591 }
 0xa83   :  { %v3602_v39 = vpop.permute.xlu0 %3601  ;;  %v3642_v21 = vsel %vm228_vm3, %v3586_v22, %v3609_v6  ;;  %v7170_v18 = vpack.i.bf16 %v9103_v62, %v9075_v19 }
 0xa84   :  { %v3654_v36 = vsel %vm228_vm3, %v3602_v39, %v3613_v52  ;;  %v7140_v27 = vpack.i.bf16 %v3586_v22, %v3602_v39  ;;  %v3646_v32 = vperm.slane %v3642_v21, %v7615_v57 }
 0xa85   :  { %v3658_v56 = vperm.slane %v3654_v36, %v7615_v57 }
 0xa86   :  { %7141 = vrot.lane.b32.xlu2 %v7140_v27, %s10273_s20  ;;  %v3667_v1 = vrot.slane %v3646_v32, 4 }
 0xa87   :  { %v3679_v5 = vrot.slane %v3658_v56, 4 }
 0xa8a   :  { %v3582_v41 = vpop.permute.xlu1 %3581 }
 0xa8b   :  { %v7155_v42 = vpack.i.bf16 %v3582_v41, %v3598_v33  ;;  %v3606_v0 = vpop.permute.xlu0 %3605  ;;  %v3610_v47 = vrot.slane %v3582_v41, 4 }
 0xa8c   :  { %v3660_v44 = vsel %vm228_vm3, %v3606_v0, %v3614_v49  ;;  %v7145_v16 = vpack.i.bf16 %v3606_v0, %v3594_v26 }
 0xa8d   :  { %v3664_v48 = vperm.slane %v3660_v44, %v7615_v57 }
 0xa8e   :  { %7156 = vrot.lane.b32.xlu2 %v7155_v42, %s10273_s20  ;;  %7146 = vrot.lane.b32.xlu1 %v7145_v16, %s10273_s20 }
 0xa8f   :  { %v3677_v23 = vrot.slane %v3664_v48, 4  ;;  %v3680_v4 = vsel %vm228_vm3, %v3664_v48, %v3679_v5 }
 0xa90   :  { %v3688_v59 = vperm.slane %v3680_v4, %v7627_v14 }
 0xa91   :  { %v3678_v7 = vsel %vm228_vm3, %v3677_v23, %v3658_v56 }
 0xa92   :  { %v3596_v63 = vpop.permute.xlu1 %3595  ;;  %v3684_v13 = vperm.slane %v3678_v7, %v7627_v14  ;;  %v3693_v34 = vrot.slane %v3688_v59, 4 }
 0xa93   :  { %v3590_v8 = vpop.permute.xlu0 %3589  ;;  %v3621_v9 = vrot.slane %v3596_v63, 4 }
 0xa94   :  { %v3648_v60 = vsel %vm228_vm3, %v3590_v8, %v3610_v47  ;;  %v7150_v50 = vpack.i.bf16 %v3590_v8, %v3561_v11  ;;  %v3689_v17 = vrot.slane %v3684_v13, 4  ;;  %v3617_v47 = vrot.slane %v9075_v19, 4 }
 0xa95   :  { %v3652_v61 = vperm.slane %v3648_v60, %v7615_v57 }
 0xa96   :  { %7171 = vrot.lane.b32.xlu2 %v7170_v18, %s10273_s20  ;;  %7151 = vrot.lane.b32.xlu0 %v7150_v50, %s10273_s20  ;;  %v3698_v60 = vsel %vm228_vm3, %v9094_v37, %v3617_v47 }
 0xa97   :  { %v3665_v30 = vrot.slane %v3652_v61, 4  ;;  %v3668_v28 = vsel %vm228_vm3, %v3652_v61, %v3667_v1  ;;  %v3702_v25 = vperm.slane %v3698_v60, %v7615_v57 }
 0xa98   :  { %v3676_v38 = vperm.slane %v3668_v28, %v7627_v14 }
 0xa99   :  { %v3666_v29 = vsel %vm228_vm3, %v3665_v30, %v3646_v32  ;;  %v3723_v30 = vrot.slane %v3702_v25, 4 }
 0xa9a   :  { %v3672_v51 = vperm.slane %v3666_v29, %v7627_v14  ;;  %v3694_v35 = vsel %vm228_vm3, %v3693_v34, %v3676_v38  ;;  %v3695_v58 = vrot.slane %v3676_v38, 4  ;;  %v3600_v36 = vpop.permute.xlu1 %3599 }
 0xa9b   :  { %v3753_v2 = vrot.slane %v3694_v35, 4  ;;  %v3604_v15 = vpop.permute.xlu0 %3603  ;;  %v3622_v6 = vrot.slane %v3600_v36, 4 }
 0xa9c   :  { %v3690_v12 = vsel %vm228_vm3, %v3689_v17, %v3672_v51  ;;  %v3691_v20 = vrot.slane %v3672_v51, 4  ;;  %v3696_v43 = vsel %vm228_vm3, %v3688_v59, %v3695_v58  ;;  %v3710_v53 = vsel %vm228_vm3, %v3604_v15, %v3621_v9 }
 0xa9d   :  { %v3754_v46 = vsel %vm228_vm3, %v3753_v2, %v3690_v12  ;;  %v3755_v54 = vrot.slane %v3690_v12, 4  ;;  %v3765_v11 = vrot.slane %v3696_v43, 4  ;;  %v7160_v33 = vpack.i.bf16 %v9094_v37, %v3604_v15 }
 0xa9e   :  { %v3692_v31 = vsel %vm228_vm3, %v3684_v13, %v3691_v20  ;;  %v3760_v26 = vperm.slane %v3754_v46, %v7615_v57  ;;  %7186 = vrot.lane.b32.xlu2 %v9127_v3, %s7399_s19  ;;  %v3714_v41 = vperm.slane %v3710_v53, %v7615_v57  ;;  %s10278_s19 = smov 16  }
 0xa9f   :  { %v3756_v52 = vsel %vm228_vm3, %v3694_v35, %v3755_v54  ;;  %v3766_v22 = vsel %vm228_vm3, %v3765_v11, %v3692_v31  ;;  %v3767_v39 = vrot.slane %v3692_v31, 4  ;;  %7161 = vrot.lane.b32.xlu1 %v7160_v33, %s10273_s20 }
 0xaa0   :  { %v3764_v27 = vperm.slane %v3756_v52, %v7615_v57  ;;  %v3772_v56 = vperm.slane %v3766_v22, %v7615_v57  ;;  %v3779_v49 = vrot.slane %v3760_v26, 4  ;;  %v3735_v4 = vrot.slane %v3714_v41, 4 }
 0xaa1   :  { %v3768_v24 = vsel %vm228_vm3, %v3696_v43, %v3767_v39 }
 0xaa2   :  { %v3776_v42 = vperm.slane %v3768_v24, %v7615_v57  ;;  %v3777_v0 = vrot.slane %v3772_v56, 4  ;;  %v3791_v44 = vrot.slane %v3764_v27, 4  ;;  %v9152_v7 = vsel %vm228_vm3, %v3772_v56, %v3779_v49 }
 0xaa3   :  { %v3608_v16 = vpop.permute.xlu0 %3607 }
 0xaa4   :  { %v9147_v5 = vsel %vm228_vm3, %v3777_v0, %v3760_v26  ;;  %v3789_v48 = vrot.slane %v3776_v42, 4  ;;  %v3716_v21 = vsel %vm228_vm3, %v3608_v16, %v3622_v6  ;;  %v7165_v23 = vpack.i.bf16 %v3608_v16, %v3596_v63 }
 0xaa5   :  { %v3720_v32 = vperm.slane %v3716_v21, %v7615_v57  ;;  %v9161_v59 = vsel %vm228_vm3, %v3776_v42, %v3791_v44 }
 0xaa6   :  { %v9156_v8 = vsel %vm228_vm3, %v3789_v48, %v3764_v27  ;;  %7166 = vrot.lane.b32.xlu0 %v7165_v23, %s10273_s20 }
 0xaa7   :  { %v3733_v45 = vrot.slane %v3720_v32, 4  ;;  %v3736_v18 = vsel %vm228_vm3, %v3720_v32, %v3735_v4 }
 0xaa8   :  { %v3744_v61 = vperm.slane %v3736_v18, %v7627_v14 }
 0xaa9   :  { %v3734_v50 = vsel %vm228_vm3, %v3733_v45, %v3714_v41 }
 0xaaa   :  { %v3740_v28 = vperm.slane %v3734_v50, %v7627_v14  ;;  %v3749_v9 = vrot.slane %v3744_v61, 4 }
 0xaab   :  { %v3584_v1 = vpop.permute.xlu0 %3583 }
 0xaac   :  { %v3618_v19 = vrot.slane %v3584_v1, 4  ;;  %v7175_v63 = vpack.i.bf16 %v3584_v1, %v3600_v36  ;;  %v3745_v51 = vrot.slane %v3740_v28, 4 }
 0xaae   :  { %v3704_v13 = vsel %vm228_vm3, %v9103_v62, %v3618_v19  ;;  %7191 = vrot.lane.b32.xlu0 %v9127_v3, %s7395_s28  ;;  %7176 = vrot.lane.b32.xlu1 %v7175_v63, %s10273_s20  ;;  %s10275_s28 = smov 8  }
 0xaaf   :  { %v3708_v37 = vperm.slane %v3704_v13, %v7615_v57 }
 0xab1   :  { %v3721_v34 = vrot.slane %v3708_v37, 4  ;;  %v3724_v38 = vsel %vm228_vm3, %v3708_v37, %v3723_v30 }
 0xab2   :  { %v3732_v29 = vperm.slane %v3724_v38, %v7627_v14 }
 0xab3   :  { %v3722_v17 = vsel %vm228_vm3, %v3721_v34, %v3702_v25 }
 0xab4   :  { %v3728_v62 = vperm.slane %v3722_v17, %v7627_v14  ;;  %v3750_v35 = vsel %vm228_vm3, %v3749_v9, %v3732_v29  ;;  %v3751_v58 = vrot.slane %v3732_v29, 4 }
 0xab5   :  { %v3809_v2 = vrot.slane %v3750_v35, 4 }
 0xab6   :  { %v3746_v15 = vsel %vm228_vm3, %v3745_v51, %v3728_v62  ;;  %v3747_v12 = vrot.slane %v3728_v62, 4  ;;  %v3752_v20 = vsel %vm228_vm3, %v3744_v61, %v3751_v58  ;;  %7181 = vrot.lane.b32.xlu1 %v9127_v3, %s7397_s30  ;;  %s10277_s30 = smov 40  }
 0xab7   :  { %v3810_v43 = vsel %vm228_vm3, %v3809_v2, %v3746_v15  ;;  %v3811_v53 = vrot.slane %v3746_v15, 4  ;;  %v3821_v46 = vrot.slane %v3752_v20, 4 }
 0xab8   :  { %v3748_v54 = vsel %vm228_vm3, %v3740_v28, %v3747_v12  ;;  %v3816_v11 = vperm.slane %v3810_v43, %v7615_v57 }
 0xab9   :  { %v3812_v31 = vsel %vm228_vm3, %v3750_v35, %v3811_v53  ;;  %v3822_v26 = vsel %vm228_vm3, %v3821_v46, %v3748_v54  ;;  %v3823_v33 = vrot.slane %v3748_v54, 4 }
 0xaba   :  { %v3820_v52 = vperm.slane %v3812_v31, %v7615_v57  ;;  %v3828_v22 = vperm.slane %v3822_v26, %v7615_v57  ;;  %v3835_v36 = vrot.slane %v3816_v11, 4 }
 0xabb   :  { %v3824_v39 = vsel %vm228_vm3, %v3752_v20, %v3823_v33  ;;  %v9220_v20 = vperm.slane %v9152_v7, %v7627_v14 }
 0xabc   :  { %v3832_v27 = vperm.slane %v3824_v39, %v7615_v57  ;;  %v3833_v56 = vrot.slane %v3828_v22, 4  ;;  %v3847_v24 = vrot.slane %v3820_v52, 4  ;;  %v9196_v41 = vsel %vm228_vm3, %v3828_v22, %v3835_v36 }
 0xabe   :  { %7196 = vrot.lane.b32.xlu1 %v9127_v3, %s7400_s1  ;;  %v3845_v49 = vrot.slane %v3832_v27, 4  ;;  %v9199_v42 = vsel %vm228_vm3, %v3833_v56, %v3816_v11  ;;  %v9202_v0 = vsel %vm228_vm3, %v3832_v27, %v3847_v24  ;;  %s10279_s1 = smov 56  }
 0xac0   :  { %v9205_v6 = vsel %vm228_vm3, %v3845_v49, %v3820_v52  ;;  %v9236_v49 = vperm.slane %v9156_v8, %v7627_v14 }
 0xae0   :  { %v7142_v44 = vpop.permute.xlu2 %7141 }
 0xae1   :  { %v7143_v48 = vunpack.i.l.bf16 %v7142_v44  ;;  %v7144_v19 = vunpack.i.h.bf16 %v7142_v44  ;;  %v3803_v44 = vrot.slane %v9220_v20, 4 }
 0xae3   :  { %v3953_v4 = vrot.slane %v7143_v48, 4  ;;  %v3929_v35 = vrot.slane %v7144_v19, 4 }
 0xae8   :  { %v7157_v16 = vpop.permute.xlu2 %7156 }
 0xae9   :  { %v7158_v21 = vunpack.i.l.bf16 %v7157_v16  ;;  %v7159_v30 = vunpack.i.h.bf16 %v7157_v16 }
 0xaeb   :  { %v3967_v32 = vrot.slane %v7158_v21, 4  ;;  %v3943_v58 = vrot.slane %v7159_v30, 4 }
 0xb00   :  { %v7147_v23 = vpop.permute.xlu1 %7146 }
 0xb01   :  { %v7149_v47 = vunpack.i.h.bf16 %v7147_v23  ;;  %v7148_v45 = vunpack.i.l.bf16 %v7147_v23  ;;  %v9242_v23 = vperm.slane %v9147_v5, %v7627_v14 }
 0xb03   :  { %v3965_v18 = vrot.slane %v7149_v47, 4  ;;  %v3968_v60 = vsel %vm228_vm3, %v7149_v47, %v3967_v32  ;;  %v3954_v50 = vsel %vm228_vm3, %v3953_v4, %v7148_v45  ;;  %v3955_v25 = vrot.slane %v7148_v45, 4 }
 0xb04   :  { %v3960_v1 = vperm.slane %v3954_v50, %v7615_v57  ;;  %v3976_v61 = vperm.slane %v3968_v60, %v7615_v57 }
 0xb05   :  { %v3966_v63 = vsel %vm228_vm3, %v3965_v18, %v7158_v21  ;;  %v3956_v13 = vsel %vm228_vm3, %v7143_v48, %v3955_v25  ;;  %v9249_v25 = vpop.permute.xlu2 %7171 }
 0xb06   :  { %v3972_v37 = vperm.slane %v3966_v63, %v7615_v57  ;;  %v3964_v28 = vperm.slane %v3956_v13, %v7615_v57  ;;  %v4003_v34 = vrot.slane %v3960_v1, 4  ;;  %v4013_v17 = vrot.slane %v3976_v61, 4 }
 0xb08   :  { %v4001_v38 = vrot.slane %v3972_v37, 4  ;;  %v4015_v9 = vrot.slane %v3964_v28, 4  ;;  %v7152_v29 = vpop.permute.xlu0 %7151  ;;  %v4004_v2 = vsel %vm228_vm3, %v3972_v37, %v4003_v34  ;;  %v4014_v31 = vsel %vm228_vm3, %v4013_v17, %v3964_v28 }
 0xb09   :  { %v7154_v51 = vunpack.i.h.bf16 %v7152_v29  ;;  %v7153_v62 = vunpack.i.l.bf16 %v7152_v29  ;;  %v4012_v11 = vperm.slane %v4004_v2, %v7627_v14  ;;  %v4020_v4 = vperm.slane %v4014_v31, %v7627_v14 }
 0xb0a   :  { %v4002_v15 = vsel %vm228_vm3, %v4001_v38, %v3960_v1  ;;  %v4016_v12 = vsel %vm228_vm3, %v3976_v61, %v4015_v9  ;;  %v3867_v37 = vpack.c.bf16 %v9220_v20, %v9220_v20  ;;  %v9264_v28 = vperm.slane %v9161_v59, %v7627_v14 }
 0xb0b   :  { %v3941_v43 = vrot.slane %v7154_v51, 4  ;;  %v3944_v53 = vsel %vm228_vm3, %v7154_v51, %v3943_v58  ;;  %v3930_v46 = vsel %vm228_vm3, %v3929_v35, %v7153_v62  ;;  %v3931_v54 = vrot.slane %v7153_v62, 4 }
 0xb0c   :  { %v3952_v26 = vperm.slane %v3944_v53, %v7615_v57  ;;  %v3936_v33 = vperm.slane %v3930_v46, %v7615_v57  ;;  %v4008_v52 = vperm.slane %v4002_v15, %v7627_v14  ;;  %v4024_v22 = vperm.slane %v4016_v12, %v7627_v14 }
 0xb0d   :  { %v3942_v7 = vsel %vm228_vm3, %v3941_v43, %v7159_v30  ;;  %v3932_v39 = vsel %vm228_vm3, %v7144_v19, %v3931_v54  ;;  %v4029_v32 = vrot.slane %v4012_v11, 4  ;;  %v7173_v17 = vunpack.i.l.bf16 %v9249_v25 }
 0xb0e   :  { %v3948_v36 = vperm.slane %v3942_v7, %v7615_v57  ;;  %v3989_v27 = vrot.slane %v3952_v26, 4  ;;  %v3940_v56 = vperm.slane %v3932_v39, %v7615_v57  ;;  %v3979_v24 = vrot.slane %v3936_v33, 4 }
 0xb0f   :  { %v4025_v18 = vrot.slane %v4008_v52, 4  ;;  %v4037_v8 = vrot.slane %v4024_v22, 4  ;;  %v9278_v35 = vsel %vm228_vm3, 0.0, %v3803_v44  ;;  %v4033_v59 = vrot.slane %v4020_v4, 4 }
 0xb10   :  { %v3977_v16 = vrot.slane %v3948_v36, 4  ;;  %v3980_v48 = vsel %vm228_vm3, %v3948_v36, %v3979_v24  ;;  %v3991_v21 = vrot.slane %v3940_v56, 4  ;;  %v3990_v45 = vsel %vm228_vm3, %v3989_v27, %v3940_v56 }
 0xb11   :  { %v3988_v47 = vperm.slane %v3980_v48, %v7627_v14  ;;  %v9256_v61 = vpop.permute.xlu1 %7161  ;;  %v3996_v13 = vperm.slane %v3990_v45, %v7627_v14  ;;  %v3868_v31 = vpack.c.bf16 %v9278_v35, %v9278_v35  ;;  %v7174_v36 = vunpack.i.h.bf16 %v9249_v25 }
 0xb12   :  { %v3978_v60 = vsel %vm228_vm3, %v3977_v16, %v3936_v33  ;;  %v3992_v50 = vsel %vm228_vm3, %v3952_v26, %v3991_v21  ;;  %v7164_v62 = vunpack.i.h.bf16 %v9256_v61  ;;  %v7163_v54 = vunpack.i.l.bf16 %v9256_v61 }
 0xb13   :  { %v3984_v1 = vperm.slane %v3978_v60, %v7627_v14  ;;  %v4000_v5 = vperm.slane %v3992_v50, %v7627_v14  ;;  %v9254_v19 = vsel %vm228_vm3, %v4029_v32, %v3988_v47  ;;  %v4031_v63 = vrot.slane %v3988_v47, 4 }
 0xb14   :  { %v4153_v30 = vrot.slane %v9254_v19, 4  ;;  %v4035_v53 = vrot.slane %v3996_v13, 4  ;;  %v3801_v26 = vrot.slane %v9242_v23, 4  ;;  %v3865_v33 = vpack.c.bf16 %v9242_v23, %v9242_v23 }
 0xb15   :  { %v9267_v34 = vsel %vm228_vm3, %v4025_v18, %v3984_v1  ;;  %v4027_v38 = vrot.slane %v3984_v1, 4  ;;  %v9270_v9 = vsel %vm228_vm3, %v4012_v11, %v4031_v63  ;;  %v9273_v29 = vsel %vm228_vm3, %v4037_v8, %v4000_v5 }
 0xb16   :  { %v4039_v51 = vrot.slane %v4000_v5, 4  ;;  %v4154_v58 = vsel %vm228_vm3, %v4153_v30, %v9267_v34  ;;  %v4165_v2 = vrot.slane %v9270_v9, 4  ;;  %v4177_v15 = vrot.slane %v9273_v29, 4 }
 0xb17   :  { %v9285_v43 = vsel %vm228_vm3, %v4008_v52, %v4027_v38  ;;  %v9298_v7 = vsel %vm228_vm3, %v4033_v59, %v3996_v13  ;;  %v4041_v52 = vrot.slane %v7164_v62, 4  ;;  %v4043_v44 = vrot.slane %v7173_v17, 4 }
 0xb18   :  { %v7167_v12 = vpop.permute.xlu0 %7166  ;;  %v9288_v46 = vsel %vm228_vm3, %v4024_v22, %v4039_v51  ;;  %v9301_v22 = vperm.slane %v4154_v58, %v7615_v57  ;;  %v4166_v56 = vsel %vm228_vm3, %v4165_v2, %v9285_v43  ;;  %v4178_v24 = vsel %vm228_vm3, %v4177_v15, %v9298_v7 }
 0xb19   :  { %v4189_v11 = vrot.slane %v9288_v46, 4  ;;  %v7168_v39 = vunpack.i.l.bf16 %v7167_v12  ;;  %v7169_v27 = vunpack.i.h.bf16 %v7167_v12  ;;  %v4065_v16 = vrot.slane %v7163_v54, 4 }
 0xb1a   :  { %v9309_v48 = vsel %vm228_vm3, %v4020_v4, %v4035_v53  ;;  %v9312_v21 = vperm.slane %v4178_v24, %v7615_v57  ;;  %v9315_v32 = vperm.slane %v4166_v56, %v7615_v57  ;;  %v4203_v45 = vrot.slane %v9301_v22, 4 }
 0xb1b   :  { %v4190_v47 = vsel %vm228_vm3, %v4189_v11, %v9309_v48  ;;  %v3807_v18 = vrot.slane %v9264_v28, 4  ;;  %v4042_v8 = vsel %vm228_vm3, %v4041_v52, %v7173_v17  ;;  %v4044_v60 = vsel %vm228_vm3, %v7164_v62, %v4043_v44 }
 0xb1c   :  { %v4066_v4 = vsel %vm228_vm3, %v4065_v16, %v7168_v39  ;;  %v3871_v50 = vpack.c.bf16 %v9264_v28, %v9264_v28  ;;  %v4053_v25 = vrot.slane %v7174_v36, 4  ;;  %v4077_v1 = vrot.slane %v7169_v27, 4 }
 0xb1d   :  { %v4067_v5 = vrot.slane %v7168_v39, 4  ;;  %v3805_v61 = vrot.slane %v9236_v49, 4  ;;  %v9328_v38 = vperm.slane %v4190_v47, %v7615_v57  ;;  %v4227_v17 = vrot.slane %v9312_v21, 4 }
 0xb1e   :  { %v4048_v51 = vperm.slane %v4042_v8, %v7615_v57  ;;  %v4052_v62 = vperm.slane %v4044_v60, %v7615_v57  ;;  %v4072_v59 = vperm.slane %v4066_v4, %v7615_v57  ;;  %v4204_v58 = vsel %vm228_vm3, %v9315_v32, %v4203_v45 }
 0xb1f   :  { %v4068_v11 = vsel %vm228_vm3, %v7163_v54, %v4067_v5  ;;  %v9342_v56 = vsel %vm228_vm3, 0.0, %v3801_v26  ;;  %v4212_v44 = vperm.slane %v4204_v58, %v7627_v14  ;;  %v4228_v16 = vsel %vm228_vm3, %v9328_v38, %v4227_v17 }
 0xb20   :  { %v7177_v63 = vpop.permute.xlu1 %7176  ;;  %v9349_v47 = vsel %vm228_vm3, 0.0, %v3807_v18  ;;  %v4091_v45 = vrot.slane %v4048_v51, 4  ;;  %v4103_v4 = vrot.slane %v4052_v62, 4  ;;  %v4076_v26 = vperm.slane %v4068_v11, %v7615_v57 }
 0xb21   :  { %v7179_v13 = vunpack.i.h.bf16 %v7177_v63  ;;  %v7178_v30 = vunpack.i.l.bf16 %v7177_v63  ;;  %v4236_v18 = vperm.slane %v4228_v16, %v7627_v14  ;;  %v4155_v58 = vrot.slane %v9267_v34, 4 }
 0xb22   :  { %v4167_v16 = vrot.slane %v9285_v43, 4 }
 0xb23   :  { %v4054_v2 = vsel %vm228_vm3, %v4053_v25, %v7179_v13  ;;  %v4055_v15 = vrot.slane %v7179_v13, 4  ;;  %v4078_v12 = vsel %vm228_vm3, %v4077_v1, %v7178_v30  ;;  %v4079_v53 = vrot.slane %v7178_v30, 4 }
 0xb24   :  { %v4060_v52 = vperm.slane %v4054_v2, %v7615_v57  ;;  %v4084_v39 = vperm.slane %v4078_v12, %v7615_v57  ;;  %v4115_v25 = vrot.slane %v4072_v59, 4  ;;  %v4201_v2 = vrot.slane %v9315_v32, 4 }
 0xb25   :  { %v4056_v24 = vsel %vm228_vm3, %v7174_v36, %v4055_v15  ;;  %v4080_v60 = vsel %vm228_vm3, %v7169_v27, %v4079_v53  ;;  %v9355_v36 = vsel %vm228_vm3, 0.0, %v3805_v61  ;;  %v4255_v27 = vrot.slane %v4212_v44, 4 }
 0xb26   :  { %v4064_v54 = vperm.slane %v4056_v24, %v7615_v57  ;;  %v4089_v8 = vrot.slane %v4060_v52, 4  ;;  %v4092_v1 = vsel %vm228_vm3, %v4060_v52, %v4091_v45  ;;  %v4113_v63 = vrot.slane %v4084_v39, 4 }
 0xb27   :  { %v4088_v17 = vperm.slane %v4080_v60, %v7615_v57  ;;  %v3866_v61 = vpack.c.bf16 %v9342_v56, %v9342_v56  ;;  %v3872_v15 = vpack.c.bf16 %v9349_v47, %v9349_v47  ;;  %v4127_v12 = vrot.slane %v4076_v26, 4 }
 0xb28   :  { %v4101_v5 = vrot.slane %v4064_v54, 4  ;;  %v4090_v13 = vsel %vm228_vm3, %v4089_v8, %v4048_v51  ;;  %v4104_v30 = vsel %vm228_vm3, %v4064_v54, %v4103_v4  ;;  %v9369_v53 = vperm.slane %v4092_v1, %v7627_v14 }
 0xb29   :  { %v4116_v51 = vsel %vm228_vm3, %v4084_v39, %v4115_v25  ;;  %v3870_v11 = vpack.c.bf16 %v9355_v36, %v9355_v36  ;;  %v4096_v52 = vperm.slane %v4090_v13, %v7627_v14  ;;  %v9377_v32 = vperm.slane %v4104_v30, %v7627_v14 }
 0xb2a   :  { %v4102_v34 = vsel %vm228_vm3, %v4101_v5, %v4052_v62  ;;  %v4114_v24 = vsel %vm228_vm3, %v4113_v63, %v4072_v59  ;;  %v4179_v45 = vrot.slane %v9298_v7, 4  ;;  %v4128_v54 = vsel %vm228_vm3, %v4088_v17, %v4127_v12 }
 0xb2b   :  { %v4256_v39 = vsel %vm228_vm3, %v4236_v18, %v4255_v27  ;;  %v4125_v8 = vrot.slane %v4088_v17, 4  ;;  %v4191_v60 = vrot.slane %v9309_v48, 4  ;;  %v4202_v4 = vsel %vm228_vm3, %v4201_v2, %v9301_v22 }
 0xb2c   :  { %v4156_v62 = vsel %vm228_vm3, %v9254_v19, %v4155_v58  ;;  %v9390_v25 = vperm.slane %v4102_v34, %v7627_v14  ;;  %v4143_v43 = vrot.slane %v9369_v53, 4  ;;  %v4120_v7 = vperm.slane %v4114_v24, %v7627_v14 }
 0xb2d   :  { %v4124_v59 = vperm.slane %v4116_v51, %v7627_v14  ;;  %v4139_v1 = vrot.slane %v4096_v52, 4  ;;  %v4151_v5 = vrot.slane %v9377_v32, 4  ;;  %v4136_v48 = vperm.slane %v4128_v54, %v7627_v14 }
 0xb2e   :  { %v4380_v63 = vpack.c.bf16 %v4256_v39, %v4256_v39  ;;  %v4208_v22 = vperm.slane %v4202_v4, %v7627_v14  ;;  %v4225_v13 = vrot.slane %v9328_v38, 4  ;;  %v4253_v19 = vrot.slane %v4236_v18, 4 }
 0xb2f   :  { %v4164_v30 = vperm.slane %v4156_v62, %v7615_v57  ;;  %v4126_v17 = vsel %vm228_vm3, %v4125_v8, %v4076_v26  ;;  %v4168_v58 = vsel %vm228_vm3, %v9270_v9, %v4167_v16  ;;  %v4180_v2 = vsel %vm228_vm3, %v9273_v29, %v4179_v45 }
 0xb30   :  { %v4962_v27 = vsel %vm71_vm1, %v4380_v63, 0  ;;  %v4226_v12 = vsel %vm228_vm3, %v4225_v13, %v9312_v21  ;;  %v4251_v51 = vrot.slane %v4208_v22, 4  ;;  %v4254_v38 = vsel %vm228_vm3, %v4253_v19, %v4212_v44 }
 0xb31   :  { %4971 = vmatpush.bf16.xpose.msra.mxu2 %v4962_v27  ;;  %v4176_v18 = vperm.slane %v4168_v58, %v7615_v57  ;;  %v4232_v34 = vperm.slane %v4226_v12, %v7627_v14  ;;  %v4379_v26 = vpack.c.bf16 %v4254_v38, %v4254_v38  ;;  %v4188_v24 = vperm.slane %v4180_v2, %v7615_v57 }
 0xb32   :  { %v4192_v9 = vsel %vm228_vm3, %v9288_v46, %v4191_v60  ;;  %v4137_v16 = vrot.slane %v4120_v7, 4  ;;  %v4141_v54 = vrot.slane %v4124_v59, 4  ;;  %v4215_v45 = vrot.slane %v4164_v30, 4 }
 0xb33   :  { %v4200_v29 = vperm.slane %v4192_v9, %v7615_v57  ;;  %v4132_v21 = vperm.slane %v4126_v17, %v7627_v14  ;;  %v4252_v39 = vsel %vm228_vm3, %v4232_v34, %v4251_v51  ;;  %v4943_v44 = vsel %vm71_vm1, %v4379_v26, 0 }
 0xb34   :  { %v4239_v8 = vrot.slane %v4188_v24, 4  ;;  %v4149_v4 = vrot.slane %v4136_v48, 4  ;;  %v4378_v62 = vpack.c.bf16 %v4252_v39, %v4252_v39  ;;  %4952 = vmatpush.bf16.xpose.msra.mxu1 %v4943_v44  ;;  %v4216_v63 = vsel %vm228_vm3, %v4176_v18, %v4215_v45 }
 0xb35   :  { %v4249_v13 = vrot.slane %v4232_v34, 4  ;;  %v4144_v46 = vsel %vm228_vm3, %v4124_v59, %v4143_v43  ;;  %v4224_v60 = vperm.slane %v4216_v63, %v7627_v14  ;;  %v9424_v17 = vperm.slane %v9196_v41, %v7627_v14 }
 0xb36   :  { %v4240_v19 = vsel %vm228_vm3, %v4200_v29, %v4239_v8  ;;  %v4147_v27 = vrot.slane %v9390_v25, 4  ;;  %v4140_v58 = vsel %vm228_vm3, %v4120_v7, %v4139_v1  ;;  %v4924_v2 = vsel %vm71_vm1, %v4378_v62, 0 }
 0xb37   :  { %v4248_v12 = vperm.slane %v4240_v19, %v7627_v14  ;;  %v4138_v51 = vsel %vm228_vm3, %v4137_v16, %v4096_v52  ;;  %v4142_v43 = vsel %vm228_vm3, %v4141_v54, %v9369_v53  ;;  %v9434_v59 = vsel %vm228_vm3, %v4136_v48, %v4151_v5  ;;  %4933 = vmatpush.bf16.xpose.msra.mxu3 %v4924_v2 }
 0xb38   :  { %v4263_v38 = vrot.slane %v4224_v60, 4  ;;  %6742 = vmatmul.msk.bf16.vlgmr.msra.gmra.mxu2 %vm71_vm1, %v3868_v31  ;;  %v4145_v41 = vrot.slane %v4132_v21, 4  ;;  %v9442_v7 = vsel %vm228_vm3, %v4149_v4, %v9377_v32  ;;  %v4250_v52 = vsel %vm228_vm3, %v4249_v13, %v4208_v22 }
 0xb39   :  { %v4261_v1 = vrot.slane %v4248_v12, 4  ;;  %v4277_v34 = vrot.slane %v4144_v46, 4  ;;  %v4279_v53 = vrot.slane %v4140_v58, 4  ;;  %v4377_v48 = vpack.c.bf16 %v4250_v52, %v4250_v52 }
 0xb3a   :  { %v4264_v5 = vsel %vm228_vm3, %v4248_v12, %v4263_v38  ;;  %v4265_v26 = vrot.slane %v4142_v43, 4  ;;  %v4213_v35 = vrot.slane %v4176_v18, 4  ;;  %v4289_v31 = vrot.slane %v9442_v7, 4 }
 0xb3b   :  { %v4384_v9 = vpack.c.bf16 %v4264_v5, %v4264_v5  ;;  %v4262_v16 = vsel %vm228_vm3, %v4261_v1, %v4224_v60  ;;  %v4905_v45 = vsel %vm71_vm1, %v4377_v48, 0  ;;  %v4237_v32 = vrot.slane %v4200_v29, 4  ;;  %6741 = vmatmul.msk.bf16.vlgmr.msra.gmra.mxu1 %vm71_vm1, %v3867_v37 }
 0xb3c   :  { %v4383_v54 = vpack.c.bf16 %v4262_v16, %v4262_v16  ;;  %v4301_v22 = vrot.slane %v9434_v59, 4  ;;  %4914 = vmatpush.bf16.xpose.msra.mxu0 %v4905_v45  ;;  %v4214_v44 = vsel %vm228_vm3, %v4213_v35, %v4164_v30  ;;  %v4146_v18 = vsel %vm228_vm3, %v4145_v41, %v9390_v25 }
 0xb3d   :  { %v5038_v39 = vsel %vm71_vm1, %v4384_v9, 0  ;;  %v4280_v8 = vsel %vm228_vm3, %v4144_v46, %v4279_v53  ;;  %v4220_v4 = vperm.slane %v4214_v44, %v7627_v14  ;;  %v4238_v20 = vsel %vm228_vm3, %v4237_v32, %v4188_v24 }
 0xb3e   :  { %5047 = vmatpush.bf16.xpose.msrb.mxu2 %v5038_v39  ;;  %v5019_v29 = vsel %vm71_vm1, %v4383_v54, 0  ;;  %v4267_v37 = vrot.slane %v4138_v51, 4  ;;  %v4244_v62 = vperm.slane %v4238_v20, %v7627_v14  ;;  %6740 = vmatmul.msk.bf16.vlgmr.msra.gmra.mxu3 %vm71_vm1, %v3866_v61  ;;  %v4148_v25 = vsel %vm228_vm3, %v4132_v21, %v4147_v27 }
 0xb3f   :  { %5028 = vmatpush.bf16.xpose.msrb.mxu1 %v5019_v29  ;;  %v4266_v30 = vsel %vm228_vm3, %v4265_v26, %v4138_v51  ;;  %v4259_v63 = vrot.slane %v4220_v4, 4  ;;  %v4278_v46 = vsel %vm228_vm3, %v4277_v34, %v4140_v58  ;;  %v4290_v24 = vsel %vm228_vm3, %v4289_v31, %v4146_v18 }
 0xb40   :  { %v4272_v13 = vperm.slane %v4266_v30, %v7615_v57  ;;  %v4257_v60 = vrot.slane %v4244_v62, 4  ;;  %v4284_v19 = vperm.slane %v4278_v46, %v7615_v57  ;;  %v4291_v2 = vrot.slane %v4146_v18, 4 }
 0xb41   :  { %v4296_v12 = vperm.slane %v4290_v24, %v7615_v57  ;;  %v4260_v56 = vsel %vm228_vm3, %v4244_v62, %v4259_v63  ;;  %v4302_v61 = vsel %vm228_vm3, %v4301_v22, %v4148_v25  ;;  %v4303_v21 = vrot.slane %v4148_v25, 4 }
 0xb42   :  { %v4315_v27 = vrot.slane %v4272_v13, 4  ;;  %v4382_v51 = vpack.c.bf16 %v4260_v56, %v4260_v56  ;;  %v4258_v38 = vsel %vm228_vm3, %v4257_v60, %v4220_v4  ;;  %v4308_v41 = vperm.slane %v4302_v61, %v7615_v57 }
 0xb43   :  { %v4313_v58 = vrot.slane %v4284_v19, 4  ;;  %v4381_v1 = vpack.c.bf16 %v4258_v38, %v4258_v38  ;;  %6739 = vmatmul.msk.bf16.vlgmr.msra.gmra.mxu0 %vm71_vm1, %v3865_v33  ;;  %v4339_v34 = vrot.slane %v4296_v12, 4  ;;  %v4268_v53 = vsel %vm228_vm3, %v4142_v43, %v4267_v37 }
 0xb44   :  { %v4316_v52 = vsel %vm228_vm3, %v4284_v19, %v4315_v27  ;;  %v5000_v5 = vsel %vm71_vm1, %v4382_v51, 0  ;;  %v4337_v26 = vrot.slane %v4308_v41, 4  ;;  %v4276_v33 = vperm.slane %v4268_v53, %v7615_v57 }
 0xb45   :  { %v4314_v48 = vsel %vm228_vm3, %v4313_v58, %v4272_v13  ;;  %v4324_v9 = vperm.slane %v4316_v52, %v7627_v14  ;;  %5009 = vmatpush.bf16.xpose.msrb.mxu3 %v5000_v5  ;;  %v4981_v16 = vsel %vm71_vm1, %v4381_v1, 0  ;;  %v4340_v23 = vsel %vm228_vm3, %v4308_v41, %v4339_v34 }
 0xb46   :  { %v4320_v35 = vperm.slane %v4314_v48, %v7627_v14  ;;  %4990 = vmatpush.bf16.xpose.msrb.mxu0 %v4981_v16  ;;  %v4338_v31 = vsel %vm228_vm3, %v4337_v26, %v4296_v12  ;;  %v4348_v43 = vperm.slane %v4340_v23, %v7627_v14  ;;  %v4288_v45 = vperm.slane %v4280_v8, %v7615_v57 }
 0xb47   :  { %v4367_v54 = vrot.slane %v4324_v9, 4  ;;  %v4344_v32 = vperm.slane %v4338_v31, %v7627_v14  ;;  %v4292_v39 = vsel %vm228_vm3, %v9442_v7, %v4291_v2  ;;  %v4304_v44 = vsel %vm228_vm3, %v9434_v59, %v4303_v21 }
 0xb48   :  { %6746 = vmatmul.msk.bf16.vlgmr.msrb.gmra.mxu2 %vm71_vm1, %v3872_v15  ;;  %v4363_v22 = vrot.slane %v4320_v35, 4  ;;  %v4365_v29 = vrot.slane %v4348_v43, 4  ;;  %v4300_v4 = vperm.slane %v4292_v39, %v7615_v57  ;;  %v4312_v8 = vperm.slane %v4304_v44, %v7615_v57 }
 0xb49   :  { %v4368_v18 = vsel %vm228_vm3, %v4348_v43, %v4367_v54  ;;  %v4361_v15 = vrot.slane %v4344_v32, 4  ;;  %v4325_v37 = vrot.slane %v4288_v45, 4  ;;  %v4327_v7 = vrot.slane %v4276_v33, 4 }
 0xb4a   :  { %v4364_v47 = vsel %vm228_vm3, %v4344_v32, %v4363_v22  ;;  %v4388_v20 = vpack.c.bf16 %v4368_v18, %v4368_v18  ;;  %v4366_v25 = vsel %vm228_vm3, %v4365_v29, %v4324_v9  ;;  %v4349_v30 = vrot.slane %v4312_v8, 4 }
 0xb4b   :  { %v4386_v62 = vpack.c.bf16 %v4364_v47, %v4364_v47  ;;  %6745 = vmatmul.msk.bf16.vlgmr.msrb.gmra.mxu1 %vm71_vm1, %v3871_v50  ;;  %v4362_v59 = vsel %vm228_vm3, %v4361_v15, %v4320_v35  ;;  %v4387_v13 = vpack.c.bf16 %v4366_v25, %v4366_v25  ;;  %v4326_v46 = vsel %vm228_vm3, %v4325_v37, %v4276_v33 }
 0xb4c   :  { %v5114_v63 = vsel %vm71_vm1, %v4388_v20, 0  ;;  %v4385_v60 = vpack.c.bf16 %v4362_v59, %v4362_v59  ;;  %v4332_v19 = vperm.slane %v4326_v46, %v7627_v14  ;;  %v4350_v2 = vsel %vm228_vm3, %v4349_v30, %v4300_v4 }
 0xb4d   :  { %v5076_v24 = vsel %vm71_vm1, %v4386_v62, 0  ;;  %5123 = vmatpush.bf16.xpose.msra.mxu2 %v5114_v63  ;;  %v5095_v12 = vsel %vm71_vm1, %v4387_v13, 0  ;;  %v4356_v28 = vperm.slane %v4350_v2, %v7627_v14  ;;  %v4328_v50 = vsel %vm228_vm3, %v4288_v45, %v4327_v7 }
 0xb4e   :  { %5085 = vmatpush.bf16.xpose.msra.mxu3 %v5076_v24  ;;  %v4351_v56 = vrot.slane %v4300_v4, 4  ;;  %v5057_v61 = vsel %vm71_vm1, %v4385_v60, 0  ;;  %5104 = vmatpush.bf16.xpose.msra.mxu1 %v5095_v12  ;;  %v4371_v21 = vrot.slane %v4332_v19, 4  ;;  %v4336_v27 = vperm.slane %v4328_v50, %v7627_v14 }
 0xb4f   :  { %6744 = vmatmul.msk.bf16.vlgmr.msrb.gmra.mxu3 %vm71_vm1, %v3870_v11  ;;  %v3859_v51 = vrot.slane %v9424_v17, 4  ;;  %5066 = vmatpush.bf16.xpose.msra.mxu0 %v5057_v61  ;;  %v4369_v41 = vrot.slane %v4356_v28, 4  ;;  %v3869_v11 = vpack.c.bf16 %v9236_v49, %v9236_v49  ;;  %v3840_v53 = vperm.slane %v9199_v42, %v7627_v14 }
 0xb50   :  { %v4352_v38 = vsel %vm228_vm3, %v4312_v8, %v4351_v56  ;;  %v4372_v58 = vsel %vm228_vm3, %v4356_v28, %v4371_v21  ;;  %v4375_v52 = vrot.slane %v4336_v27, 4  ;;  %v3875_v32 = vpack.c.bf16 %v9424_v17, %v9424_v17 }
 0xb51   :  { %v4360_v1 = vperm.slane %v4352_v38, %v7627_v14  ;;  %v4390_v36 = vpack.c.bf16 %v4372_v58, %v4372_v58  ;;  %v4370_v34 = vsel %vm228_vm3, %v4369_v41, %v4332_v19  ;;  %v3860_v9 = vsel %vm228_vm3, 0.0, %v3859_v51 }
 0xb52   :  { %v4389_v48 = vpack.c.bf16 %v4370_v34, %v4370_v34  ;;  %v3876_v31 = vpack.c.bf16 %v3860_v9, %v3860_v9  ;;  %v3857_v43 = vrot.slane %v3840_v53, 4  ;;  %v3856_v22 = vperm.slane %v9202_v0, %v7627_v14 }
 0xb53   :  { %v4376_v5 = vsel %vm228_vm3, %v4360_v1, %v4375_v52  ;;  %v4373_v26 = vrot.slane %v4360_v1, 4  ;;  %v5152_v16 = vsel %vm71_vm1, %v4390_v36, 0  ;;  %6743 = vmatmul.msk.bf16.vlgmr.msrb.gmra.mxu0 %vm71_vm1, %v3869_v11  ;;  %v3873_v18 = vpack.c.bf16 %v3840_v53, %v3840_v53 }
 0xb54   :  { %v4392_v35 = vpack.c.bf16 %v4376_v5, %v4376_v5  ;;  %v5133_v23 = vsel %vm71_vm1, %v4389_v48, 0  ;;  %v3858_v45 = vsel %vm228_vm3, 0.0, %v3857_v43  ;;  %v3863_v44 = vrot.slane %v3856_v22, 4 }
 0xb55   :  { %v4374_v49 = vsel %vm228_vm3, %v4373_v26, %v4336_v27  ;;  %v3874_v39 = vpack.c.bf16 %v3858_v45, %v3858_v45  ;;  %v3852_v29 = vperm.slane %v9205_v6, %v7627_v14  ;;  %v3879_v17 = vpack.c.bf16 %v3856_v22, %v3856_v22 }
 0xb56   :  { %5161 = vmatpush.bf16.xpose.msrb.mxu3 %v5152_v16  ;;  %v5190_v33 = vsel %vm71_vm1, %v4392_v35, 0  ;;  %v4391_v42 = vpack.c.bf16 %v4374_v49, %v4374_v49  ;;  %v3864_v4 = vsel %vm228_vm3, 0.0, %v3863_v44 }
 0xb57   :  { %5142 = vmatpush.bf16.xpose.msrb.mxu0 %v5133_v23  ;;  %5199 = vmatpush.bf16.xpose.msrb.mxu2 %v5190_v33  ;;  %v3880_v8 = vpack.c.bf16 %v3864_v4, %v3864_v4  ;;  %v3861_v47 = vrot.slane %v3852_v29, 4  ;;  %v3877_v15 = vpack.c.bf16 %v3852_v29, %v3852_v29 }
 0xb58   :  { %v5171_v54 = vsel %vm71_vm1, %v4391_v42, 0  ;;  %6750 = vmatmul.msk.bf16.vlgmr.msra.gmra.mxu2 %vm71_vm1, %v3876_v31 }
 0xb59   :  { %5180 = vmatpush.bf16.xpose.msrb.mxu1 %v5171_v54  ;;  %v3862_v0 = vsel %vm228_vm3, 0.0, %v3861_v47 }
 0xb5a   :  { %v3878_v20 = vpack.c.bf16 %v3862_v0, %v3862_v0 }
 0xb5b   :  { %6749 = vmatmul.msk.bf16.vlgmr.msra.gmra.mxu1 %vm71_vm1, %v3875_v32 }
 0xb5f   :  { %6748 = vmatmul.msk.bf16.vlgmr.msra.gmra.mxu3 %vm71_vm1, %v3874_v39 }
 0xb63   :  { %6747 = vmatmul.msk.bf16.vlgmr.msra.gmra.mxu0 %vm71_vm1, %v3873_v18 }
 0xb68   :  { %6754 = vmatmul.msk.bf16.vlgmr.msrb.gmra.mxu2 %vm71_vm1, %v3880_v8 }
 0xb6b   :  { %6753 = vmatmul.msk.bf16.vlgmr.msrb.gmra.mxu1 %vm71_vm1, %v3879_v17 }
 0xb6f   :  { %6752 = vmatmul.msk.bf16.vlgmr.msrb.gmra.mxu3 %vm71_vm1, %v3878_v20 }
 0xb73   :  { %6751 = vmatmul.msk.bf16.vlgmr.msrb.gmra.mxu0 %vm71_vm1, %v3877_v15 }
 0xbb8   :  { %v4954_v6 = vpop.f32.mrf.mxu1 }
 0xbb9   :  { %v9561_v37 = vmul.f32 0.35355338, %v4954_v6 }
 0xbbb   :  { %v4973_v62 = vpop.f32.mrf.mxu2  ;;  %v5228_v25 = vsel %vm5221_vm11, %v9561_v37, -inf }
 0xbbc   :  { %5229 = vmax.xlane.f32.xlu1 %v5228_v25  ;;  %v9573_v19 = vmul.f32 0.35355338, %v4973_v62 }
 0xbbe   :  { %v5231_v56 = vsel %vm5221_vm11, %v9573_v19, -inf }
 0xbc0   :  { %v4916_v30 = vpop.f32.mrf.mxu0  ;;  %v4956_v7 = vpop.f32.mrf.mxu1 }
 0xbc1   :  { %v9565_v63 = vmul.f32 0.35355338, %v4916_v30  ;;  %v4935_v59 = vpop.f32.mrf.mxu3 }
 0xbc2   :  { %v9567_v13 = vmul.f32 0.35355338, %v4935_v59  ;;  %v9631_v59 = vpop.permute.xlu1 %7181 }
 0xbc3   :  { %v4975_v46 = vpop.f32.mrf.mxu2  ;;  %v5222_v24 = vsel %vm5221_vm11, %v9565_v63, -inf }
 0xbc4   :  { %5223 = vmax.xlane.f32.xlu0 %v5222_v24  ;;  %v5225_v60 = vsel %vm5221_vm11, %v9567_v13, -inf  ;;  %v9633_v46 = vpop.permute.xlu0 %7191  ;;  %v9635_v24 = vpop.permute.xlu2 %7186 }
 0xbc5   :  { %5226 = vmax.xlane.f32.xlu2 %v5225_v60 }
 0xbc8   :  { %v4918_v2 = vpop.f32.mrf.mxu0  ;;  %v5030_v12 = vpop.f32.mrf.mxu1 }
 0xbc9   :  { %v4937_v28 = vpop.f32.mrf.mxu3  ;;  %v9577_v61 = vmul.f32 0.35355338, %v5030_v12 }
 0xbca   :  { %v9637_v60 = vpop.permute.xlu1 %7196 }
 0xbcb   :  { %v5049_v50 = vpop.f32.mrf.mxu2  ;;  %v5240_v1 = vsel %vm5221_vm11, %v9577_v61, -inf }
 0xbcc   :  { %5232 = vmax.xlane.f32.xlu0 %v5231_v56  ;;  %v9589_v11 = vmul.f32 0.35355338, %v5049_v50 }
 0xbce   :  { %v5243_v26 = vsel %vm5221_vm11, %v9589_v11, -inf }
 0xbd0   :  { %v4992_v21 = vpop.f32.mrf.mxu0  ;;  %v5032_v27 = vpop.f32.mrf.mxu1 }
 0xbd1   :  { %v9579_v51 = vmul.f32 0.35355338, %v4992_v21 }
 0xbd2   :  { %v5011_v38 = vpop.f32.mrf.mxu3 }
 0xbd3   :  { %v9581_v41 = vmul.f32 0.35355338, %v5011_v38  ;;  %v5051_v58 = vpop.f32.mrf.mxu2  ;;  %v5234_v52 = vsel %vm5221_vm11, %v9579_v51, -inf }
 0xbd4   :  { %5241 = vmax.xlane.f32.xlu0 %v5240_v1  ;;  %5235 = vmax.xlane.f32.xlu2 %v5234_v52 }
 0xbd5   :  { %v5237_v36 = vsel %vm5221_vm11, %v9581_v41, -inf }
 0xbd6   :  { %5238 = vmax.xlane.f32.xlu1 %v5237_v36 }
 0xbd8   :  { %v4994_v34 = vpop.f32.mrf.mxu0  ;;  %v5106_v53 = vpop.f32.mrf.mxu1 }
 0xbd9   :  { %v9611_v0 = vmul.f32 0.35355338, %v5106_v53 }
 0xbda   :  { %v5013_v5 = vpop.f32.mrf.mxu3 }
 0xbdb   :  { %v5125_v48 = vpop.f32.mrf.mxu2 }
 0xbdc   :  { %5244 = vmax.xlane.f32.xlu2 %v5243_v26  ;;  %v9613_v17 = vmul.f32 0.35355338, %v5125_v48 }
 0xbde   :  { %v5255_v20 = vsel %vm5221_vm11, %v9613_v17, -inf }
 0xbe0   :  { %v5068_v9 = vpop.f32.mrf.mxu0  ;;  %v5108_v16 = vpop.f32.mrf.mxu1 }
 0xbe1   :  { %v9621_v6 = vmul.f32 0.35355338, %v5068_v9 }
 0xbe2   :  { %v5087_v35 = vpop.f32.mrf.mxu3 }
 0xbe3   :  { %v9593_v23 = vmul.f32 0.35355338, %v5087_v35  ;;  %v5127_v49 = vpop.f32.mrf.mxu2  ;;  %v5246_v25 = vsel %vm5221_vm11, %v9621_v6, -inf  ;;  %v7184_v35 = vunpack.i.h.bf16 %v9631_v59 }
 0xbe5   :  { %v5249_v33 = vsel %vm5221_vm11, %v9593_v23, -inf }
 0xbe6   :  { %5250 = vmax.xlane.f32.xlu2 %v5249_v33 }
 0xbe8   :  { %7206 = vrot.lane.b32.xlu0 %v9127_v3, %s7394_s27  ;;  %v5070_v42 = vpop.f32.mrf.mxu0  ;;  %v5182_v31 = vpop.f32.mrf.mxu1  ;;  %s10274_s27 = smov 32  }
 0xbe9   :  { %v9627_v30 = vmul.f32 0.35355338, %v5182_v31 }
 0xbea   :  { %v5089_v43 = vpop.f32.mrf.mxu3 }
 0xbeb   :  { %v5201_v54 = vpop.f32.mrf.mxu2  ;;  %v5264_v7 = vsel %vm5221_vm11, %v9627_v30, -inf  ;;  %v7194_v43 = vunpack.i.h.bf16 %v9633_v46 }
 0xbec   :  { %v9599_v45 = vmul.f32 0.35355338, %v5201_v54  ;;  %v7183_v54 = vunpack.i.l.bf16 %v9631_v59 }
 0xbee   :  { %v5267_v32 = vsel %vm5221_vm11, %v9599_v45, -inf }
 0xbef   :  { %7201 = vrot.lane.b32.xlu1 %v9127_v3, %s10272_s5  ;;  %5268 = vmax.xlane.f32.xlu2 %v5267_v32  ;;  %v5252_v3 = vsel %vm5221_vm11, %v9611_v0, -inf }
 0xbf0   :  { %4395 = vrot.lane.b32.xlu0 %v9120_v40, %s7396_s29  ;;  %v5144_v22 = vpop.f32.mrf.mxu0  ;;  %v5184_v39 = vpop.f32.mrf.mxu1 }
 0xbf1   :  { %v9619_v15 = vmul.f32 0.35355338, %v5144_v22  ;;  %v4573_v22 = vrot.slane %v7184_v35, 4 }
 0xbf2   :  { %v5163_v44 = vpop.f32.mrf.mxu3 }
 0xbf3   :  { %v9607_v18 = vmul.f32 0.35355338, %v5163_v44  ;;  %v5203_v29 = vpop.f32.mrf.mxu2  ;;  %v5258_v62 = vsel %vm5221_vm11, %v9619_v15, -inf }
 0xbf4   :  { %v4575_v29 = vrot.slane %v7194_v43, 4 }
 0xbf5   :  { %v5261_v4 = vsel %vm5221_vm11, %v9607_v18, -inf }
 0xbf7   :  { %5262 = vmax.xlane.f32.xlu2 %v5261_v4  ;;  %v7193_v4 = vunpack.i.l.bf16 %v9633_v46 }
 0xbf8   :  { %v5146_v8 = vpop.f32.mrf.mxu0 }
 0xbf9   :  { %v4463_v46 = vrot.slane %v7193_v4, 4 }
 0xbfa   :  { %v5165_v47 = vpop.f32.mrf.mxu3 }
 0xbfb   :  { %v7199_v47 = vunpack.i.h.bf16 %v9637_v60 }
 0xc19   :  { %5253 = vmax.xlane.f32.xlu1 %v5252_v3  ;;  %v4574_v3 = vsel %vm228_vm3, %v4573_v22, %v7194_v43 }
 0xc1a   :  { %5256 = vmax.xlane.f32.xlu0 %v5255_v20  ;;  %v4576_v20 = vsel %vm228_vm3, %v7184_v35, %v4575_v29 }
 0xc21   :  { %5259 = vmax.xlane.f32.xlu1 %v5258_v62  ;;  %v7188_v62 = vunpack.i.l.bf16 %v9635_v24 }
 0xc22   :  { %5247 = vmax.xlane.f32.xlu0 %v5246_v25  ;;  %v7198_v25 = vunpack.i.l.bf16 %v9637_v60 }
 0xc29   :  { %5265 = vmax.xlane.f32.xlu1 %v5264_v7 }
 0xc2f   :  { %v5230_v27 = vpop.xlane.xlu1 %5229 }
 0xc30   :  { %v5272_v52 = vsub.f32 %v9561_v37, %v5230_v27 }
 0xc32   :  { %v5290_v53 = vmul.f32 1.442695, %v5272_v52 }
 0xc37   :  { %v5224_v2 = vpop.xlane.xlu0 %5223 }
 0xc38   :  { %v5270_v12 = vsub.f32 %v9565_v63, %v5224_v2  ;;  %v5227_v28 = vpop.xlane.xlu2 %5226 }
 0xc39   :  { %v5271_v50 = vsub.f32 %v9567_v13, %v5227_v28 }
 0xc3a   :  { %v5286_v56 = vmul.f32 1.442695, %v5270_v12 }
 0xc3b   :  { %v5288_v21 = vmul.f32 1.442695, %v5271_v50  ;;  %v4580_v50 = vperm.slane %v4574_v3, %v7615_v57 }
 0xc3c   :  { %7300 = vpow2.f32 %v5286_v56  ;;  %v4584_v56 = vperm.slane %v4576_v20, %v7615_v57 }
 0xc3d   :  { %7302 = vpow2.f32 %v5288_v21  ;;  %v4585_v21 = vrot.slane %v7199_v47, 4 }
 0xc3e   :  { %v4635_v35 = vrot.slane %v4584_v56, 4 }
 0xc3f   :  { %v5233_v38 = vpop.xlane.xlu0 %5232 }
 0xc40   :  { %v5273_v58 = vsub.f32 %v9573_v19, %v5233_v38 }
 0xc42   :  { %v9642_v1 = vpop.eup %7300  ;;  %v5292_v36 = vmul.f32 1.442695, %v5273_v58 }
 0xc43   :  { %v9645_v34 = vpop.eup %7302  ;;  %v5318_v63 = vsel %vm5221_vm11, %v9642_v1, 0.0 }
 0xc44   :  { %7304 = vpow2.f32 %v5292_v36  ;;  %5319 = vadd.xlane.f32.xlu1 %v5318_v63  ;;  %v5321_v13 = vsel %vm5221_vm11, %v9645_v34, 0.0  ;;  %v4437_v36 = vrot.slane %v7188_v62, 4  ;;  %v4464_v63 = vsel %vm228_vm3, %v7183_v54, %v4463_v46 }
 0xc45   :  { %5322 = vadd.xlane.f32.xlu0 %v5321_v13  ;;  %7306 = vpow2.f32 %v5290_v53  ;;  %v4473_v13 = vrot.slane %v7198_v25, 4  ;;  %v4472_v22 = vperm.slane %v4464_v63, %v7615_v57 }
 0xc46   :  { %v4438_v3 = vsel %vm228_vm3, %v4437_v36, %v9120_v40 }
 0xc47   :  { %v5236_v5 = vpop.xlane.xlu2 %5235  ;;  %v5242_v49 = vpop.xlane.xlu0 %5241 }
 0xc48   :  { %v5274_v37 = vsub.f32 %v9579_v51, %v5236_v5  ;;  %v5276_v51 = vsub.f32 %v9577_v61, %v5242_v49 }
 0xc49   :  { %v5239_v48 = vpop.xlane.xlu1 %5238 }
 0xc4a   :  { %v5275_v19 = vsub.f32 %v9581_v41, %v5239_v48  ;;  %v9652_v26 = vpop.eup %7304  ;;  %v5294_v33 = vmul.f32 1.442695, %v5274_v37  ;;  %v5298_v61 = vmul.f32 1.442695, %v5276_v51  ;;  %v4623_v37 = vrot.slane %v4580_v50, 4 }
 0xc4b   :  { %v5327_v16 = vsel %vm5221_vm11, %v9652_v26, 0.0  ;;  %v9658_v31 = vpop.eup %7306 }
 0xc4c   :  { %v5296_v9 = vmul.f32 1.442695, %v5275_v19  ;;  %5328 = vadd.xlane.f32.xlu2 %v5327_v16  ;;  %v5324_v39 = vsel %vm5221_vm11, %v9658_v31, 0.0 }
 0xc4e   :  { %7308 = vpow2.f32 %v5296_v9 }
 0xc4f   :  { %v5245_v42 = vpop.xlane.xlu2 %5244  ;;  %7310 = vpow2.f32 %v5294_v33 }
 0xc50   :  { %v5277_v41 = vsub.f32 %v9589_v11, %v5245_v42  ;;  %v4461_v11 = vrot.slane %v7183_v54, 4 }
 0xc52   :  { %v5300_v32 = vmul.f32 1.442695, %v5277_v41  ;;  %v4462_v2 = vsel %vm228_vm3, %v4461_v11, %v7193_v4 }
 0xc53   :  { %v4468_v19 = vperm.slane %v4462_v2, %v7615_v57  ;;  %v4523_v2 = vrot.slane %v4472_v22, 4 }
 0xc54   :  { %v9666_v44 = vpop.eup %7308  ;;  %7312 = vpow2.f32 %v5300_v32  ;;  %5325 = vadd.xlane.f32.xlu2 %v5324_v39  ;;  %v4439_v32 = vrot.slane %v9120_v40, 4 }
 0xc55   :  { %v5333_v8 = vsel %vm5221_vm11, %v9666_v44, 0.0  ;;  %v9676_v59 = vpop.eup %7310  ;;  %7314 = vpow2.f32 %v5298_v61  ;;  %v4511_v20 = vrot.slane %v4468_v19, 4 }
 0xc56   :  { %5334 = vadd.xlane.f32.xlu1 %v5333_v8  ;;  %v5330_v48 = vsel %vm5221_vm11, %v9676_v59, 0.0  ;;  %v4440_v8 = vsel %vm228_vm3, %v7188_v62, %v4439_v32 }
 0xc57   :  { %v4448_v40 = vperm.slane %v4440_v8, %v7615_v57 }
 0xc59   :  { %v5251_v7 = vpop.xlane.xlu2 %5250 }
 0xc5a   :  { %v5279_v12 = vsub.f32 %v9593_v23, %v5251_v7  ;;  %v9680_v28 = vpop.eup %7312  ;;  %v7207_v27 = vpop.permute.xlu0 %7206 }
 0xc5b   :  { %v7209_v38 = vunpack.i.h.bf16 %v7207_v27  ;;  %v7208_v58 = vunpack.i.l.bf16 %v7207_v27  ;;  %v5339_v52 = vsel %vm5221_vm11, %v9680_v28, 0.0  ;;  %v9695_v42 = vpop.eup %7314 }
 0xc5c   :  { %v5304_v60 = vmul.f32 1.442695, %v5279_v12  ;;  %5340 = vadd.xlane.f32.xlu0 %v5339_v52  ;;  %v5336_v61 = vsel %vm5221_vm11, %v9695_v42, 0.0 }
 0xc5d   :  { %v4586_v23 = vsel %vm228_vm3, %v4585_v21, %v7209_v38  ;;  %v4587_v53 = vrot.slane %v7209_v38, 4  ;;  %v4475_v5 = vrot.slane %v7208_v58, 4  ;;  %v4474_v16 = vsel %vm228_vm3, %v4473_v13, %v7208_v58 }
 0xc5e   :  { %v4592_v9 = vperm.slane %v4586_v23, %v7615_v57  ;;  %5331 = vadd.xlane.f32.xlu1 %v5330_v48  ;;  %7316 = vpow2.f32 %v5304_v60  ;;  %v4480_v39 = vperm.slane %v4474_v16, %v7615_v57  ;;  %v4444_v38 = vperm.slane %v4438_v3, %v7615_v57 }
 0xc5f   :  { %v4588_v49 = vsel %vm228_vm3, %v7199_v47, %v4587_v53  ;;  %v4476_v33 = vsel %vm228_vm3, %v7198_v25, %v4475_v5 }
 0xc60   :  { %v4596_v41 = vperm.slane %v4588_v49, %v7615_v57  ;;  %v4621_v43 = vrot.slane %v4592_v9, 4  ;;  %v9699_v54 = vsel %vm228_vm3, %v4592_v9, %v4623_v37  ;;  %v4484_v51 = vperm.slane %v4476_v33, %v7615_v57 }
 0xc61   :  { %v4509_v12 = vrot.slane %v4480_v39, 4  ;;  %v4512_v21 = vsel %vm228_vm3, %v4480_v39, %v4511_v20  ;;  %v4499_v37 = vrot.slane %v4448_v40, 4 }
 0xc62   :  { %v9706_v29 = vsel %vm228_vm3, %v4621_v43, %v4580_v50  ;;  %v4633_v4 = vrot.slane %v4596_v41, 4  ;;  %v9709_v11 = vsel %vm228_vm3, %v4596_v41, %v4635_v35  ;;  %v4396_v47 = vpop.permute.xlu0 %4395  ;;  %v4521_v7 = vrot.slane %v4484_v51, 4  ;;  %v9721_v50 = vpop.permute.xlu1 %7201 }
 0xc63   :  { %v5269_v62 = vpop.xlane.xlu2 %5268  ;;  %v4451_v27 = vrot.slane %v4396_v47, 4  ;;  %v4524_v58 = vsel %vm228_vm3, %v4484_v51, %v4523_v2  ;;  %v7203_v60 = vunpack.i.l.bf16 %v9721_v50  ;;  %v4510_v63 = vsel %vm228_vm3, %v4509_v12, %v4468_v19 }
 0xc64   :  { %v9717_v25 = vsel %vm228_vm3, %v4633_v4, %v4584_v56  ;;  %5337 = vadd.xlane.f32.xlu0 %v5336_v61  ;;  %v9719_v46 = vpop.eup %7316  ;;  %v4522_v56 = vsel %vm228_vm3, %v4521_v7, %v4472_v22  ;;  %v5285_v36 = vsub.f32 %v9599_v45, %v5269_v62  ;;  %v4520_v13 = vperm.slane %v4512_v21, %v7627_v14 }
 0xc65   :  { %v5345_v52 = vsel %vm5221_vm11, %v9719_v46, 0.0  ;;  %v4532_v23 = vperm.slane %v4524_v58, %v7627_v14  ;;  %v4449_v53 = vrot.slane %v7203_v60, 4  ;;  %v4452_v5 = vsel %vm228_vm3, %v7203_v60, %v4451_v27 }
 0xc66   :  { %5346 = vadd.xlane.f32.xlu1 %v5345_v52  ;;  %v5316_v48 = vmul.f32 1.442695, %v5285_v36  ;;  %v4528_v9 = vperm.slane %v4522_v56, %v7627_v14  ;;  %v4460_v16 = vperm.slane %v4452_v5, %v7615_v57  ;;  %v4487_v35 = vrot.slane %v4444_v38, 4 }
 0xc67   :  { %v4450_v49 = vsel %vm228_vm3, %v4449_v53, %v4396_v47  ;;  %v4516_v45 = vperm.slane %v4510_v63, %v7627_v14  ;;  %v4537_v43 = vrot.slane %v4520_v13, 4  ;;  %v4545_v51 = vrot.slane %v4532_v23, 4 }
 0xc68   :  { %7318 = vpow2.f32 %v5316_v48  ;;  %v4456_v19 = vperm.slane %v4450_v49, %v7615_v57  ;;  %v4497_v33 = vrot.slane %v4460_v16, 4  ;;  %v4500_v41 = vsel %vm228_vm3, %v4460_v16, %v4499_v37 }
 0xc69   :  { %v4508_v32 = vperm.slane %v4500_v41, %v7627_v14  ;;  %v4541_v22 = vrot.slane %v4528_v9, 4  ;;  %v4533_v7 = vrot.slane %v4516_v45, 4 }
 0xc6a   :  { %v4485_v39 = vrot.slane %v4456_v19, 4  ;;  %v4488_v4 = vsel %vm228_vm3, %v4456_v19, %v4487_v35  ;;  %v4498_v8 = vsel %vm228_vm3, %v4497_v33, %v4448_v40 }
 0xc6b   :  { %v4496_v47 = vperm.slane %v4488_v4, %v7627_v14  ;;  %v4504_v61 = vperm.slane %v4498_v8, %v7627_v14  ;;  %v4546_v3 = vsel %vm228_vm3, %v4545_v51, %v4508_v32  ;;  %v4547_v20 = vrot.slane %v4508_v32, 4 }
 0xc6c   :  { %4397 = vrot.lane.b32.xlu2 %v9116_v10, %s7396_s29  ;;  %v4486_v2 = vsel %vm228_vm3, %v4485_v39, %v4444_v38  ;;  %v4685_v12 = vrot.slane %v4546_v3, 4  ;;  %s10276_s29 = smov 24  }
 0xc6d   :  { %v4492_v21 = vperm.slane %v4486_v2, %v7627_v14  ;;  %v4538_v27 = vsel %vm228_vm3, %v4537_v43, %v4496_v47  ;;  %v4539_v58 = vrot.slane %v4496_v47, 4  ;;  %v4542_v40 = vsel %vm228_vm3, %v4541_v22, %v4504_v61 }
 0xc6e   :  { %v9751_v62 = vpop.eup %7318  ;;  %v4543_v56 = vrot.slane %v4504_v61, 4  ;;  %v4548_v60 = vsel %vm228_vm3, %v4532_v23, %v4547_v20  ;;  %v4661_v52 = vrot.slane %v4538_v27, 4  ;;  %v4687_v36 = vrot.slane %v4542_v40, 4 }
 0xc6f   :  { %v4535_v63 = vrot.slane %v4492_v21, 4  ;;  %v4540_v53 = vsel %vm228_vm3, %v4520_v13, %v4539_v58  ;;  %v4697_v5 = vrot.slane %v4548_v60, 4  ;;  %v5363_v38 = vsel %vm5221_vm11, %v9751_v62, 0.0 }
 0xc70   :  { %v4688_v48 = vsel %vm228_vm3, %v4546_v3, %v4687_v36  ;;  %5364 = vadd.xlane.f32.xlu1 %v5363_v38  ;;  %v4534_v37 = vsel %vm228_vm3, %v4533_v7, %v4492_v21  ;;  %v4544_v16 = vsel %vm228_vm3, %v4528_v9, %v4543_v56  ;;  %v4673_v35 = vrot.slane %v4540_v53, 4 }
 0xc71   :  { %v4536_v49 = vsel %vm228_vm3, %v4516_v45, %v4535_v63  ;;  %v4662_v23 = vsel %vm228_vm3, %v4661_v52, %v4534_v37  ;;  %v4663_v19 = vrot.slane %v4534_v37, 4  ;;  %v4686_v33 = vsel %vm228_vm3, %v4685_v12, %v4542_v40 }
 0xc72   :  { %v4668_v13 = vperm.slane %v4662_v23, %v7615_v57  ;;  %v4674_v41 = vsel %vm228_vm3, %v4673_v35, %v4536_v49  ;;  %v4675_v43 = vrot.slane %v4536_v49, 4  ;;  %v4692_v51 = vperm.slane %v4686_v33, %v7615_v57 }
 0xc73   :  { %v4680_v32 = vperm.slane %v4674_v41, %v7615_v57  ;;  %v4698_v22 = vsel %vm228_vm3, %v4697_v5, %v4544_v16  ;;  %v4699_v9 = vrot.slane %v4544_v16, 4  ;;  %v4664_v39 = vsel %vm228_vm3, %v4538_v27, %v4663_v19 }
 0xc74   :  { %v4704_v45 = vperm.slane %v4698_v22, %v7615_v57  ;;  %v4711_v4 = vrot.slane %v4668_v13, 4  ;;  %v4735_v8 = vrot.slane %v4692_v51, 4  ;;  %v4672_v47 = vperm.slane %v4664_v39, %v7615_v57 }
 0xc75   :  { %v4709_v61 = vrot.slane %v4680_v32, 4  ;;  %v4676_v3 = vsel %vm228_vm3, %v4540_v53, %v4675_v43  ;;  %v4696_v20 = vperm.slane %v4688_v48, %v7615_v57  ;;  %v4700_v7 = vsel %vm228_vm3, %v4548_v60, %v4699_v9 }
 0xc76   :  { %v4712_v2 = vsel %vm228_vm3, %v4680_v32, %v4711_v4  ;;  %v4736_v12 = vsel %vm228_vm3, %v4704_v45, %v4735_v8  ;;  %v4733_v21 = vrot.slane %v4704_v45, 4  ;;  %v4684_v27 = vperm.slane %v4676_v3, %v7615_v57 }
 0xc77   :  { %v4720_v58 = vperm.slane %v4712_v2, %v7627_v14  ;;  %v4744_v40 = vperm.slane %v4736_v12, %v7627_v14  ;;  %v4710_v56 = vsel %vm228_vm3, %v4709_v61, %v4668_v13  ;;  %v4708_v52 = vperm.slane %v4700_v7, %v7615_v57 }
 0xc78   :  { %v4716_v36 = vperm.slane %v4710_v56, %v7627_v14  ;;  %v4734_v63 = vsel %vm228_vm3, %v4733_v21, %v4692_v51  ;;  %v4723_v60 = vrot.slane %v4672_v47, 4  ;;  %v4747_v53 = vrot.slane %v4696_v20, 4 }
 0xc79   :  { %v4761_v5 = vrot.slane %v4744_v40, 4  ;;  %v4740_v38 = vperm.slane %v4734_v63, %v7627_v14  ;;  %v4763_v48 = vrot.slane %v4720_v58, 4  ;;  %v4721_v37 = vrot.slane %v4684_v27, 4 }
 0xc7a   :  { %v4724_v16 = vsel %vm228_vm3, %v4684_v27, %v4723_v60  ;;  %v4748_v35 = vsel %vm228_vm3, %v4708_v52, %v4747_v53  ;;  %v4759_v49 = vrot.slane %v4716_v36, 4  ;;  %v4745_v23 = vrot.slane %v4708_v52, 4 }
 0xc7b   :  { %v4762_v19 = vsel %vm228_vm3, %v4761_v5, %v4720_v58  ;;  %v4757_v33 = vrot.slane %v4740_v38, 4  ;;  %v4764_v13 = vsel %vm228_vm3, %v4744_v40, %v4763_v48  ;;  %v4732_v41 = vperm.slane %v4724_v16, %v7627_v14 }
 0xc7c   :  { %v4887_v43 = vpack.c.bf16 %v4762_v19, %v4762_v19  ;;  %v4888_v51 = vpack.c.bf16 %v4764_v13, %v4764_v13  ;;  %v4756_v32 = vperm.slane %v4748_v35, %v7627_v14  ;;  %v4760_v22 = vsel %vm228_vm3, %v4740_v38, %v4759_v49 }
 0xc7d   :  { %v4758_v9 = vsel %vm228_vm3, %v4757_v33, %v4716_v36  ;;  %v4886_v39 = vpack.c.bf16 %v4760_v22, %v4760_v22  ;;  %v4722_v45 = vsel %vm228_vm3, %v4721_v37, %v4672_v47  ;;  %v4746_v4 = vsel %vm228_vm3, %v4745_v23, %v4696_v20 }
 0xc7e   :  { %v5456_v8 = vsel %vm75_vm0, %v4887_v43, 0  ;;  %v4885_v61 = vpack.c.bf16 %v4758_v9, %v4758_v9  ;;  %v5475_v3 = vsel %vm75_vm0, %v4888_v51, 0  ;;  %v4769_v7 = vrot.slane %v4756_v32, 4 }
 0xc7f   :  { %5465 = vmatpush.bf16.msra.mxu1 %v5456_v8  ;;  %5484 = vmatpush.bf16.msra.mxu2 %v5475_v3  ;;  %v5437_v2 = vsel %vm75_vm0, %v4886_v39, 0  ;;  %v4728_v12 = vperm.slane %v4722_v45, %v7627_v14  ;;  %v4752_v21 = vperm.slane %v4746_v4, %v7627_v14  ;;  %v4771_v27 = vrot.slane %v4732_v41, 4 }
 0xc80   :  { %v5418_v58 = vsel %vm75_vm0, %v4885_v61, 0  ;;  %v4770_v47 = vsel %vm228_vm3, %v4769_v7, %v4732_v41  ;;  %5446 = vmatpush.bf16.msra.mxu3 %v5437_v2  ;;  %v5263_v41 = vpop.xlane.xlu2 %5262 }
 0xc81   :  { %5427 = vmatpush.bf16.msra.mxu0 %v5418_v58  ;;  %v4891_v20 = vpack.c.bf16 %v4770_v47, %v4770_v47  ;;  %v4765_v40 = vrot.slane %v4752_v21, 4  ;;  %v4772_v56 = vsel %vm228_vm3, %v4756_v32, %v4771_v27  ;;  %v4767_v52 = vrot.slane %v4728_v12, 4 }
 0xc82   :  { %v4892_v36 = vpack.c.bf16 %v4772_v56, %v4772_v56  ;;  %v5283_v22 = vsub.f32 %v9607_v18, %v5263_v41 }
 0xc83   :  { %v5532_v63 = vsel %vm75_vm0, %v4891_v20, 0  ;;  %v4766_v60 = vsel %vm228_vm3, %v4765_v40, %v4728_v12  ;;  %v4768_v53 = vsel %vm228_vm3, %v4752_v21, %v4767_v52 }
 0xc84   :  { %5541 = vmatpush.bf16.msrb.mxu1 %v5532_v63  ;;  %v4889_v5 = vpack.c.bf16 %v4766_v60, %v4766_v60  ;;  %v5551_v38 = vsel %vm75_vm0, %v4892_v36, 0  ;;  %v4890_v48 = vpack.c.bf16 %v4768_v53, %v4768_v53  ;;  %v7189_v63 = vunpack.i.h.bf16 %v9635_v24 }
 0xc85   :  { %5560 = vmatpush.bf16.msrb.mxu2 %v5551_v38  ;;  %v4551_v24 = vrot.slane %v9116_v10, 4 }
 0xc86   :  { %v5494_v37 = vsel %vm75_vm0, %v4889_v5, 0  ;;  %v5513_v16 = vsel %vm75_vm0, %v4890_v48, 0  ;;  %v4549_v38 = vrot.slane %v7189_v63, 4 }
 0xc87   :  { %5503 = vmatpush.bf16.msrb.mxu0 %v5494_v37  ;;  %5522 = vmatpush.bf16.msrb.mxu3 %v5513_v16 }
 0xc8c   :  { %v5254_v35 = vpop.xlane.xlu1 %5253 }
 0xc8d   :  { %v5257_v49 = vpop.xlane.xlu0 %5256  ;;  %v5280_v33 = vsub.f32 %v9611_v0, %v5254_v35 }
 0xc8e   :  { %v5281_v23 = vsub.f32 %v9613_v17, %v5257_v49  ;;  %v5312_v17 = vmul.f32 1.442695, %v5283_v22  ;;  %v7204_v49 = vunpack.i.h.bf16 %v9721_v50  ;;  %v4628_v22 = vperm.slane %v9706_v29, %v7627_v14 }
 0xc8f   :  { %v5306_v43 = vmul.f32 1.442695, %v5280_v33 }
 0xc90   :  { %v5308_v19 = vmul.f32 1.442695, %v5281_v23  ;;  %v4552_v23 = vsel %vm228_vm3, %v7189_v63, %v4551_v24 }
 0xc92   :  { %7320 = vpow2.f32 %v5308_v19 }
 0xc93   :  { %7322 = vpow2.f32 %v5306_v43  ;;  %v4632_v43 = vperm.slane %v9699_v54, %v7627_v14 }
 0xc94   :  { %v5260_v13 = vpop.xlane.xlu1 %5259 }
 0xc95   :  { %v5248_v51 = vpop.xlane.xlu0 %5247  ;;  %v5282_v18 = vsub.f32 %v9619_v15, %v5260_v13  ;;  %v4561_v13 = vrot.slane %v7204_v49, 4 }
 0xc96   :  { %v5278_v32 = vsub.f32 %v9621_v6, %v5248_v51 }
 0xc97   :  { %v5310_v2 = vmul.f32 1.442695, %v5282_v18  ;;  %v4640_v18 = vperm.slane %v9717_v25, %v7627_v14 }
 0xc98   :  { %v9815_v9 = vpop.eup %7320  ;;  %v5302_v39 = vmul.f32 1.442695, %v5278_v32 }
 0xc99   :  { %v5351_v45 = vsel %vm5221_vm11, %v9815_v9, 0.0  ;;  %v9820_v8 = vpop.eup %7322 }
 0xc9a   :  { %7324 = vpow2.f32 %v5302_v39  ;;  %5352 = vadd.xlane.f32.xlu0 %v5351_v45  ;;  %v5348_v3 = vsel %vm5221_vm11, %v9820_v8, 0.0 }
 0xc9b   :  { %7326 = vpow2.f32 %v5312_v17  ;;  %v4644_v17 = vperm.slane %v9709_v11, %v7627_v14  ;;  %v4645_v11 = vrot.slane %v4628_v22, 4 }
 0xc9c   :  { %v5266_v0 = vpop.xlane.xlu1 %5265 }
 0xc9d   :  { %v5284_v4 = vsub.f32 %v9627_v30, %v5266_v0 }
 0xc9f   :  { %v5314_v61 = vmul.f32 1.442695, %v5284_v4 }
 0xca0   :  { %v9822_v6 = vpop.eup %7324 }
 0xca1   :  { %7328 = vpow2.f32 %v5314_v61  ;;  %v5342_v7 = vsel %vm5221_vm11, %v9822_v6, 0.0  ;;  %v9829_v12 = vpop.eup %7326 }
 0xca2   :  { %5349 = vadd.xlane.f32.xlu0 %v5348_v3  ;;  %5343 = vadd.xlane.f32.xlu2 %v5342_v7  ;;  %7330 = vpow2.f32 %v5310_v2  ;;  %v5357_v15 = vsel %vm5221_vm11, %v9829_v12, 0.0 }
 0xca7   :  { %v9831_v30 = vpop.eup %7328 }
 0xca8   :  { %v5360_v21 = vsel %vm5221_vm11, %v9831_v30, 0.0  ;;  %v9837_v27 = vpop.eup %7330 }
 0xca9   :  { %5361 = vadd.xlane.f32.xlu1 %v5360_v21  ;;  %v5354_v58 = vsel %vm5221_vm11, %v9837_v27, 0.0 }
 0xcaa   :  { %5358 = vadd.xlane.f32.xlu0 %v5357_v15  ;;  %v4649_v15 = vrot.slane %v4632_v43, 4 }
 0xcb2   :  { %5355 = vadd.xlane.f32.xlu0 %v5354_v58  ;;  %v4657_v58 = vrot.slane %v4644_v17, 4 }
 0xcb7   :  { %v5320_v47 = vpop.xlane.xlu1 %5319 }
 0xcb8   :  { %7332 = vrcp.f32 %v5320_v47  ;;  %v5323_v20 = vpop.xlane.xlu0 %5322 }
 0xcb9   :  { %7334 = vrcp.f32 %v5323_v20 }
 0xcbe   :  { %v7333_v40 = vpop.eup %7332 }
 0xcbf   :  { %v7335_v56 = vpop.eup %7334  ;;  %v5382_v52 = vmul.f32 %v7333_v40, %v9642_v1  ;;  %v5329_v36 = vpop.xlane.xlu2 %5328  ;;  %v4550_v1 = vsel %vm228_vm3, %v4549_v38, %v9116_v10 }
 0xcc0   :  { %v5383_v60 = vmul.f32 %v7335_v56, %v9645_v34  ;;  %7336 = vrcp.f32 %v5329_v36  ;;  %v4556_v19 = vperm.slane %v4550_v1, %v7615_v57 }
 0xcc1   :  { %v5398_v53 = vpack.c.bf16 %v5382_v52, %v5382_v52 }
 0xcc2   :  { %v5399_v5 = vpack.c.bf16 %v5383_v60, %v5383_v60  ;;  %v4599_v41 = vrot.slane %v4556_v19, 4  ;;  %v4653_v60 = vrot.slane %v4640_v18, 4 }
 0xcc3   :  { %6755 = vmatmul.msk.bf16.vlgmr.msra.gmra.mxu0 %vm71_vm1, %v5398_v53 }
 0xcc4   :  { %6756 = vmatmul.msk.bf16.vlgmr.msra.gmra.mxu3 %vm71_vm1, %v5399_v5 }
 0xcc6   :  { %v7337_v48 = vpop.eup %7336 }
 0xcc7   :  { %v5385_v37 = vmul.f32 %v7337_v48, %v9652_v26  ;;  %v5326_v16 = vpop.xlane.xlu2 %5325  ;;  %v4560_v26 = vperm.slane %v4552_v23, %v7615_v57 }
 0xcc8   :  { %7338 = vrcp.f32 %v5326_v16 }
 0xcc9   :  { %v5401_v35 = vpack.c.bf16 %v5385_v37, %v5385_v37  ;;  %v5335_v34 = vpop.xlane.xlu1 %5334 }
 0xcca   :  { %7340 = vrcp.f32 %v5335_v34 }
 0xccb   :  { %6758 = vmatmul.msk.bf16.vlgmr.msra.gmra.mxu2 %vm71_vm1, %v5401_v35 }
 0xcce   :  { %v7339_v33 = vpop.eup %7338 }
 0xccf   :  { %v5384_v10 = vmul.f32 %v7339_v33, %v9658_v31  ;;  %v5341_v51 = vpop.xlane.xlu0 %5340  ;;  %v4398_v32 = vpop.permute.xlu2 %4397  ;;  %v4611_v31 = vrot.slane %v4560_v26, 4 }
 0xcd0   :  { %v7341_v50 = vpop.eup %7340  ;;  %7342 = vrcp.f32 %v5341_v51  ;;  %v4562_v39 = vsel %vm228_vm3, %v4561_v13, %v4398_v32  ;;  %v4563_v45 = vrot.slane %v4398_v32, 4 }
 0xcd1   :  { %v5400_v0 = vpack.c.bf16 %v5384_v10, %v5384_v10  ;;  %v5387_v4 = vmul.f32 %v7341_v50, %v9666_v44  ;;  %v4568_v54 = vperm.slane %v4562_v39, %v7615_v57  ;;  %v5332_v61 = vpop.xlane.xlu1 %5331 }
 0xcd2   :  { %v4564_v3 = vsel %vm228_vm3, %v7204_v49, %v4563_v45  ;;  %7344 = vrcp.f32 %v5332_v61 }
 0xcd3   :  { %v5403_v29 = vpack.c.bf16 %v5387_v4, %v5387_v4  ;;  %v4572_v7 = vperm.slane %v4564_v3, %v7615_v57  ;;  %v4597_v2 = vrot.slane %v4568_v54, 4  ;;  %v4600_v21 = vsel %vm228_vm3, %v4568_v54, %v4599_v41  ;;  %6757 = vmatmul.msk.bf16.vlgmr.msra.gmra.mxu1 %vm71_vm1, %v5400_v0 }
 0xcd4   :  { %v4608_v44 = vperm.slane %v4600_v21, %v7627_v14 }
 0xcd5   :  { %v4598_v47 = vsel %vm228_vm3, %v4597_v2, %v4556_v19  ;;  %v4609_v20 = vrot.slane %v4572_v7, 4  ;;  %v4612_v25 = vsel %vm228_vm3, %v4572_v7, %v4611_v31  ;;  %6760 = vmatmul.msk.bf16.vlgmr.msrb.gmra.mxu3 %vm71_vm1, %v5403_v29 }
 0xcd6   :  { %v7343_v40 = vpop.eup %7342  ;;  %v4604_v56 = vperm.slane %v4598_v47, %v7627_v14  ;;  %v4620_v52 = vperm.slane %v4612_v25, %v7627_v14  ;;  %v4650_v36 = vsel %vm228_vm3, %v4649_v15, %v4608_v44  ;;  %v4651_v63 = vrot.slane %v4608_v44, 4 }
 0xcd7   :  { %v5389_v53 = vmul.f32 %v7343_v40, %v9680_v28  ;;  %v4610_v5 = vsel %vm228_vm3, %v4609_v20, %v4560_v26  ;;  %v4773_v38 = vrot.slane %v4650_v36, 4  ;;  %v5338_v13 = vpop.xlane.xlu0 %5337 }
 0xcd8   :  { %v4616_v48 = vperm.slane %v4610_v5, %v7627_v14  ;;  %v4646_v37 = vsel %vm228_vm3, %v4645_v11, %v4604_v56  ;;  %v4647_v16 = vrot.slane %v4604_v56, 4  ;;  %v4652_v1 = vsel %vm228_vm3, %v4632_v43, %v4651_v63  ;;  %v7345_v23 = vpop.eup %7344 }
 0xcd9   :  { %v5405_v24 = vpack.c.bf16 %v5389_v53, %v5389_v53  ;;  %v4658_v35 = vsel %vm228_vm3, %v4657_v58, %v4620_v52  ;;  %v4659_v34 = vrot.slane %v4620_v52, 4  ;;  %v4774_v49 = vsel %vm228_vm3, %v4773_v38, %v4646_v37  ;;  %v5347_v0 = vpop.xlane.xlu1 %5346 }
 0xcda   :  { %v4648_v19 = vsel %vm228_vm3, %v4628_v22, %v4647_v16  ;;  %v4654_v28 = vsel %vm228_vm3, %v4653_v60, %v4616_v48  ;;  %v4655_v33 = vrot.slane %v4616_v48, 4  ;;  %v4775_v26 = vrot.slane %v4646_v37, 4 }
 0xcdb   :  { %v4660_v41 = vsel %vm228_vm3, %v4644_v17, %v4659_v34  ;;  %v4780_v10 = vperm.slane %v4774_v49, %v7615_v57  ;;  %v4785_v51 = vrot.slane %v4652_v1, 4  ;;  %v4787_v43 = vrot.slane %v4648_v19, 4  ;;  %6762 = vmatmul.msk.bf16.vlgmr.msrb.gmra.mxu2 %vm71_vm1, %v5405_v24 }
 0xcdc   :  { %v4776_v32 = vsel %vm228_vm3, %v4650_v36, %v4775_v26  ;;  %v4797_v50 = vrot.slane %v4658_v35, 4  ;;  %v4799_v39 = vrot.slane %v4654_v28, 4  ;;  %v4809_v45 = vrot.slane %v4660_v41, 4 }
 0xcdd   :  { %v9892_v22 = vperm.slane %v4776_v32, %v7615_v57  ;;  %v4788_v4 = vsel %vm228_vm3, %v4652_v1, %v4787_v43  ;;  %v5386_v54 = vmul.f32 %v7345_v23, %v9676_v59  ;;  %7346 = vrcp.f32 %v5338_v13 }
 0xcde   :  { %7348 = vrcp.f32 %v5347_v0  ;;  %v4656_v17 = vsel %vm228_vm3, %v4640_v18, %v4655_v33  ;;  %v4786_v61 = vsel %vm228_vm3, %v4785_v51, %v4648_v19  ;;  %v4798_v31 = vsel %vm228_vm3, %v4797_v50, %v4654_v28 }
 0xcdf   :  { %v5402_v3 = vpack.c.bf16 %v5386_v54, %v5386_v54  ;;  %v4792_v29 = vperm.slane %v4786_v61, %v7615_v57  ;;  %v4804_v7 = vperm.slane %v4798_v31, %v7615_v57  ;;  %v4810_v2 = vsel %vm228_vm3, %v4809_v45, %v4656_v17 }
 0xce0   :  { %v4811_v21 = vrot.slane %v4656_v17, 4  ;;  %v4816_v11 = vperm.slane %v4810_v2, %v7615_v57  ;;  %v4823_v15 = vrot.slane %v4780_v10, 4  ;;  %v4796_v59 = vperm.slane %v4788_v4, %v7615_v57 }
 0xce1   :  { %6759 = vmatmul.msk.bf16.vlgmr.msrb.gmra.mxu0 %vm71_vm1, %v5402_v3  ;;  %v4847_v18 = vrot.slane %v4804_v7, 4  ;;  %v4821_v44 = vrot.slane %v4792_v29, 4  ;;  %v4800_v58 = vsel %vm228_vm3, %v4658_v35, %v4799_v39  ;;  %v4835_v47 = vrot.slane %v9892_v22, 4 }
 0xce2   :  { %v4824_v20 = vsel %vm228_vm3, %v4792_v29, %v4823_v15  ;;  %v4845_v25 = vrot.slane %v4816_v11, 4  ;;  %v4812_v40 = vsel %vm228_vm3, %v4660_v41, %v4811_v21  ;;  %v4808_v60 = vperm.slane %v4800_v58, %v7615_v57 }
 0xce3   :  { %v7347_v56 = vpop.eup %7346  ;;  %v4832_v52 = vperm.slane %v4824_v20, %v7627_v14  ;;  %v4848_v36 = vsel %vm228_vm3, %v4816_v11, %v4847_v18  ;;  %v4822_v63 = vsel %vm228_vm3, %v4821_v44, %v4780_v10  ;;  %v4820_v24 = vperm.slane %v4812_v40, %v7615_v57 }
 0xce4   :  { %v7349_v53 = vpop.eup %7348  ;;  %v5388_v5 = vmul.f32 %v7347_v56, %v9695_v42  ;;  %v4856_v38 = vperm.slane %v4848_v36, %v7627_v14  ;;  %v4828_v48 = vperm.slane %v4822_v63, %v7627_v14  ;;  %v4846_v37 = vsel %vm228_vm3, %v4845_v25, %v4804_v7 }
 0xce5   :  { %v4875_v16 = vrot.slane %v4832_v52, 4  ;;  %v4852_v1 = vperm.slane %v4846_v37, %v7627_v14  ;;  %v4836_v35 = vsel %vm228_vm3, %v4796_v59, %v4835_v47  ;;  %v5391_v42 = vmul.f32 %v7349_v53, %v9719_v46  ;;  %v5365_v37 = vpop.xlane.xlu1 %5364 }
 0xce6   :  { %v5404_v34 = vpack.c.bf16 %v5388_v5, %v5388_v5  ;;  %v4871_v49 = vrot.slane %v4828_v48, 4  ;;  %v4873_v23 = vrot.slane %v4856_v38, 4  ;;  %v4844_v19 = vperm.slane %v4836_v35, %v7627_v14 }
 0xce7   :  { %v4876_v28 = vsel %vm228_vm3, %v4856_v38, %v4875_v16  ;;  %v4859_v33 = vrot.slane %v4808_v60, 4  ;;  %v4869_v26 = vrot.slane %v4852_v1, 4  ;;  %v4833_v0 = vrot.slane %v4796_v59, 4 }
 0xce8   :  { %6761 = vmatmul.msk.bf16.vlgmr.msrb.gmra.mxu1 %vm71_vm1, %v5404_v34  ;;  %v4896_v13 = vpack.c.bf16 %v4876_v28, %v4876_v28  ;;  %v4872_v41 = vsel %vm228_vm3, %v4852_v1, %v4871_v49  ;;  %v4874_v10 = vsel %vm228_vm3, %v4873_v23, %v4832_v52  ;;  %v4883_v51 = vrot.slane %v4844_v19, 4 }
 0xce9   :  { %v4894_v43 = vpack.c.bf16 %v4872_v41, %v4872_v41  ;;  %v4895_v32 = vpack.c.bf16 %v4874_v10, %v4874_v10  ;;  %v4860_v50 = vsel %vm228_vm3, %v4820_v24, %v4859_v33  ;;  %v4870_v45 = vsel %vm228_vm3, %v4869_v26, %v4828_v48 }
 0xcea   :  { %v5627_v39 = vsel %vm75_vm0, %v4896_v13, 0  ;;  %v4868_v46 = vperm.slane %v4860_v50, %v7627_v14  ;;  %v4893_v17 = vpack.c.bf16 %v4870_v45, %v4870_v45  ;;  %v4857_v61 = vrot.slane %v4820_v24, 4 }
 0xceb   :  { %5636 = vmatpush.bf16.msra.mxu2 %v5627_v39  ;;  %v5589_v4 = vsel %vm75_vm0, %v4894_v43, 0  ;;  %v5608_v54 = vsel %vm75_vm0, %v4895_v32, 0  ;;  %v5407_v31 = vpack.c.bf16 %v5391_v42, %v5391_v42  ;;  %v4834_v29 = vsel %vm228_vm3, %v4833_v0, %v9892_v22 }
 0xcec   :  { %5598 = vmatpush.bf16.msra.mxu3 %v5589_v4  ;;  %5617 = vmatpush.bf16.msra.mxu1 %v5608_v54  ;;  %v4884_v3 = vsel %vm228_vm3, %v4868_v46, %v4883_v51  ;;  %v4881_v7 = vrot.slane %v4868_v46, 4  ;;  %v5570_v21 = vsel %vm75_vm0, %v4893_v17, 0  ;;  %v4840_v11 = vperm.slane %v4834_v29, %v7627_v14 }
 0xced   :  { %v4900_v2 = vpack.c.bf16 %v4884_v3, %v4884_v3  ;;  %v4858_v15 = vsel %vm228_vm3, %v4857_v61, %v4808_v60  ;;  %5579 = vmatpush.bf16.msra.mxu0 %v5570_v21 }
 0xcee   :  { %v4864_v59 = vperm.slane %v4858_v15, %v7627_v14  ;;  %v4882_v18 = vsel %vm228_vm3, %v4881_v7, %v4844_v19  ;;  %v4879_v58 = vrot.slane %v4840_v11, 4 }
 0xcef   :  { %v5703_v44 = vsel %vm75_vm0, %v4900_v2, 0  ;;  %v4899_v47 = vpack.c.bf16 %v4882_v18, %v4882_v18  ;;  %6764 = vmatmul.msk.bf16.vlgmr.msra.gmra.mxu3 %vm71_vm1, %v5407_v31 }
 0xcf0   :  { %5712 = vmatpush.bf16.msrb.mxu2 %v5703_v44  ;;  %v4877_v22 = vrot.slane %v4864_v59, 4  ;;  %v4880_v20 = vsel %vm228_vm3, %v4864_v59, %v4879_v58 }
 0xcf1   :  { %v5684_v25 = vsel %vm75_vm0, %v4899_v47, 0  ;;  %v4898_v40 = vpack.c.bf16 %v4880_v20, %v4880_v20 }
 0xcf2   :  { %5693 = vmatpush.bf16.msrb.mxu1 %v5684_v25  ;;  %v4878_v56 = vsel %vm228_vm3, %v4877_v22, %v4840_v11 }
 0xcf3   :  { %v4897_v52 = vpack.c.bf16 %v4878_v56, %v4878_v56  ;;  %v5665_v36 = vsel %vm75_vm0, %v4898_v40, 0 }
 0xcf4   :  { %5674 = vmatpush.bf16.msrb.mxu3 %v5665_v36 }
 0xcf5   :  { %v5646_v63 = vsel %vm75_vm0, %v4897_v52, 0 }
 0xcf6   :  { %5655 = vmatpush.bf16.msrb.mxu0 %v5646_v63 }
 0xd0d   :  { %v5353_v60 = vpop.xlane.xlu0 %5352 }
 0xd0e   :  { %7350 = vrcp.f32 %v5353_v60 }
 0xd14   :  { %v7351_v53 = vpop.eup %7350 }
 0xd15   :  { %v5393_v5 = vmul.f32 %v7351_v53, %v9815_v9  ;;  %v5350_v38 = vpop.xlane.xlu0 %5349  ;;  %v5344_v48 = vpop.xlane.xlu2 %5343 }
 0xd16   :  { %7352 = vrcp.f32 %v5350_v38 }
 0xd17   :  { %v5409_v16 = vpack.c.bf16 %v5393_v5, %v5393_v5  ;;  %7354 = vrcp.f32 %v5344_v48 }
 0xd18   :  { %7356 = vrcp.f32 %v5365_v37 }
 0xd19   :  { %6766 = vmatmul.msk.bf16.vlgmr.msra.gmra.mxu2 %vm71_vm1, %v5409_v16 }
 0xd1c   :  { %v7353_v1 = vpop.eup %7352  ;;  %v5362_v19 = vpop.xlane.xlu1 %5361 }
 0xd1d   :  { %v7355_v24 = vpop.eup %7354  ;;  %v5392_v35 = vmul.f32 %v7353_v1, %v9820_v8  ;;  %v5359_v34 = vpop.xlane.xlu0 %5358 }
 0xd1e   :  { %v5390_v49 = vmul.f32 %v7355_v24, %v9822_v6  ;;  %7358 = vrcp.f32 %v5359_v34  ;;  %v7357_v9 = vpop.eup %7356 }
 0xd1f   :  { %v5408_v23 = vpack.c.bf16 %v5392_v35, %v5392_v35  ;;  %7360 = vrcp.f32 %v5362_v19  ;;  %v5397_v28 = vmul.f32 %v7357_v9, %v9751_v62 }
 0xd20   :  { %v5406_v42 = vpack.c.bf16 %v5390_v49, %v5390_v49 }
 0xd21   :  { %6765 = vmatmul.msk.bf16.vlgmr.msra.gmra.mxu1 %vm71_vm1, %v5408_v23  ;;  %v5413_v8 = vpack.c.bf16 %v5397_v28, %v5397_v28 }
 0xd22   :  { %6763 = vmatmul.msk.bf16.vlgmr.msra.gmra.mxu0 %vm71_vm1, %v5406_v42 }
 0xd24   :  { %v7359_v33 = vpop.eup %7358 }
 0xd25   :  { %v5395_v26 = vmul.f32 %v7359_v33, %v9829_v12  ;;  %v5356_v13 = vpop.xlane.xlu0 %5355  ;;  %v7361_v6 = vpop.eup %7360 }
 0xd26   :  { %7362 = vrcp.f32 %v5356_v13  ;;  %v5396_v10 = vmul.f32 %v7361_v6, %v9831_v30 }
 0xd27   :  { %v5411_v41 = vpack.c.bf16 %v5395_v26, %v5395_v26 }
 0xd28   :  { %v5412_v32 = vpack.c.bf16 %v5396_v10, %v5396_v10 }
 0xd29   :  { %6768 = vmatmul.msk.bf16.vlgmr.msrb.gmra.mxu3 %vm71_vm1, %v5411_v41  ;;  %6770 = vmatmul.msk.bf16.vlgmr.msrb.gmra.mxu2 %vm71_vm1, %v5413_v8 }
 0xd2c   :  { %v7363_v51 = vpop.eup %7362 }
 0xd2d   :  { %v5394_v43 = vmul.f32 %v7363_v51, %v9837_v27 }
 0xd2f   :  { %v5410_v50 = vpack.c.bf16 %v5394_v43, %v5394_v43 }
 0xd31   :  { %6769 = vmatmul.msk.bf16.vlgmr.msrb.gmra.mxu1 %vm71_vm1, %v5412_v32 }
 0xd32   :  { %6767 = vmatmul.msk.bf16.vlgmr.msrb.gmra.mxu0 %vm71_vm1, %v5410_v50 }
 0xd40   :  { %v5429_v62 = vpop.f32.mrf.mxu0 }
 0xd47   :  { %v5448_v12 = vpop.f32.mrf.mxu3 }
 0xd48   :  { %v5431_v39 = vpop.f32.mrf.mxu0 }
 0xd4e   :  { %v5486_v46 = vpop.f32.mrf.mxu2 }
 0xd4f   :  { %v5724_v45 = vrot.slane %v5486_v46, 4  ;;  %v5450_v0 = vpop.f32.mrf.mxu3 }
 0xd50   :  { %v5467_v4 = vpop.f32.mrf.mxu1 }
 0xd51   :  { %v5725_v54 = vsel %vm228_vm3, %v5724_v45, %v5448_v12  ;;  %v5718_v17 = vrot.slane %v5467_v4, 4 }
 0xd52   :  { %v5729_v30 = vperm.slane %v5725_v54, %v7615_v57 }
 0xd53   :  { %v5719_v27 = vsel %vm228_vm3, %v5718_v17, %v5429_v62 }
 0xd54   :  { %v5742_v61 = vrot.slane %v5729_v30, 4  ;;  %v5723_v31 = vperm.slane %v5719_v27, %v7615_v57 }
 0xd56   :  { %v5743_v3 = vsel %vm228_vm3, %v5742_v61, %v5723_v31  ;;  %v5744_v29 = vrot.slane %v5723_v31, 4  ;;  %v5488_v7 = vpop.f32.mrf.mxu2 }
 0xd57   :  { %v5749_v52 = vperm.slane %v5743_v3, %v7627_v14 }
 0xd58   :  { %v5745_v2 = vsel %vm228_vm3, %v5729_v30, %v5744_v29  ;;  %v5469_v21 = vpop.f32.mrf.mxu1  ;;  %v5524_v11 = vpop.f32.mrf.mxu3 }
 0xd59   :  { %v5753_v60 = vperm.slane %v5745_v2, %v7627_v14  ;;  %v5768_v38 = vrot.slane %v5749_v52, 4 }
 0xd5b   :  { %v5772_v1 = vrot.slane %v5753_v60, 4 }
 0xd5e   :  { %v5505_v15 = vpop.f32.mrf.mxu0  ;;  %v5562_v59 = vpop.f32.mrf.mxu2 }
 0xd5f   :  { %v5736_v18 = vrot.slane %v5562_v59, 4 }
 0xd60   :  { %v5526_v44 = vpop.f32.mrf.mxu3 }
 0xd61   :  { %v5737_v58 = vsel %vm228_vm3, %v5736_v18, %v5524_v11 }
 0xd62   :  { %v5741_v47 = vperm.slane %v5737_v58, %v7615_v57 }
 0xd64   :  { %v5754_v56 = vrot.slane %v5741_v47, 4 }
 0xd65   :  { %v5543_v22 = vpop.f32.mrf.mxu1 }
 0xd66   :  { %v5730_v20 = vrot.slane %v5543_v22, 4  ;;  %v5507_v25 = vpop.f32.mrf.mxu0  ;;  %v5564_v40 = vpop.f32.mrf.mxu2 }
 0xd68   :  { %v5731_v36 = vsel %vm228_vm3, %v5730_v20, %v5505_v15 }
 0xd69   :  { %v5735_v63 = vperm.slane %v5731_v36, %v7615_v57 }
 0xd6b   :  { %v5755_v53 = vsel %vm228_vm3, %v5754_v56, %v5735_v63  ;;  %v5756_v5 = vrot.slane %v5735_v63, 4 }
 0xd6c   :  { %v5761_v48 = vperm.slane %v5755_v53, %v7627_v14 }
 0xd6d   :  { %v5757_v37 = vsel %vm228_vm3, %v5741_v47, %v5756_v5  ;;  %v5545_v16 = vpop.f32.mrf.mxu1 }
 0xd6e   :  { %v5765_v24 = vperm.slane %v5757_v37, %v7627_v14  ;;  %v5766_v35 = vrot.slane %v5761_v48, 4  ;;  %v5769_v34 = vsel %vm228_vm3, %v5761_v48, %v5768_v38 }
 0xd6f   :  { %v5844_v49 = vrot.slane %v5769_v34, 4 }
 0xd70   :  { %v5767_v23 = vsel %vm228_vm3, %v5766_v35, %v5749_v52  ;;  %v5770_v19 = vrot.slane %v5765_v24, 4  ;;  %v5773_v9 = vsel %vm228_vm3, %v5765_v24, %v5772_v1 }
 0xd71   :  { %v5832_v42 = vrot.slane %v5767_v23, 4  ;;  %v5842_v28 = vrot.slane %v5773_v9, 4  ;;  %v5845_v33 = vsel %vm228_vm3, %v5773_v9, %v5844_v49 }
 0xd72   :  { %v5600_v26 = vpop.f32.mrf.mxu3  ;;  %v5771_v13 = vsel %vm228_vm3, %v5770_v19, %v5753_v60  ;;  %v5853_v8 = vperm.slane %v5845_v33, %v7615_v57 }
 0xd73   :  { %v5830_v41 = vrot.slane %v5771_v13, 4  ;;  %v5833_v6 = vsel %vm228_vm3, %v5771_v13, %v5832_v42  ;;  %v5843_v10 = vsel %vm228_vm3, %v5842_v28, %v5769_v34 }
 0xd74   :  { %v5841_v51 = vperm.slane %v5833_v6, %v7615_v57  ;;  %v5890_v43 = vrot.slane %v5853_v8, 4  ;;  %v5849_v32 = vperm.slane %v5843_v10, %v7615_v57 }
 0xd75   :  { %v5831_v50 = vsel %vm228_vm3, %v5830_v41, %v5767_v23 }
 0xd76   :  { %v9989_v62 = vsel %vm228_vm3, %v5890_v43, %v5841_v51  ;;  %v5837_v12 = vperm.slane %v5831_v50, %v7615_v57  ;;  %v5878_v39 = vrot.slane %v5849_v32, 4  ;;  %v5892_v46 = vrot.slane %v5841_v51, 4 }
 0xd78   :  { %v9993_v45 = vsel %vm228_vm3, %v5878_v39, %v5837_v12  ;;  %v5880_v0 = vrot.slane %v5837_v12, 4  ;;  %v9996_v4 = vsel %vm228_vm3, %v5853_v8, %v5892_v46 }
 0xd7a   :  { %v5602_v54 = vpop.f32.mrf.mxu3  ;;  %v9999_v17 = vsel %vm228_vm3, %v5849_v32, %v5880_v0 }
 0xd9c   :  { %v5638_v30 = vpop.f32.mrf.mxu2 }
 0xd9d   :  { %v5780_v61 = vrot.slane %v5638_v30, 4 }
 0xd9e   :  { %v5619_v27 = vpop.f32.mrf.mxu1 }
 0xd9f   :  { %v5581_v31 = vpop.f32.mrf.mxu0  ;;  %v5774_v3 = vrot.slane %v5619_v27, 4  ;;  %v5781_v29 = vsel %vm228_vm3, %v5780_v61, %v5600_v26  ;;  %v5885_v27 = vperm.slane %v9993_v45, %v7627_v14 }
 0xda0   :  { %v5785_v21 = vperm.slane %v5781_v29, %v7615_v57 }
 0xda1   :  { %v5775_v2 = vsel %vm228_vm3, %v5774_v3, %v5581_v31  ;;  %v5928_v45 = vrot.slane %v5885_v27, 4 }
 0xda2   :  { %v5779_v59 = vperm.slane %v5775_v2, %v7615_v57  ;;  %v5798_v18 = vrot.slane %v5785_v21, 4 }
 0xda4   :  { %v5640_v7 = vpop.f32.mrf.mxu2  ;;  %v5800_v44 = vrot.slane %v5779_v59, 4  ;;  %v5799_v20 = vsel %vm228_vm3, %v5798_v18, %v5779_v59 }
 0xda5   :  { %v5805_v60 = vperm.slane %v5799_v20, %v7627_v14  ;;  %v5889_v7 = vperm.slane %v9999_v17, %v7627_v14 }
 0xda6   :  { %v5621_v11 = vpop.f32.mrf.mxu1  ;;  %v5801_v36 = vsel %vm228_vm3, %v5785_v21, %v5800_v44 }
 0xda7   :  { %v5583_v15 = vpop.f32.mrf.mxu0  ;;  %v5809_v48 = vperm.slane %v5801_v36, %v7627_v14  ;;  %v5824_v35 = vrot.slane %v5805_v60, 4  ;;  %v5897_v11 = vperm.slane %v9989_v62, %v7627_v14 }
 0xda9   :  { %v5828_v19 = vrot.slane %v5809_v48, 4 }
 0xdac   :  { %v5676_v58 = vpop.f32.mrf.mxu3  ;;  %v5714_v47 = vpop.f32.mrf.mxu2 }
 0xdad   :  { %v5792_v22 = vrot.slane %v5714_v47, 4  ;;  %v5932_v47 = vrot.slane %v5889_v7, 4 }
 0xdae   :  { %v5695_v25 = vpop.f32.mrf.mxu1 }
 0xdaf   :  { %v5793_v40 = vsel %vm228_vm3, %v5792_v22, %v5676_v58  ;;  %v5657_v56 = vpop.f32.mrf.mxu0  ;;  %v5786_v52 = vrot.slane %v5695_v25, 4  ;;  %v5936_v22 = vrot.slane %v5897_v11, 4 }
 0xdb0   :  { %v5797_v63 = vperm.slane %v5793_v40, %v7615_v57 }
 0xdb1   :  { %v5787_v53 = vsel %vm228_vm3, %v5786_v52, %v5657_v56  ;;  %v5901_v52 = vperm.slane %v9996_v4, %v7627_v14  ;;  %v6986_v4 = vld [vmem:[%s10241_s6 + $0x28] sm:$0xff] }
 0xdb2   :  { %v5810_v5 = vrot.slane %v5797_v63, 4  ;;  %v5791_v38 = vperm.slane %v5787_v53, %v7615_v57 }
 0xdb4   :  { %v5811_v37 = vsel %vm228_vm3, %v5810_v5, %v5791_v38  ;;  %v5812_v16 = vrot.slane %v5791_v38, 4  ;;  %v5678_v1 = vpop.f32.mrf.mxu3  ;;  %v5716_v24 = vpop.f32.mrf.mxu2  ;;  %v6988_v38 = vld [vmem:[%s10241_s6 + $0x38] sm:$0xff] }
 0xdb5   :  { %v5817_v34 = vperm.slane %v5811_v37, %v7627_v14  ;;  %6023 = vmatpush.bf16.msra.mxu0 %v6988_v38  ;;  %v6818_v38 = vld [vmem:[%s10245_s10 + $0x50] sm:$0xf] }
 0xdb6   :  { %v5813_v49 = vsel %vm228_vm3, %v5797_v63, %v5812_v16  ;;  %v5697_v23 = vpop.f32.mrf.mxu1  ;;  %v5940_v63 = vrot.slane %v5901_v52, 4 }
 0xdb7   :  { %v5821_v9 = vperm.slane %v5813_v49, %v7627_v14  ;;  %v5822_v42 = vrot.slane %v5817_v34, 4  ;;  %v5825_v28 = vsel %vm228_vm3, %v5817_v34, %v5824_v35  ;;  %v5659_v33 = vpop.f32.mrf.mxu0 }
 0xdb8   :  { %v5868_v26 = vrot.slane %v5825_v28, 4 }
 0xdb9   :  { %v5823_v13 = vsel %vm228_vm3, %v5822_v42, %v5805_v60  ;;  %v5826_v8 = vrot.slane %v5821_v9, 4  ;;  %v5829_v41 = vsel %vm228_vm3, %v5821_v9, %v5828_v19 }
 0xdba   :  { %v5856_v6 = vrot.slane %v5823_v13, 4  ;;  %v5866_v10 = vrot.slane %v5829_v41, 4  ;;  %v5869_v51 = vsel %vm228_vm3, %v5829_v41, %v5868_v26 }
 0xdbb   :  { %v5827_v43 = vsel %vm228_vm3, %v5826_v8, %v5809_v48  ;;  %v5877_v32 = vperm.slane %v5869_v51, %v7615_v57  ;;  %v6985_v48 = vld [vmem:[%s10241_s6 + $0x20] sm:$0xff] }
 0xdbc   :  { %v5857_v50 = vsel %vm228_vm3, %v5827_v43, %v5856_v6  ;;  %v5854_v12 = vrot.slane %v5827_v43, 4  ;;  %v5867_v39 = vsel %vm228_vm3, %v5866_v10, %v5825_v28  ;;  %v7218_v6 = vld [vmem:[%s10242_s7 + $0x1] ss:$0 sm:$0xff] }
 0xdbd   :  { %v5865_v46 = vperm.slane %v5857_v50, %v7615_v57  ;;  %v5914_v0 = vrot.slane %v5877_v32, 4  ;;  %v5873_v54 = vperm.slane %v5867_v39, %v7615_v57  ;;  %v3485_v43 = vld [vmem:[#allocation1 + $0x1] ss:$2 sm:$0xff] }
 0xdbe   :  { %v5855_v30 = vsel %vm228_vm3, %v5854_v12, %v5823_v13  ;;  %v3488_v12 = vld [vmem:[#allocation1 + $0x11] ss:$2 sm:$0xff] }
 0xdbf   :  { %v5915_v61 = vsel %vm228_vm3, %v5914_v0, %v5865_v46  ;;  %v5861_v31 = vperm.slane %v5855_v30, %v7615_v57  ;;  %v5902_v3 = vrot.slane %v5873_v54, 4  ;;  %v5916_v62 = vrot.slane %v5865_v46, 4 }
 0xdc0   :  { %v5921_v29 = vperm.slane %v5915_v61, %v7627_v14  ;;  %v7412_v30 = vmov 839922192   ;;  %v7413_v61 = vmov 1985246804  }
 0xdc1   :  { %v5903_v2 = vsel %vm228_vm3, %v5902_v3, %v5861_v31  ;;  %v5904_v21 = vrot.slane %v5861_v31, 4  ;;  %v5917_v25 = vsel %vm228_vm3, %v5877_v32, %v5916_v62  ;;  %v6058_v31 = vunpack.c.l.s4 %v7413_v61  ;;  %v6995_v62 = vld [vmem:[%s10245_s10 + $0x74] sm:$0xf] }
 0xdc2   :  { %v5934_v15 = vrot.slane %v5921_v29, 4  ;;  %v5909_v59 = vperm.slane %v5903_v2, %v7627_v14  ;;  %v5937_v40 = vsel %vm228_vm3, %v5921_v29, %v5936_v22  ;;  %v5925_v36 = vperm.slane %v5917_v25, %v7627_v14  ;;  %v6836_v25 = vld [vmem:[%s10245_s10 + $0x78] sm:$0xf0] }
 0xdc3   :  { %v5905_v18 = vsel %vm228_vm3, %v5873_v54, %v5904_v21  ;;  %v10086_v29 = vunpack.c.0.s8 %v6058_v31 }
 0xdc4   :  { %v5935_v57 = vsel %vm228_vm3, %v5934_v15, %v5897_v11  ;;  %v5929_v44 = vsel %vm228_vm3, %v5909_v59, %v5928_v45  ;;  %v5913_v58 = vperm.slane %v5905_v18, %v7627_v14  ;;  %v5938_v60 = vrot.slane %v5925_v36, 4  ;;  %v6987_v14 = vld [vmem:[%s10241_s6 + $0x30] sm:$0xff] }
 0xdc5   :  { %5955 = vrot.lane.b32.xlu2 %v5935_v57, %s10274_s27  ;;  %5943 = vrot.lane.b32.xlu1 %v5929_v44, %s10275_s28  ;;  %v5941_v53 = vsel %vm228_vm3, %v5925_v36, %v5940_v63  ;;  %v5926_v1 = vrot.slane %v5909_v59, 4  ;;  %v6993_v36 = vld [vmem:[%s10245_s10 + $0x64] sm:$0xf]  ;;  %v6828_v63 = vld [vmem:[%s10245_s10 + $0x68] sm:$0xf0] }
 0xdc6   :  { %v5933_v17 = vsel %vm228_vm3, %v5913_v58, %v5932_v47  ;;  %v5930_v20 = vrot.slane %v5913_v58, 4  ;;  %v5939_v5 = vsel %vm228_vm3, %v5938_v60, %v5901_v52  ;;  %6024 = vmatpush.bf16.msra.mxu0 %v6987_v14  ;;  %v6834_v47 = vld [vmem:[%s10245_s10 + $0x70] sm:$0xf]  ;;  %v6839_v52 = vor.u32 %v6995_v62, %v6836_v25  ;;  %v6992_v14 = vld [vmem:[%s10245_s10 + $0x54] sm:$0xf0] }
 0xdc7   :  { %5951 = vrot.lane.b32.xlu0 %v5933_v17, %s10276_s29  ;;  %v5927_v24 = vsel %vm228_vm3, %v5926_v1, %v5885_v27  ;;  %v6054_v27 = vunpack.c.l.s4 %v7412_v30  ;;  %v6996_v17 = vld [vmem:[%s10245_s10 + $0x74] sm:$0xf0]  ;;  %v6810_v1 = vld [vmem:[%s10245_s10 + $0x40] sm:$0xf] }
 0xdc8   :  { %v5931_v56 = vsel %vm228_vm3, %v5930_v20, %v5889_v7  ;;  %v6835_v20 = vor.u32 %v6996_v17, %v6834_v47  ;;  %6200 = vmatpush.bf16.msra.mxu1 %v6839_v52  ;;  %v7008_v30 = vld [vmem:[%s10247_s12 + $0xd8] sm:$0xff]  ;;  %v6998_v47 = vld [vmem:[%s10247_s12 + $0x88] sm:$0xff]  ;;  %v6997_v17 = vld [vmem:[%s10247_s12 + $0x80] sm:$0xff] }
 0xdc9   :  { %v10084_v3 = vunpack.c.0.s8 %v6054_v27  ;;  %v6807_v62 = vld [vmem:[%s10246_s11 + $0x2] sm:$0x3] }
 0xdca   :  { %6025 = vmatpush.bf16.msra.mxu0 %v6986_v4  ;;  %6187 = vmatpush.bf16.msra.mxu3 %v6835_v20  ;;  %v6991_v4 = vld [vmem:[%s10245_s10 + $0x54] sm:$0xf] }
 0xdcd   :  { %5959 = vrot.lane.b32.xlu1 %v5937_v40, %s10277_s30  ;;  %v6826_v40 = vld [vmem:[%s10245_s10 + $0x60] sm:$0xf] }
 0xdce   :  { %6026 = vmatpush.bf16.msra.mxu0 %v6985_v48  ;;  %v6820_v48 = vld [vmem:[%s10245_s10 + $0x58] sm:$0xf0] }
 0xdcf   :  { %5947 = vrot.lane.b32.xlu0 %v5931_v56, %s10278_s19  ;;  %v6994_v56 = vld [vmem:[%s10245_s10 + $0x64] sm:$0xf0] }
 0xdd5   :  { %5967 = vrot.lane.b32.xlu1 %v5941_v53, %s10279_s1  ;;  %v6827_v53 = vor.u32 %v6994_v56, %v6826_v40  ;;  %v6136_v56 = vperm.slane %v6807_v62, 0 }
 0xdd7   :  { %5963 = vrot.lane.b32.xlu0 %v5939_v5, %s10280_s25  ;;  %v6831_v5 = vor.u32 %v6993_v36, %v6828_v63  ;;  %6188 = vmatpush.bf16.msra.mxu3 %v6827_v53 }
 0xdd9   :  { %6201 = vmatpush.bf16.msra.mxu1 %v6831_v5 }
 0xe1f   :  { %v5956_v9 = vpop.permute.xlu2 %5955 }
 0xe37   :  { %v5944_v37 = vpop.permute.xlu1 %5943 }
 0xe38   :  { %v5970_v34 = vsel %vm71_vm1, %v5927_v24, %v5944_v37  ;;  %v6819_v37 = vor.u32 %v6992_v14, %v6818_v38  ;;  %v6990_v24 = vld [vmem:[%s10245_s10 + $0x44] sm:$0xf0] }
 0xe39   :  { %v5952_v16 = vpop.permute.xlu0 %5951 }
 0xe3a   :  { %6189 = vmatpush.bf16.msra.mxu3 %v6819_v37 }
 0xe3f   :  { %v5960_v35 = vpop.permute.xlu1 %5959 }
 0xe41   :  { %v5948_v49 = vpop.permute.xlu0 %5947 }
 0xe42   :  { %v5971_v23 = vsel %vm3034_vm4, %v5970_v34, %v5948_v49  ;;  %v6812_v34 = vld [vmem:[%s10245_s10 + $0x48] sm:$0xf0]  ;;  %v7012_v49 = vld [vmem:[%s10247_s12 + $0xf8] sm:$0xff] }
 0xe43   :  { %v5972_v19 = vsel %vm3037_vm5, %v5971_v23, %v5952_v16  ;;  %v6823_v16 = vor.u32 %v6991_v4, %v6820_v48  ;;  %v7004_v23 = vld [vmem:[%s10247_s12 + $0xb8] sm:$0xff]  ;;  %6360 = vmatpush.bf16.msrb.mxu0 %v7012_v49  ;;  %v7221_v48 = vld [vmem:[%s10248_s13 + $0x1] ss:$0 sm:$0xff] }
 0xe44   :  { %v5973_v42 = vsel %vm3040_vm6, %v5972_v19, %v5956_v9  ;;  %v6811_v9 = vor.u32 %v6990_v24, %v6810_v1  ;;  %6347 = vmatpush.bf16.msra.mxu2 %v7004_v23  ;;  %vm6463_vm6 = vcmask 519168  }
 0xe45   :  { %v5974_v33 = vsel %vm3043_vm7, %v5973_v42, %v5960_v35  ;;  %v6989_v35 = vld [vmem:[%s10245_s10 + $0x44] sm:$0xf]  ;;  %6202 = vmatpush.bf16.msra.mxu1 %v6823_v16  ;;  %vm6485_vm7 = vcmask 1041409  }
 0xe46   :  { %6190 = vmatpush.bf16.msra.mxu3 %v6811_v9 }
 0xe47   :  { %v5968_v26 = vpop.permute.xlu1 %5967 }
 0xe49   :  { %v5964_v28 = vpop.permute.xlu0 %5963 }
 0xe4a   :  { %v5975_v13 = vsel %vm3046_vm8, %v5974_v33, %v5964_v28  ;;  %v6815_v28 = vor.u32 %v6989_v35, %v6812_v34  ;;  %v7011_v33 = vld [vmem:[%s10247_s12 + $0xf0] sm:$0xff]  ;;  %vm6488_vm8 = vcmask 25600  }
 0xe4b   :  { %v5976_v8 = vsel %vm3049_vm9, %v5975_v13, %v5968_v26  ;;  %v7003_v26 = vld [vmem:[%s10247_s12 + $0xb0] sm:$0xff]  ;;  %6361 = vmatpush.bf16.msrb.mxu0 %v7011_v33 }
 0xe4c   :  { %v5988_v41 = vpack.c.bf16 %v5976_v8, %v5976_v8  ;;  %6203 = vmatpush.bf16.msra.mxu1 %v6815_v28  ;;  %6348 = vmatpush.bf16.msra.mxu2 %v7003_v26 }
 0xe4e   :  { %6796 = vmatmul.msk.bf16.vlgmr.msra.gmra.mxu0 %vm151_vm2, %v5988_v41  ;;  %v7010_v41 = vld [vmem:[%s10247_s12 + $0xe8] sm:$0xff] }
 0xe4f   :  { %6362 = vmatpush.bf16.msrb.mxu0 %v7010_v41 }
 0xecb   :  { %v6028_v10 = vpop.f32.mrf.mxu0 }
 0xecc   :  { %v6029_v51 = vadd.f32 %v7218_v6, %v6028_v10  ;;  %v7002_v6 = vld [vmem:[%s10247_s12 + $0xa8] sm:$0xff] }
 0xecd   :  { %6349 = vmatpush.bf16.msra.mxu2 %v7002_v6 }
 0xece   :  { %v6033_v32 = vrot.slane %v6029_v51, 4  ;;  %v6035_v50 = vadd.f32 %v6029_v51, %v3485_v43  ;;  %v7219_v51 = vld [vmem:[%s10243_s8 + $0x1] ss:$0 sm:$0xff]  ;;  %s6497_s8 = sshll.u32 %s10253_s18, 4  ;;  %s6498_s8 = int_to_ptr.hbm [resolvable:$true] %s6497_s8 }
 0xed0   :  { %v6036_v39 = vadd.f32 %v6033_v32, %v3488_v12  ;;  %6043 = vst [vmem:[#allocation1] ss:$2 sm:$0xff] %v6035_v50  ;;  %v7009_v32 = vld [vmem:[%s10247_s12 + $0xe0] sm:$0xff] }
 0xed1   :  { %v7001_v12 = vld [vmem:[%s10247_s12 + $0xa0] sm:$0xff]  ;;  %6363 = vmatpush.bf16.msrb.mxu0 %v7009_v32 }
 0xed2   :  { %6045 = vst [vmem:[#allocation1 + $0x1] ss:$2 sm:$0xff] %v6036_v39  ;;  %6350 = vmatpush.bf16.msra.mxu2 %v7001_v12 }
 0xed3   :  { %v6030_v46 = vpop.f32.mrf.mxu0 }
 0xed4   :  { %v6105_v46 = vrot.slane %v7219_v51, 4 }
 0xed5   :  { %6364 = vmatpush.bf16.msrb.mxu0 %v7008_v30 }
 0xed9   :  { %v6046_v0 = vld.sshfl [vmem:[#allocation1] sm:$0xff pattern:$0x75316420] }
 0xeda   :  { %v6048_v54 = vsel %vm151_vm2, %v6046_v0, 0.0 }
 0xedb   :  { %6049 = vadd.xlane.f32.xlu0 %v6048_v54 }
 0xf4e   :  { %v6050_v7 = vpop.xlane.xlu0 %6049 }
 0xf4f   :  { %v6051_v2 = vmul.f32 %v6050_v7, %v8856_v55  ;;  %v7000_v7 = vld [vmem:[%s10247_s12 + $0x98] sm:$0xff] }
 0xf50   :  { %6351 = vmatpush.bf16.msra.mxu2 %v7000_v7 }
 0xf51   :  { %v6056_v21 = vperm.slane %v6051_v2, %v10084_v3  ;;  %v6060_v11 = vperm.slane %v6051_v2, %v10086_v29 }
 0xf53   :  { %v10091_v15 = vsub.f32 %v6035_v50, %v6056_v21  ;;  %v10093_v59 = vsub.f32 %v6036_v39, %v6060_v11  ;;  %v7220_v50 = vld [vmem:[%s10244_s9 + $0x1] ss:$0 sm:$0xff]  ;;  %v7007_v11 = vld [vmem:[%s10247_s12 + $0xd0] sm:$0xff] }
 0xf54   :  { %v6112_v27 = vrot.slane %v7220_v50, 4  ;;  %6365 = vmatpush.bf16.msrb.mxu0 %v7007_v11 }
 0xf55   :  { %v6065_v45 = vmul.f32 %v10091_v15, %v10091_v15  ;;  %v6066_v18 = vmul.f32 %v10093_v59, %v10093_v59 }
 0xf57   :  { %6069 = vst [vmem:[#allocation1] ss:$2 sm:$0xff] %v6065_v45 }
 0xf58   :  { %6071 = vst [vmem:[#allocation1 + $0x1] ss:$2 sm:$0xff] %v6066_v18 }
 0xf5f   :  { %v6072_v57 = vld.sshfl [vmem:[#allocation1] sm:$0xff pattern:$0x75316420] }
 0xf60   :  { %v6074_v44 = vsel %vm151_vm2, %v6072_v57, 0.0  ;;  %v7006_v57 = vld [vmem:[%s10247_s12 + $0xc8] sm:$0xff] }
 0xf61   :  { %6075 = vadd.xlane.f32.xlu1 %v6074_v44  ;;  %v6999_v44 = vld [vmem:[%s10247_s12 + $0x90] sm:$0xff]  ;;  %6366 = vmatpush.bf16.msrb.mxu0 %v7006_v57 }
 0xf62   :  { %6352 = vmatpush.bf16.msra.mxu2 %v6999_v44 }
 0xf66   :  { %6353 = vmatpush.bf16.msra.mxu2 %v6998_v47 }
 0xf6a   :  { %6354 = vmatpush.bf16.msra.mxu2 %v6997_v17 }
 0xfd4   :  { %v6076_v58 = vpop.xlane.xlu1 %6075 }
 0xfd5   :  { %v6077_v22 = vmul.f32 %v6076_v58, %v8856_v55  ;;  %v7005_v58 = vld [vmem:[%s10247_s12 + $0xc0] sm:$0xff] }
 0xfd6   :  { %6367 = vmatpush.bf16.msrb.mxu0 %v7005_v58 }
 0xfd7   :  { %v6078_v60 = vadd.f32 1e-05, %v6077_v22  ;;  %v6137_v22 = vperm.slane %v6807_v62, 1 }
 0xfd9   :  { %7364 = vrsqrt.f32 %v6078_v60  ;;  %vm6085_vm1 = vweird.f32 %v6078_v60 }
 0xfdf   :  { %v7365_v19 = vpop.eup %7364 }
 0xfe0   :  { %v6080_v42 = vmul.f32 %v7365_v19, %v6078_v60  ;;  %vm6086_vm0 = vweird.f32 %v7365_v19 }
 0xfe1   :  { %vm6087_vm3 = vmor %vm6085_vm1, %vm6086_vm0 }
 0xfe2   :  { %v6081_v13 = vmul.f32 %v7365_v19, %v6080_v42 }
 0xfe4   :  { %v6082_v8 = vmul.f32 0.5, %v6081_v13 }
 0xfe6   :  { %v6083_v10 = vsub.f32 1.5, %v6082_v8 }
 0xfe8   :  { %v6084_v43 = vmul.f32 %v7365_v19, %v6083_v10 }
 0xfea   :  { %v6088_v39 = vsel %vm6087_vm3, %v7365_v19, %v6084_v43 }
 0xfeb   :  { %v6093_v0 = vperm.slane %v6088_v39, %v10084_v3  ;;  %v6097_v54 = vperm.slane %v6088_v39, %v10086_v29 }
 0xfed   :  { %v6100_v61 = vmul.f32 %v6093_v0, %v10091_v15  ;;  %v6101_v31 = vmul.f32 %v6097_v54, %v10093_v59 }
 0xfef   :  { %v6107_v2 = vmul.f32 %v7219_v51, %v6100_v61  ;;  %v6108_v21 = vmul.f32 %v6105_v46, %v6101_v31  ;;  %v7414_v51 = vmov 0  }
 0xff0   :  { %7210 = vset.pattern.permute.xlu0 %v7414_v51 }
 0xff1   :  { %v6114_v45 = vadd.f32 %v7220_v50, %v6107_v2  ;;  %v6115_v18 = vadd.f32 %v6112_v27, %v6108_v21  ;;  %v7225_v50 = vld [vmem:[#allocation2] ss:$0 sm:$0xff]  ;;  %v7222_v27 = vld [vmem:[%s10249_s14 + $0x1] ss:$0 sm:$0xff]  ;;  %s7415_s14 = smov [#allocation3]  }
 0xff2   :  { %v6446_v21 = vrot.slane %v7222_v27, 4 }
 0xff3   :  { %6129 = vst [vmem:[#allocation1] ss:$2 sm:$0xff] %v6114_v45 }
 0xff4   :  { %6131 = vst [vmem:[#allocation1 + $0x1] ss:$2 sm:$0xff] %v6115_v18 }
 0xffb   :  { %v6132_v15 = vld.sshfl [vmem:[#allocation1] sm:$0xff pattern:$0x75316420] }
 0xffc   :  { %v6134_v59 = vpack.c.bf16 %v6132_v15, %v6132_v15 }
 0xffe   :  { %6840 = vmatmul.msk.bf16.vlgmr.msra.gmra.mxu3 %vm151_vm2, %v6134_v59  ;;  %6841 = vmatmul.msk.bf16.vlgmr.msra.gmra.mxu1 %vm151_vm2, %v6134_v59  ;;  %v7224_v59 = vld [vmem:[%s10251_s16] ss:$0 sm:$0xff] }
0x107b   :  { %v6205_v20 = vpop.f32.mrf.mxu1 }
0x107c   :  { %v6206_v25 = vadd.f32 %v6205_v20, %v6137_v22 }
0x107e   :  { %v6210_v40 = vmax.f32 %v6206_v25, 0.0 }
0x1080   :  { %v6247_v52 = vpack.c.bf16 %v6210_v40, %v6210_v40 }
0x1081   :  { %v6192_v36 = vpop.f32.mrf.mxu3 }
0x1082   :  { %v6193_v63 = vadd.f32 %v6192_v36, %v6136_v56  ;;  %6368 = vmatmul.bf16.vlgmr.msrb.gmra.mxu0 %v6247_v52 }
0x1083   :  { %v6207_v60 = vpop.f32.mrf.mxu1 }
0x1084   :  { %v6209_v53 = vmax.f32 %v6193_v63, 0.0 }
0x1086   :  { %v6246_v5 = vpack.c.bf16 %v6209_v53, %v6209_v53 }
0x1088   :  { %6355 = vmatmul.bf16.vlgmr.msra.gmra.mxu2 %v6246_v5 }
0x1089   :  { %v6194_v38 = vpop.f32.mrf.mxu3 }
0x10ff   :  { %v6369_v14 = vpop.f32.mrf.mxu0 }
0x1107   :  { %v6371_v4 = vpop.f32.mrf.mxu0 }
0x110b   :  { %v6356_v37 = vpop.f32.mrf.mxu2 }
0x110c   :  { %v6357_v16 = vadd.f32 %v7221_v48, %v6356_v37 }
0x110e   :  { %v6370_v1 = vadd.f32 %v6369_v14, %v6357_v16 }
0x1110   :  { %v6374_v24 = vrot.slane %v6370_v1, 4  ;;  %v6376_v35 = vadd.f32 %v6370_v1, %v6114_v45 }
0x1112   :  { %v6377_v34 = vadd.f32 %v6374_v24, %v6115_v18  ;;  %6384 = vst [vmem:[#allocation1] ss:$2 sm:$0xff] %v6376_v35 }
0x1113   :  { %v6358_v49 = vpop.f32.mrf.mxu2 }
0x1114   :  { %6386 = vst [vmem:[#allocation1 + $0x1] ss:$2 sm:$0xff] %v6377_v34 }
0x111b   :  { %v6387_v23 = vld.sshfl [vmem:[#allocation1] sm:$0xff pattern:$0x75316420] }
0x111c   :  { %v6389_v19 = vsel %vm151_vm2, %v6387_v23, 0.0 }
0x111d   :  { %6390 = vadd.xlane.f32.xlu2 %v6389_v19 }
0x1190   :  { %v6391_v9 = vpop.xlane.xlu2 %6390 }
0x1191   :  { %v6392_v42 = vmul.f32 %v6391_v9, %v8856_v55 }
0x1193   :  { %v6397_v28 = vperm.slane %v6392_v42, %v10084_v3  ;;  %v6401_v33 = vperm.slane %v6392_v42, %v10086_v29 }
0x1195   :  { %v6404_v26 = vsub.f32 %v6376_v35, %v6397_v28  ;;  %v6405_v13 = vsub.f32 %v6377_v34, %v6401_v33 }
0x1197   :  { %v6406_v8 = vmul.f32 %v6404_v26, %v6404_v26  ;;  %v6407_v41 = vmul.f32 %v6405_v13, %v6405_v13 }
0x1199   :  { %6410 = vst [vmem:[#allocation1] ss:$2 sm:$0xff] %v6406_v8 }
0x119a   :  { %6412 = vst [vmem:[#allocation1 + $0x1] ss:$2 sm:$0xff] %v6407_v41 }
0x11a1   :  { %v6413_v6 = vld.sshfl [vmem:[#allocation1] sm:$0xff pattern:$0x75316420] }
0x11a2   :  { %v6415_v10 = vsel %vm151_vm2, %v6413_v6, 0.0 }
0x11a3   :  { %6416 = vadd.xlane.f32.xlu0 %v6415_v10 }
0x11b7   :  { %6474 = vperm.xlu0 %7210, %v7225_v50  }
0x1216   :  { %v6417_v43 = vpop.xlane.xlu0 %6416 }
0x1217   :  { %v6418_v32 = vmul.f32 %v6417_v43, %v8856_v55  ;;  %v7223_v55 = vld [vmem:[%s10250_s15 + $0x1] ss:$0 sm:$0xff]  ;;  %s6495_s15 = sshll.u32 %s7415_s14, 4  ;;  %s6496_s15 = int_to_ptr.vmem [resolvable:$true] %s6495_s15 }
0x1218   :  { %v6453_v45 = vrot.slane %v7223_v55, 4 }
0x1219   :  { %v6419_v12 = vadd.f32 1e-05, %v6418_v32 }
0x121b   :  { %7366 = vrsqrt.f32 %v6419_v12  ;;  %vm6426_vm2 = vweird.f32 %v6419_v12 }
0x1221   :  { %v7367_v39 = vpop.eup %7366 }
0x1222   :  { %v6421_v46 = vmul.f32 %v7367_v39, %v6419_v12  ;;  %vm6427_vm4 = vweird.f32 %v7367_v39 }
0x1223   :  { %vm6428_vm5 = vmor %vm6426_vm2, %vm6427_vm4 }
0x1224   :  { %v6422_v0 = vmul.f32 %v7367_v39, %v6421_v46 }
0x1226   :  { %v6423_v54 = vmul.f32 0.5, %v6422_v0 }
0x1228   :  { %v6424_v30 = vsub.f32 1.5, %v6423_v54 }
0x122a   :  { %v6425_v61 = vmul.f32 %v7367_v39, %v6424_v30 }
0x122c   :  { %v6429_v31 = vsel %vm6428_vm5, %v7367_v39, %v6425_v61 }
0x122d   :  { %v6434_v7 = vperm.slane %v6429_v31, %v10084_v3  ;;  %v6438_v2 = vperm.slane %v6429_v31, %v10086_v29  ;;  %v6481_v3 = vlaneseq  ;;  %v6475_v29 = vpop.permute.xlu0 %6474 }
0x122f   :  { %v6442_v11 = vmul.f32 %v6438_v2, %v6405_v13  ;;  %v6441_v18 = vmul.f32 %v6434_v7, %v6404_v26  ;;  %v6482_v20 = vand.u32 127, %v6481_v3 }
0x1231   :  { %v6449_v15 = vmul.f32 %v6446_v21, %v6442_v11  ;;  %v6448_v57 = vmul.f32 %v7222_v27, %v6441_v18 }
0x1233   :  { %v6456_v44 = vadd.f32 %v6453_v45, %v6449_v15  ;;  %v6455_v58 = vadd.f32 %v7223_v55, %v6448_v57 }
0x1235   :  { %v6462_v47 = vmul.f32 %v7224_v59, %v6456_v44  ;;  %v6461_v17 = vmul.f32 %v7224_v59, %v6455_v58 }
0x1237   :  { %v6467_v62 = vsel %vm6463_vm6, %v6462_v47, 0.0  ;;  %v6464_v22 = vsel %vm6463_vm6, %v6461_v17, 0.0 }
0x1238   :  { %6468 = vadd.xlane.f32.xlu2 %v6467_v62  ;;  %6465 = vadd.xlane.f32.xlu1 %v6464_v22 }
0x12ab   :  { %v6469_v25 = vpop.xlane.xlu2 %6468  ;;  %v6466_v40 = vpop.xlane.xlu1 %6465 }
0x12ac   :  { %v6477_v56 = vadd.f32 %v6475_v29, %v6466_v40  ;;  %v6478_v52 = vadd.f32 %v6475_v29, %v6469_v25 }
0x12ae   :  { %v6483_v36 = vperm.slane %v6477_v56, %v6482_v20  ;;  %v6484_v63 = vperm.slane %v6478_v52, %v6482_v20 }
0x12b0   :  { %v6486_v60 = vsel %vm6485_vm7, %v6484_v63, %v6483_v36 }
0x12b1   :  { %6489 = vst.msk [vmem:[#allocation3] sm:$0x3] %vm6488_vm8, %v6486_v60 }
0x12b2   :  { %6500 = dma.vmem_to_hbm [thread:$0]  %s6496_s15, 32, %s6498_s8, [#allocation4]  }
0x12b3   :  { %7392 = dma.done.wait [#allocation4], 32  }
0x12b4   :  { %7393 = vsyncadd [#allocation4], 4294967264 }
0x12b5   :  { %6505 = vsyncpa [#allocation4], 1 }

</bundles_post_ra>
